<compile_context>
chip_gen: v6e
topology: v6e:2x2x1
jax: 0.10.0
libtpu: 0.0.40
codegen_flags: <defaults>
</compile_context>

<pallas_src>
import functools

import jax
import jax.numpy as jnp
from jax import lax
from jax.experimental import pallas as pl
from jax.experimental.pallas import tpu as pltpu


def _round_up(x, m):
    return ((x + m - 1) // m) * m


# ----------------------------------------------------------------------------
# Pallas kernel: M x K tiled GEMM with the full weight panel VMEM-resident.
# bf16 operands on the MXU, f32 accumulation in a resident (tm, Np) scratch;
# fused (optional) bias + LeakyReLU(0.2) on the final K step.
# Refs: p_ref (tm, tk), w_ref (Kt, tk, Np) [resident], [b_ref (1, Np)],
#       o_ref (tm, Np), acc_ref (tm, Np) f32 scratch.
# ----------------------------------------------------------------------------
def _gemm_kernel(*refs, has_bias, apply_lrelu, neg_slope):
    if has_bias:
        p_ref, w_ref, b_ref, o_ref, acc_ref = refs
    else:
        p_ref, w_ref, o_ref, acc_ref = refs
        b_ref = None

    k = pl.program_id(1)

    @pl.when(k == 0)
    def _():
        acc_ref[...] = jnp.zeros_like(acc_ref)

    acc_ref[...] += jnp.dot(p_ref[...], w_ref[k],
                            preferred_element_type=jnp.float32)

    @pl.when(k == pl.num_programs(1) - 1)
    def _():
        y = acc_ref[...]
        if b_ref is not None:
            y = y + b_ref[...]
        if apply_lrelu:
            y = jnp.where(y >= 0, y, y * neg_slope)
        o_ref[...] = y.astype(o_ref.dtype)


# ----------------------------------------------------------------------------
# Glue: im2col from NHWC activations -> (N*Ho*Wo, k*k*Cin) bf16 patch matrix.
# K ordering is (kh, kw, cin); the weight matrix is flattened the same way.
# TODO(synk): fuse the patch gather into the kernel (row-slab + halo DMA from
# an NHWC activation kept in HBM) instead of materializing the replicated
# im2col matrix through HBM; that is the remaining biggest win on v5e/v6e.
# ----------------------------------------------------------------------------
def _im2col_nhwc(x, k, stride, pad):
    N, H, W, C = x.shape
    xp = jnp.pad(x, ((0, 0), (pad, pad), (pad, pad), (0, 0)))
    Ho = (H + 2 * pad - k) // stride + 1
    Wo = (W + 2 * pad - k) // stride + 1
    cols = []
    for i in range(k):
        for j in range(k):
            cols.append(xp[:, i:i + stride * Ho:stride,
                           j:j + stride * Wo:stride, :])
    p = jnp.concatenate(cols, axis=-1).reshape(N * Ho * Wo, k * k * C)
    return p, Ho, Wo


def conv2d_pallas(x, w, b=None, *, stride, pad, lrelu, neg_slope=0.2,
                  out_dtype=jnp.bfloat16):
    """x: (N, H, W, Cin) NHWC; w: (Cout, Cin, k, k) OIHW; b: (Cout,) or None.
    Returns (N, Ho, Wo, Cout) NHWC in out_dtype."""
    N, H, W, Cin = x.shape
    Cout, _, k, _ = w.shape

    # Pad input channels to a multiple of 8 so K = k*k*Cin_p is a multiple of
    # 128 (k == 4) -> no separate K padding of the patch matrix is needed.
    Cin_p = _round_up(Cin, 8)
    if Cin_p != Cin:
        x = jnp.pad(x, ((0, 0), (0, 0), (0, 0), (0, Cin_p - Cin)))
        w = jnp.pad(w, ((0, 0), (0, Cin_p - Cin), (0, 0), (0, 0)))

    x = x.astype(jnp.bfloat16)
    patches, Ho, Wo = _im2col_nhwc(x, k, stride, pad)     # (M, K) bf16
    M, K = patches.shape
    Np = _round_up(Cout, 128)                             # tn == Np (no j axis)

    wm = w.transpose(2, 3, 1, 0).reshape(K, Cout).astype(jnp.bfloat16)
    wm = jnp.pad(wm, ((0, 0), (0, Np - Cout)))

    # M tiling: up to 512 rows; keep >= 2 parallel blocks when M allows so
    # both v7x TensorCores get work.
    tm = min(512, _round_up(M, 8))
    if _round_up(M, tm) == tm and M > 128:
        tm = _round_up((M + 1) // 2, 8)
    Mp = _round_up(M, tm)
    if Mp != M:
        patches = jnp.pad(patches, ((0, Mp - M), (0, 0)))

    # K tiling (innermost, "arbitrary"); K is always a multiple of 128 here.
    tk = 512 if K % 512 == 0 else (256 if K % 256 == 0 else 128)
    Kt = K // tk
    w3 = wm.reshape(Kt, tk, Np)          # full panel -> VMEM-resident operand

    has_bias = b is not None
    inputs = [patches, w3]
    in_specs = [
        pl.BlockSpec((tm, tk), lambda i, kk: (i, kk)),
        # Constant index_map: DMA'd once, stays resident in VMEM.
        pl.BlockSpec((Kt, tk, Np), lambda i, kk: (0, 0, 0)),
    ]
    if has_bias:
        b_pad = jnp.pad(b.astype(jnp.float32), (0, Np - Cout)).reshape(1, Np)
        inputs.append(b_pad)
        in_specs.append(pl.BlockSpec((1, Np), lambda i, kk: (0, 0)))

    kernel = functools.partial(_gemm_kernel, has_bias=has_bias,
                               apply_lrelu=lrelu, neg_slope=neg_slope)

    cost = pl.CostEstimate(
        flops=2 * Mp * K * Np,
        transcendentals=0,
        bytes_accessed=(Mp * K + K * Np) * 2
                       + Mp * Np * jnp.dtype(out_dtype).itemsize)

    out = pl.pallas_call(
        kernel,
        out_shape=jax.ShapeDtypeStruct((Mp, Np), out_dtype),
        grid_spec=pltpu.PrefetchScalarGridSpec(
            num_scalar_prefetch=0,
            grid=(Mp // tm, Kt),
            in_specs=in_specs,
            out_specs=pl.BlockSpec((tm, Np), lambda i, kk: (i, 0)),
            scratch_shapes=[pltpu.VMEM((tm, Np), jnp.float32)],
        ),
        compiler_params=pltpu.CompilerParams(
            dimension_semantics=("parallel", "arbitrary"),
            vmem_limit_bytes=32 * 1024 * 1024),
        cost_estimate=cost,
    )(*inputs)

    return out[:M, :Cout].reshape(N, Ho, Wo, Cout)   # NHWC, no transpose needed


# ----------------------------------------------------------------------------
# Parameter setup (deterministic, synthetic): N(0, 0.02) weights, zero bias,
# spectral normalization via power iteration (weight / sigma) at init.
# ----------------------------------------------------------------------------
def _spectral_normalize(w, n_iter=5):
    cout = w.shape[0]
    wm = w.reshape(cout, -1)
    u = jax.random.normal(jax.random.PRNGKey(42), (cout,), jnp.float32)
    u = u / (jnp.linalg.norm(u) + 1e-12)
    v = None
    for _ in range(n_iter):
        v = wm.T @ u
        v = v / (jnp.linalg.norm(v) + 1e-12)
        u = wm @ v
        u = u / (jnp.linalg.norm(u) + 1e-12)
    sigma = u @ (wm @ v)
    return w / sigma


def init_params(key):
    specs = [(64, 3), (128, 64), (256, 128), (512, 256), (1, 512)]
    params = []
    for i, (co, ci) in enumerate(specs):
        key, sub = jax.random.split(key)
        w = 0.02 * jax.random.normal(sub, (co, ci, 4, 4), jnp.float32)
        if i < 4:                      # spectral_norm-wrapped, bias=False
            w = _spectral_normalize(w)
        b = jnp.zeros((co,), jnp.float32)
        params.append((w, b))
    return params


def discriminator_forward(params, x):
    """x: (N, 3, H, W) NCHW float32 -> (N, 1, Ho, Wo) NCHW float32."""
    strides = [2, 2, 2, 1, 1]
    x = x.transpose(0, 2, 3, 1)        # NCHW -> NHWC once
    n_layers = len(params)
    for i, (w, b) in enumerate(params):
        last = (i == n_layers - 1)
        x = conv2d_pallas(x, w, b if last else None,
                          stride=strides[i], pad=1,
                          lrelu=not last,
                          out_dtype=jnp.float32 if last else jnp.bfloat16)
    return x.transpose(0, 3, 1, 2)     # NHWC -> NCHW once


# Pure-JAX reference mirroring the kernel's numerics (bf16 operands on the
# conv, f32 accumulation, bf16 intermediate activations).
def _reference_forward(params, x):
    strides = [2, 2, 2, 1, 1]
    n_layers = len(params)
    for i, (w, b) in enumerate(params):
        y = lax.conv_general_dilated(
            x.astype(jnp.bfloat16), w.astype(jnp.bfloat16),
            (strides[i], strides[i]), ((1, 1), (1, 1)),
            dimension_numbers=('NCHW', 'OIHW', 'NCHW'),
            preferred_element_type=jnp.float32)
        y = y + b[None, :, None, None]
        if i < n_layers - 1:
            y = jnp.where(y >= 0, y, 0.2 * y).astype(jnp.bfloat16)
        x = y
    return x.astype(jnp.float32)


if __name__ == "__main__":
    key = jax.random.PRNGKey(0)
    k_in, k_par = jax.random.split(key)

    # Small but valid input: 32x32 -> 16 -> 8 -> 4 -> 3 -> 2
    x = jax.random.normal(k_in, (2, 3, 32, 32), jnp.float32)
    params = init_params(k_par)

    fwd = jax.jit(discriminator_forward)
    out = jax.block_until_ready(fwd(params, x))
    assert out.shape == (2, 1, 2, 2), out.shape

    ref = jax.block_until_ready(_reference_forward(params, x))
    err = float(jnp.max(jnp.abs(out.astype(jnp.float32) - ref)))
    assert jnp.allclose(out.astype(jnp.float32), ref, rtol=2e-2, atol=2e-2), err

    print("KERNEL_OK")
</pallas_src>

<mosaic_0001>
module attributes {stable_mosaic.version = 11 : i64} {
  func.func @_gemm_kernel(%arg0: i32, %arg1: i32, %arg2: memref<256x128xbf16, #tpu.memory_space<vmem>>, %arg3: memref<1x128x128xbf16, #tpu.memory_space<vmem>>, %arg4: memref<256x128xbf16, #tpu.memory_space<vmem>>, %arg5: memref<256x128xf32, #tpu.memory_space<vmem>>) attributes {dimension_semantics = [#tpu.dimension_semantics<parallel>, #tpu.dimension_semantics<arbitrary>], iteration_bounds = array<i64: 2, 1>, scalar_prefetch = 0 : i64, scratch_operands = 1 : i64, tpu.core_type = #tpu.core_type<tc>, window_params = [{transform_indices = @transform_0, window_bounds = array<i64: 256, 128>}, {pipeline_mode = #tpu.pipeline_mode<synchronous>, transform_indices = @transform_1, window_bounds = array<i64: 1, 128, 128>}, {transform_indices = @transform_2, window_bounds = array<i64: 256, 128>}]} {
    %c0_i32 = arith.constant 0 : i32
    %0 = arith.cmpi eq, %arg1, %c0_i32 : i32
    %1 = arith.extui %0 : i1 to i32
    %c0_i32_0 = arith.constant 0 : i32
    %2 = arith.cmpi ne, %1, %c0_i32_0 : i32
    scf.if %2 {
      %cst_10 = arith.constant 0.000000e+00 : f32
      %14 = vector.broadcast %cst_10 : f32 to vector<256x128xf32>
      %c0_11 = arith.constant 0 : index
      %c0_12 = arith.constant 0 : index
      %15 = vector.load %arg5[%c0_11, %c0_12] : memref<256x128xf32, #tpu.memory_space<vmem>>, vector<256x128xf32>
      tpu.vector_store %arg5[%c0_11, %c0_12], %14 {strides = array<i32>} : memref<256x128xf32, #tpu.memory_space<vmem>>, vector<256x128xf32>,
    } else {
    }
    %c0 = arith.constant 0 : index
    %c0_1 = arith.constant 0 : index
    %3 = vector.load %arg5[%c0, %c0_1] : memref<256x128xf32, #tpu.memory_space<vmem>>, vector<256x128xf32>
    %c0_2 = arith.constant 0 : index
    %c0_3 = arith.constant 0 : index
    %4 = vector.load %arg2[%c0_2, %c0_3] : memref<256x128xbf16, #tpu.memory_space<vmem>>, vector<256x128xbf16>
    %5 = arith.index_cast %arg1 : i32 to index
    %c0_4 = arith.constant 0 : index
    %c0_5 = arith.constant 0 : index
    %6 = vector.load %arg3[%5, %c0_4, %c0_5] : memref<1x128x128xbf16, #tpu.memory_space<vmem>>, vector<1x128x128xbf16>
    %7 = vector.shape_cast %6 : vector<1x128x128xbf16> to vector<128x128xbf16>
    %cst = arith.constant dense<0.000000e+00> : vector<256x128xf32>
    %8 = tpu.matmul %4, %7, %cst {dimension_numbers = #tpu.dot_dimension_numbers<[1], [0], [0], [1], [0, 0, 1, 1], [], []>} : vector<256x128xbf16>, vector<128x128xbf16>, vector<256x128xf32> -> vector<256x128xf32>
    %9 = arith.addf %3, %8 : vector<256x128xf32>
    %c0_6 = arith.constant 0 : index
    %c0_7 = arith.constant 0 : index
    %10 = vector.load %arg5[%c0_6, %c0_7] : memref<256x128xf32, #tpu.memory_space<vmem>>, vector<256x128xf32>
    tpu.vector_store %arg5[%c0_6, %c0_7], %9 {strides = array<i32>} : memref<256x128xf32, #tpu.memory_space<vmem>>, vector<256x128xf32>,
    %c0_i32_8 = arith.constant 0 : i32
    %11 = arith.cmpi eq, %arg1, %c0_i32_8 : i32
    %12 = arith.extui %11 : i1 to i32
    %c0_i32_9 = arith.constant 0 : i32
    %13 = arith.cmpi ne, %12, %c0_i32_9 : i32
    scf.if %13 {
      %c0_10 = arith.constant 0 : index
      %c0_11 = arith.constant 0 : index
      %14 = vector.load %arg5[%c0_10, %c0_11] : memref<256x128xf32, #tpu.memory_space<vmem>>, vector<256x128xf32>
      %cst_12 = arith.constant 0.000000e+00 : f32
      %15 = vector.broadcast %cst_12 : f32 to vector<256x128xf32>
      %16 = arith.cmpf oge, %14, %15 : vector<256x128xf32>
      %cst_13 = arith.constant 2.000000e-01 : f32
      %17 = vector.broadcast %cst_13 : f32 to vector<256x128xf32>
      %18 = arith.mulf %14, %17 : vector<256x128xf32>
      %19 = arith.select %16, %14, %18 : vector<256x128xi1>, vector<256x128xf32>
      %20 = arith.truncf %19 : vector<256x128xf32> to vector<256x128xbf16>
      %c0_14 = arith.constant 0 : index
      %c0_15 = arith.constant 0 : index
      %21 = vector.load %arg4[%c0_14, %c0_15] : memref<256x128xbf16, #tpu.memory_space<vmem>>, vector<256x128xbf16>
      tpu.vector_store %arg4[%c0_14, %c0_15], %20 {strides = array<i32>} : memref<256x128xbf16, #tpu.memory_space<vmem>>, vector<256x128xbf16>,
    } else {
    }
    return
  }
  func.func @transform_0(%arg0: i32, %arg1: i32) -> (i32, i32) {
    %c0_i32 = arith.constant 0 : i32
    return %arg0, %arg1 : i32, i32
  }
  func.func @transform_1(%arg0: i32, %arg1: i32) -> (i32, i32, i32) {
    %c0_i32 = arith.constant 0 : i32
    %c0_i32_0 = arith.constant 0 : i32
    %c0_i32_1 = arith.constant 0 : i32
    %c0_i32_2 = arith.constant 0 : i32
    return %c0_i32, %c0_i32_0, %c0_i32_1 : i32, i32, i32
  }
  func.func @transform_2(%arg0: i32, %arg1: i32) -> (i32, i32) {
    %c0_i32 = arith.constant 0 : i32
    %c0_i32_0 = arith.constant 0 : i32
    return %arg0, %c0_i32 : i32, i32
  }
}

module attributes {stable_mosaic.version = 11 : i64} {
  func.func @_gemm_kernel(%arg0: i32, %arg1: i32, %arg2: memref<128x512xbf16, #tpu.memory_space<vmem>>, %arg3: memref<2x512x128xbf16, #tpu.memory_space<vmem>>, %arg4: memref<128x128xbf16, #tpu.memory_space<vmem>>, %arg5: memref<128x128xf32, #tpu.memory_space<vmem>>) attributes {dimension_semantics = [#tpu.dimension_semantics<parallel>, #tpu.dimension_semantics<arbitrary>], iteration_bounds = array<i64: 1, 2>, scalar_prefetch = 0 : i64, scratch_operands = 1 : i64, tpu.core_type = #tpu.core_type<tc>, window_params = [{transform_indices = @transform_0, window_bounds = array<i64: 128, 512>}, {pipeline_mode = #tpu.pipeline_mode<synchronous>, transform_indices = @transform_1, window_bounds = array<i64: 2, 512, 128>}, {transform_indices = @transform_2, window_bounds = array<i64: 128, 128>}]} {
    %c0_i32 = arith.constant 0 : i32
    %0 = arith.cmpi eq, %arg1, %c0_i32 : i32
    %1 = arith.extui %0 : i1 to i32
    %c0_i32_0 = arith.constant 0 : i32
    %2 = arith.cmpi ne, %1, %c0_i32_0 : i32
    scf.if %2 {
      %cst_9 = arith.constant 0.000000e+00 : f32
      %14 = vector.broadcast %cst_9 : f32 to vector<128x128xf32>
      %c0_10 = arith.constant 0 : index
      %c0_11 = arith.constant 0 : index
      %15 = vector.load %arg5[%c0_10, %c0_11] : memref<128x128xf32, #tpu.memory_space<vmem>>, vector<128x128xf32>
      tpu.vector_store %arg5[%c0_10, %c0_11], %14 {strides = array<i32>} : memref<128x128xf32, #tpu.memory_space<vmem>>, vector<128x128xf32>,
    } else {
    }
    %c0 = arith.constant 0 : index
    %c0_1 = arith.constant 0 : index
    %3 = vector.load %arg5[%c0, %c0_1] : memref<128x128xf32, #tpu.memory_space<vmem>>, vector<128x128xf32>
    %c0_2 = arith.constant 0 : index
    %c0_3 = arith.constant 0 : index
    %4 = vector.load %arg2[%c0_2, %c0_3] : memref<128x512xbf16, #tpu.memory_space<vmem>>, vector<128x512xbf16>
    %5 = arith.index_cast %arg1 : i32 to index
    %c0_4 = arith.constant 0 : index
    %c0_5 = arith.constant 0 : index
    %6 = vector.load %arg3[%5, %c0_4, %c0_5] : memref<2x512x128xbf16, #tpu.memory_space<vmem>>, vector<1x512x128xbf16>
    %7 = vector.shape_cast %6 : vector<1x512x128xbf16> to vector<512x128xbf16>
    %cst = arith.constant dense<0.000000e+00> : vector<128x128xf32>
    %8 = tpu.matmul %4, %7, %cst {dimension_numbers = #tpu.dot_dimension_numbers<[1], [0], [0], [1], [0, 0, 1, 1], [], []>} : vector<128x512xbf16>, vector<512x128xbf16>, vector<128x128xf32> -> vector<128x128xf32>
    %9 = arith.addf %3, %8 : vector<128x128xf32>
    %c0_6 = arith.constant 0 : index
    %c0_7 = arith.constant 0 : index
    %10 = vector.load %arg5[%c0_6, %c0_7] : memref<128x128xf32, #tpu.memory_space<vmem>>, vector<128x128xf32>
    tpu.vector_store %arg5[%c0_6, %c0_7], %9 {strides = array<i32>} : memref<128x128xf32, #tpu.memory_space<vmem>>, vector<128x128xf32>,
    %c1_i32 = arith.constant 1 : i32
    %11 = arith.cmpi eq, %arg1, %c1_i32 : i32
    %12 = arith.extui %11 : i1 to i32
    %c0_i32_8 = arith.constant 0 : i32
    %13 = arith.cmpi ne, %12, %c0_i32_8 : i32
    scf.if %13 {
      %c0_9 = arith.constant 0 : index
      %c0_10 = arith.constant 0 : index
      %14 = vector.load %arg5[%c0_9, %c0_10] : memref<128x128xf32, #tpu.memory_space<vmem>>, vector<128x128xf32>
      %cst_11 = arith.constant 0.000000e+00 : f32
      %15 = vector.broadcast %cst_11 : f32 to vector<128x128xf32>
      %16 = arith.cmpf oge, %14, %15 : vector<128x128xf32>
      %cst_12 = arith.constant 2.000000e-01 : f32
      %17 = vector.broadcast %cst_12 : f32 to vector<128x128xf32>
      %18 = arith.mulf %14, %17 : vector<128x128xf32>
      %19 = arith.select %16, %14, %18 : vector<128x128xi1>, vector<128x128xf32>
      %20 = arith.truncf %19 : vector<128x128xf32> to vector<128x128xbf16>
      %c0_13 = arith.constant 0 : index
      %c0_14 = arith.constant 0 : index
      %21 = vector.load %arg4[%c0_13, %c0_14] : memref<128x128xbf16, #tpu.memory_space<vmem>>, vector<128x128xbf16>
      tpu.vector_store %arg4[%c0_13, %c0_14], %20 {strides = array<i32>} : memref<128x128xbf16, #tpu.memory_space<vmem>>, vector<128x128xbf16>,
    } else {
    }
    return
  }
  func.func @transform_0(%arg0: i32, %arg1: i32) -> (i32, i32) {
    %c0_i32 = arith.constant 0 : i32
    return %arg0, %arg1 : i32, i32
  }
  func.func @transform_1(%arg0: i32, %arg1: i32) -> (i32, i32, i32) {
    %c0_i32 = arith.constant 0 : i32
    %c0_i32_0 = arith.constant 0 : i32
    %c0_i32_1 = arith.constant 0 : i32
    %c0_i32_2 = arith.constant 0 : i32
    return %c0_i32, %c0_i32_0, %c0_i32_1 : i32, i32, i32
  }
  func.func @transform_2(%arg0: i32, %arg1: i32) -> (i32, i32) {
    %c0_i32 = arith.constant 0 : i32
    %c0_i32_0 = arith.constant 0 : i32
    return %arg0, %c0_i32 : i32, i32
  }
}

module attributes {stable_mosaic.version = 11 : i64} {
  func.func @_gemm_kernel(%arg0: i32, %arg1: i32, %arg2: memref<32x512xbf16, #tpu.memory_space<vmem>>, %arg3: memref<4x512x256xbf16, #tpu.memory_space<vmem>>, %arg4: memref<32x256xbf16, #tpu.memory_space<vmem>>, %arg5: memref<32x256xf32, #tpu.memory_space<vmem>>) attributes {dimension_semantics = [#tpu.dimension_semantics<parallel>, #tpu.dimension_semantics<arbitrary>], iteration_bounds = array<i64: 1, 4>, scalar_prefetch = 0 : i64, scratch_operands = 1 : i64, tpu.core_type = #tpu.core_type<tc>, window_params = [{transform_indices = @transform_0, window_bounds = array<i64: 32, 512>}, {pipeline_mode = #tpu.pipeline_mode<synchronous>, transform_indices = @transform_1, window_bounds = array<i64: 4, 512, 256>}, {transform_indices = @transform_2, window_bounds = array<i64: 32, 256>}]} {
    %c0_i32 = arith.constant 0 : i32
    %0 = arith.cmpi eq, %arg1, %c0_i32 : i32
    %1 = arith.extui %0 : i1 to i32
    %c0_i32_0 = arith.constant 0 : i32
    %2 = arith.cmpi ne, %1, %c0_i32_0 : i32
    scf.if %2 {
      %cst_9 = arith.constant 0.000000e+00 : f32
      %14 = vector.broadcast %cst_9 : f32 to vector<32x256xf32>
      %c0_10 = arith.constant 0 : index
      %c0_11 = arith.constant 0 : index
      %15 = vector.load %arg5[%c0_10, %c0_11] : memref<32x256xf32, #tpu.memory_space<vmem>>, vector<32x256xf32>
      tpu.vector_store %arg5[%c0_10, %c0_11], %14 {strides = array<i32>} : memref<32x256xf32, #tpu.memory_space<vmem>>, vector<32x256xf32>,
    } else {
    }
    %c0 = arith.constant 0 : index
    %c0_1 = arith.constant 0 : index
    %3 = vector.load %arg5[%c0, %c0_1] : memref<32x256xf32, #tpu.memory_space<vmem>>, vector<32x256xf32>
    %c0_2 = arith.constant 0 : index
    %c0_3 = arith.constant 0 : index
    %4 = vector.load %arg2[%c0_2, %c0_3] : memref<32x512xbf16, #tpu.memory_space<vmem>>, vector<32x512xbf16>
    %5 = arith.index_cast %arg1 : i32 to index
    %c0_4 = arith.constant 0 : index
    %c0_5 = arith.constant 0 : index
    %6 = vector.load %arg3[%5, %c0_4, %c0_5] : memref<4x512x256xbf16, #tpu.memory_space<vmem>>, vector<1x512x256xbf16>
    %7 = vector.shape_cast %6 : vector<1x512x256xbf16> to vector<512x256xbf16>
    %cst = arith.constant dense<0.000000e+00> : vector<32x256xf32>
    %8 = tpu.matmul %4, %7, %cst {dimension_numbers = #tpu.dot_dimension_numbers<[1], [0], [0], [1], [0, 0, 1, 1], [], []>} : vector<32x512xbf16>, vector<512x256xbf16>, vector<32x256xf32> -> vector<32x256xf32>
    %9 = arith.addf %3, %8 : vector<32x256xf32>
    %c0_6 = arith.constant 0 : index
    %c0_7 = arith.constant 0 : index
    %10 = vector.load %arg5[%c0_6, %c0_7] : memref<32x256xf32, #tpu.memory_space<vmem>>, vector<32x256xf32>
    tpu.vector_store %arg5[%c0_6, %c0_7], %9 {strides = array<i32>} : memref<32x256xf32, #tpu.memory_space<vmem>>, vector<32x256xf32>,
    %c3_i32 = arith.constant 3 : i32
    %11 = arith.cmpi eq, %arg1, %c3_i32 : i32
    %12 = arith.extui %11 : i1 to i32
    %c0_i32_8 = arith.constant 0 : i32
    %13 = arith.cmpi ne, %12, %c0_i32_8 : i32
    scf.if %13 {
      %c0_9 = arith.constant 0 : index
      %c0_10 = arith.constant 0 : index
      %14 = vector.load %arg5[%c0_9, %c0_10] : memref<32x256xf32, #tpu.memory_space<vmem>>, vector<32x256xf32>
      %cst_11 = arith.constant 0.000000e+00 : f32
      %15 = vector.broadcast %cst_11 : f32 to vector<32x256xf32>
      %16 = arith.cmpf oge, %14, %15 : vector<32x256xf32>
      %cst_12 = arith.constant 2.000000e-01 : f32
      %17 = vector.broadcast %cst_12 : f32 to vector<32x256xf32>
      %18 = arith.mulf %14, %17 : vector<32x256xf32>
      %19 = arith.select %16, %14, %18 : vector<32x256xi1>, vector<32x256xf32>
      %20 = arith.truncf %19 : vector<32x256xf32> to vector<32x256xbf16>
      %c0_13 = arith.constant 0 : index
      %c0_14 = arith.constant 0 : index
      %21 = vector.load %arg4[%c0_13, %c0_14] : memref<32x256xbf16, #tpu.memory_space<vmem>>, vector<32x256xbf16>
      tpu.vector_store %arg4[%c0_13, %c0_14], %20 {strides = array<i32>} : memref<32x256xbf16, #tpu.memory_space<vmem>>, vector<32x256xbf16>,
    } else {
    }
    return
  }
  func.func @transform_0(%arg0: i32, %arg1: i32) -> (i32, i32) {
    %c0_i32 = arith.constant 0 : i32
    return %arg0, %arg1 : i32, i32
  }
  func.func @transform_1(%arg0: i32, %arg1: i32) -> (i32, i32, i32) {
    %c0_i32 = arith.constant 0 : i32
    %c0_i32_0 = arith.constant 0 : i32
    %c0_i32_1 = arith.constant 0 : i32
    %c0_i32_2 = arith.constant 0 : i32
    return %c0_i32, %c0_i32_0, %c0_i32_1 : i32, i32, i32
  }
  func.func @transform_2(%arg0: i32, %arg1: i32) -> (i32, i32) {
    %c0_i32 = arith.constant 0 : i32
    %c0_i32_0 = arith.constant 0 : i32
    return %arg0, %c0_i32 : i32, i32
  }
}

module attributes {stable_mosaic.version = 11 : i64} {
  func.func @_gemm_kernel(%arg0: i32, %arg1: i32, %arg2: memref<24x512xbf16, #tpu.memory_space<vmem>>, %arg3: memref<8x512x512xbf16, #tpu.memory_space<vmem>>, %arg4: memref<24x512xbf16, #tpu.memory_space<vmem>>, %arg5: memref<24x512xf32, #tpu.memory_space<vmem>>) attributes {dimension_semantics = [#tpu.dimension_semantics<parallel>, #tpu.dimension_semantics<arbitrary>], iteration_bounds = array<i64: 1, 8>, scalar_prefetch = 0 : i64, scratch_operands = 1 : i64, tpu.core_type = #tpu.core_type<tc>, window_params = [{transform_indices = @transform_0, window_bounds = array<i64: 24, 512>}, {pipeline_mode = #tpu.pipeline_mode<synchronous>, transform_indices = @transform_1, window_bounds = array<i64: 8, 512, 512>}, {transform_indices = @transform_2, window_bounds = array<i64: 24, 512>}]} {
    %c0_i32 = arith.constant 0 : i32
    %0 = arith.cmpi eq, %arg1, %c0_i32 : i32
    %1 = arith.extui %0 : i1 to i32
    %c0_i32_0 = arith.constant 0 : i32
    %2 = arith.cmpi ne, %1, %c0_i32_0 : i32
    scf.if %2 {
      %cst_9 = arith.constant 0.000000e+00 : f32
      %14 = vector.broadcast %cst_9 : f32 to vector<24x512xf32>
      %c0_10 = arith.constant 0 : index
      %c0_11 = arith.constant 0 : index
      %15 = vector.load %arg5[%c0_10, %c0_11] : memref<24x512xf32, #tpu.memory_space<vmem>>, vector<24x512xf32>
      tpu.vector_store %arg5[%c0_10, %c0_11], %14 {strides = array<i32>} : memref<24x512xf32, #tpu.memory_space<vmem>>, vector<24x512xf32>,
    } else {
    }
    %c0 = arith.constant 0 : index
    %c0_1 = arith.constant 0 : index
    %3 = vector.load %arg5[%c0, %c0_1] : memref<24x512xf32, #tpu.memory_space<vmem>>, vector<24x512xf32>
    %c0_2 = arith.constant 0 : index
    %c0_3 = arith.constant 0 : index
    %4 = vector.load %arg2[%c0_2, %c0_3] : memref<24x512xbf16, #tpu.memory_space<vmem>>, vector<24x512xbf16>
    %5 = arith.index_cast %arg1 : i32 to index
    %c0_4 = arith.constant 0 : index
    %c0_5 = arith.constant 0 : index
    %6 = vector.load %arg3[%5, %c0_4, %c0_5] : memref<8x512x512xbf16, #tpu.memory_space<vmem>>, vector<1x512x512xbf16>
    %7 = vector.shape_cast %6 : vector<1x512x512xbf16> to vector<512x512xbf16>
    %cst = arith.constant dense<0.000000e+00> : vector<24x512xf32>
    %8 = tpu.matmul %4, %7, %cst {dimension_numbers = #tpu.dot_dimension_numbers<[1], [0], [0], [1], [0, 0, 1, 1], [], []>} : vector<24x512xbf16>, vector<512x512xbf16>, vector<24x512xf32> -> vector<24x512xf32>
    %9 = arith.addf %3, %8 : vector<24x512xf32>
    %c0_6 = arith.constant 0 : index
    %c0_7 = arith.constant 0 : index
    %10 = vector.load %arg5[%c0_6, %c0_7] : memref<24x512xf32, #tpu.memory_space<vmem>>, vector<24x512xf32>
    tpu.vector_store %arg5[%c0_6, %c0_7], %9 {strides = array<i32>} : memref<24x512xf32, #tpu.memory_space<vmem>>, vector<24x512xf32>,
    %c7_i32 = arith.constant 7 : i32
    %11 = arith.cmpi eq, %arg1, %c7_i32 : i32
    %12 = arith.extui %11 : i1 to i32
    %c0_i32_8 = arith.constant 0 : i32
    %13 = arith.cmpi ne, %12, %c0_i32_8 : i32
    scf.if %13 {
      %c0_9 = arith.constant 0 : index
      %c0_10 = arith.constant 0 : index
      %14 = vector.load %arg5[%c0_9, %c0_10] : memref<24x512xf32, #tpu.memory_space<vmem>>, vector<24x512xf32>
      %cst_11 = arith.constant 0.000000e+00 : f32
      %15 = vector.broadcast %cst_11 : f32 to vector<24x512xf32>
      %16 = arith.cmpf oge, %14, %15 : vector<24x512xf32>
      %cst_12 = arith.constant 2.000000e-01 : f32
      %17 = vector.broadcast %cst_12 : f32 to vector<24x512xf32>
      %18 = arith.mulf %14, %17 : vector<24x512xf32>
      %19 = arith.select %16, %14, %18 : vector<24x512xi1>, vector<24x512xf32>
      %20 = arith.truncf %19 : vector<24x512xf32> to vector<24x512xbf16>
      %c0_13 = arith.constant 0 : index
      %c0_14 = arith.constant 0 : index
      %21 = vector.load %arg4[%c0_13, %c0_14] : memref<24x512xbf16, #tpu.memory_space<vmem>>, vector<24x512xbf16>
      tpu.vector_store %arg4[%c0_13, %c0_14], %20 {strides = array<i32>} : memref<24x512xbf16, #tpu.memory_space<vmem>>, vector<24x512xbf16>,
    } else {
    }
    return
  }
  func.func @transform_0(%arg0: i32, %arg1: i32) -> (i32, i32) {
    %c0_i32 = arith.constant 0 : i32
    return %arg0, %arg1 : i32, i32
  }
  func.func @transform_1(%arg0: i32, %arg1: i32) -> (i32, i32, i32) {
    %c0_i32 = arith.constant 0 : i32
    %c0_i32_0 = arith.constant 0 : i32
    %c0_i32_1 = arith.constant 0 : i32
    %c0_i32_2 = arith.constant 0 : i32
    return %c0_i32, %c0_i32_0, %c0_i32_1 : i32, i32, i32
  }
  func.func @transform_2(%arg0: i32, %arg1: i32) -> (i32, i32) {
    %c0_i32 = arith.constant 0 : i32
    %c0_i32_0 = arith.constant 0 : i32
    return %arg0, %c0_i32 : i32, i32
  }
}

module attributes {stable_mosaic.version = 11 : i64} {
  func.func @_gemm_kernel(%arg0: i32, %arg1: i32, %arg2: memref<8x512xbf16, #tpu.memory_space<vmem>>, %arg3: memref<16x512x128xbf16, #tpu.memory_space<vmem>>, %arg4: memref<1x128xf32, #tpu.memory_space<vmem>>, %arg5: memref<8x128xf32, #tpu.memory_space<vmem>>, %arg6: memref<8x128xf32, #tpu.memory_space<vmem>>) attributes {dimension_semantics = [#tpu.dimension_semantics<parallel>, #tpu.dimension_semantics<arbitrary>], iteration_bounds = array<i64: 1, 16>, scalar_prefetch = 0 : i64, scratch_operands = 1 : i64, tpu.core_type = #tpu.core_type<tc>, window_params = [{transform_indices = @transform_0, window_bounds = array<i64: 8, 512>}, {pipeline_mode = #tpu.pipeline_mode<synchronous>, transform_indices = @transform_1, window_bounds = array<i64: 16, 512, 128>}, {pipeline_mode = #tpu.pipeline_mode<synchronous>, transform_indices = @transform_2, window_bounds = array<i64: 1, 128>}, {transform_indices = @transform_3, window_bounds = array<i64: 8, 128>}]} {
    %c0_i32 = arith.constant 0 : i32
    %0 = arith.cmpi eq, %arg1, %c0_i32 : i32
    %1 = arith.extui %0 : i1 to i32
    %c0_i32_0 = arith.constant 0 : i32
    %2 = arith.cmpi ne, %1, %c0_i32_0 : i32
    scf.if %2 {
      %cst_9 = arith.constant 0.000000e+00 : f32
      %14 = vector.broadcast %cst_9 : f32 to vector<8x128xf32>
      %c0_10 = arith.constant 0 : index
      %c0_11 = arith.constant 0 : index
      %15 = vector.load %arg6[%c0_10, %c0_11] : memref<8x128xf32, #tpu.memory_space<vmem>>, vector<8x128xf32>
      tpu.vector_store %arg6[%c0_10, %c0_11], %14 {strides = array<i32>} : memref<8x128xf32, #tpu.memory_space<vmem>>, vector<8x128xf32>,
    } else {
    }
    %c0 = arith.constant 0 : index
    %c0_1 = arith.constant 0 : index
    %3 = vector.load %arg6[%c0, %c0_1] : memref<8x128xf32, #tpu.memory_space<vmem>>, vector<8x128xf32>
    %c0_2 = arith.constant 0 : index
    %c0_3 = arith.constant 0 : index
    %4 = vector.load %arg2[%c0_2, %c0_3] : memref<8x512xbf16, #tpu.memory_space<vmem>>, vector<8x512xbf16>
    %5 = arith.index_cast %arg1 : i32 to index
    %c0_4 = arith.constant 0 : index
    %c0_5 = arith.constant 0 : index
    %6 = vector.load %arg3[%5, %c0_4, %c0_5] : memref<16x512x128xbf16, #tpu.memory_space<vmem>>, vector<1x512x128xbf16>
    %7 = vector.shape_cast %6 : vector<1x512x128xbf16> to vector<512x128xbf16>
    %cst = arith.constant dense<0.000000e+00> : vector<8x128xf32>
    %8 = tpu.matmul %4, %7, %cst {dimension_numbers = #tpu.dot_dimension_numbers<[1], [0], [0], [1], [0, 0, 1, 1], [], []>} : vector<8x512xbf16>, vector<512x128xbf16>, vector<8x128xf32> -> vector<8x128xf32>
    %9 = arith.addf %3, %8 : vector<8x128xf32>
    %c0_6 = arith.constant 0 : index
    %c0_7 = arith.constant 0 : index
    %10 = vector.load %arg6[%c0_6, %c0_7] : memref<8x128xf32, #tpu.memory_space<vmem>>, vector<8x128xf32>
    tpu.vector_store %arg6[%c0_6, %c0_7], %9 {strides = array<i32>} : memref<8x128xf32, #tpu.memory_space<vmem>>, vector<8x128xf32>,
    %c15_i32 = arith.constant 15 : i32
    %11 = arith.cmpi eq, %arg1, %c15_i32 : i32
    %12 = arith.extui %11 : i1 to i32
    %c0_i32_8 = arith.constant 0 : i32
    %13 = arith.cmpi ne, %12, %c0_i32_8 : i32
    scf.if %13 {
      %c0_9 = arith.constant 0 : index
      %c0_10 = arith.constant 0 : index
      %14 = vector.load %arg6[%c0_9, %c0_10] : memref<8x128xf32, #tpu.memory_space<vmem>>, vector<8x128xf32>
      %c0_11 = arith.constant 0 : index
      %c0_12 = arith.constant 0 : index
      %15 = vector.load %arg4[%c0_11, %c0_12] : memref<1x128xf32, #tpu.memory_space<vmem>>, vector<1x128xf32>
      %16 = vector.broadcast %15 : vector<1x128xf32> to vector<8x128xf32>
      %17 = arith.addf %14, %16 : vector<8x128xf32>
      %c0_13 = arith.constant 0 : index
      %c0_14 = arith.constant 0 : index
      %18 = vector.load %arg5[%c0_13, %c0_14] : memref<8x128xf32, #tpu.memory_space<vmem>>, vector<8x128xf32>
      tpu.vector_store %arg5[%c0_13, %c0_14], %17 {strides = array<i32>} : memref<8x128xf32, #tpu.memory_space<vmem>>, vector<8x128xf32>,
    } else {
    }
    return
  }
  func.func @transform_0(%arg0: i32, %arg1: i32) -> (i32, i32) {
    %c0_i32 = arith.constant 0 : i32
    return %arg0, %arg1 : i32, i32
  }
  func.func @transform_1(%arg0: i32, %arg1: i32) -> (i32, i32, i32) {
    %c0_i32 = arith.constant 0 : i32
    %c0_i32_0 = arith.constant 0 : i32
    %c0_i32_1 = arith.constant 0 : i32
    %c0_i32_2 = arith.constant 0 : i32
    return %c0_i32, %c0_i32_0, %c0_i32_1 : i32, i32, i32
  }
  func.func @transform_2(%arg0: i32, %arg1: i32) -> (i32, i32) {
    %c0_i32 = arith.constant 0 : i32
    %c0_i32_0 = arith.constant 0 : i32
    %c0_i32_1 = arith.constant 0 : i32
    return %c0_i32, %c0_i32_0 : i32, i32
  }
  func.func @transform_3(%arg0: i32, %arg1: i32) -> (i32, i32) {
    %c0_i32 = arith.constant 0 : i32
    %c0_i32_0 = arith.constant 0 : i32
    return %arg0, %c0_i32 : i32, i32
  }
}

</mosaic_0001>

<bundles_post_ra>
// kernel: discriminator_forward.5
= control target key start
LH: loop header
LB: loop body
LE: loop exit
PB: predicated region body
PF: predicated region fallthrough
CT: control target
= control target key end

     0   :  { %s1389_s9 = smov 0   ;;  %s1391_s10 = smov 0   ;;  %s1494_s0 = inlined_call_operand.vmem [shape: bf16[512,128], index: 0, kind: input, shape index: {}]   ;;  %s1495_s1 = inlined_call_operand.vmem [shape: bf16[1,128,128], index: 1, kind: input, shape index: {}]   ;;  %s1496_s2 = inlined_call_operand.vmem [shape: bf16[512,128], index: 2, kind: output, shape index: {}]  }
   0x1   :  { %s1393_s11 = smov 0  }
   0x2 LB: > { %s24_s12 = sadd.s32 1, %s1368_s10  ;;  %p1024_p0 = scmp.ge.s32.totalorder %s1372_s11, 1  ;;  %s1372_s11 = sphi %s1393_s11, %s12_s11   ;;  %s1368_s10 = sphi %s1391_s10, %s1498_s10   ;;  %s1364_s9 = sphi %s1389_s9, %s1497_s9  }
   0x3   : > { %p26_p1 = scmp.ge.s32.totalorder %s24_s12, 2  ;;  %p130_p2 = scmp.lt.s32.totalorder %s1372_s11, 3 }
   0x5   : > { %s1500_s12 = smov (%p26_p1, %s24_s12), 0  ;;  %p131_p3 = pnand %p1024_p0, %p130_p2 }
   0x6   : > { %s1025_s15 = sshll.u32 (!%p131_p3), %s1364_s9, 5 }
   0x7   : > { %134 = sbr.rel (%p131_p3) target bundleno = 275 (0x113), region = 28  ;;  %p156_p4 = scmp.lt.s32.totalorder (!%p131_p3), %s1025_s15, 63 }
   0xc   : > { %v1326_v0 = vld [vmem:[%s1495_s1 + $0x38] sm:$0xff]   ;;  %v1327_v1 = vld [vmem:[%s1495_s1 + $0x30] sm:$0xff]   ;;  %s1502_s15 = smov (!%p156_p4, %s1025_s15), 63  ;;  %v1328_v2 = vld [vmem:[%s1495_s1 + $0x28] sm:$0xff]  }
   0xd   : > { %1238 = vmatprep.subr.bf16.mxu0 %v1326_v0  ;;  %1286 = vmatprep.subr.bf16.mxu1 %v1326_v0  ;;  %s1026_s20 = sshll.u32 %s1502_s15, 2  ;;  %v1329_v3 = vld [vmem:[%s1495_s1 + $0x20] sm:$0xff]   ;;  %v1330_v6 = vld [vmem:[%s1495_s1 + $0x18] sm:$0xff]   ;;  %v1331_v7 = vld [vmem:[%s1495_s1 + $0x10] sm:$0xff]  }
   0xe   : > { %1239 = vmatpush3.bf16.msra.mxu0 %v1326_v0  ;;  %1294 = vmatpush3.bf16.msra.mxu1 %v1326_v0  ;;  %s1424_s23 = scalar_lea.vmem %s1494_s0, %s1026_s20  ;;  %v1332_v8 = vld [vmem:[%s1495_s1 + $0x8] sm:$0xff]   ;;  %v1333_v9 = vld [vmem:[%s1495_s1] sm:$0xff]   ;;  %s1462_s8 = scalar_lea.vmem %s1496_s2, %s1026_s20 }
   0xf   : > { %1240 = vmatprep.subr.bf16.mxu0 %v1327_v1  ;;  %1287 = vmatprep.subr.bf16.mxu1 %v1327_v1  ;;  %v1334_v4 = vld [vmem:[%s1424_s23] sm:$0xff]   ;;  %v1336_v10 = vld [vmem:[%s1424_s23 + $0x8] sm:$0xff]   ;;  %v1338_v12 = vld [vmem:[%s1424_s23 + $0x10] sm:$0xff]  }
  0x10   : > { %v1335_v5 = vld [vmem:[%s1424_s23 + $0x40] sm:$0xff]   ;;  %1254 = vmatprep.mubr.bf16.mxu0 %v1334_v4  ;;  %v1337_v11 = vld [vmem:[%s1424_s23 + $0x48] sm:$0xff]   ;;  %v1339_v13 = vld [vmem:[%s1424_s23 + $0x50] sm:$0xff]  }
  0x11   : > { %1270 = vmatprep.mubr.bf16.mxu1 %v1335_v5  ;;  %v1340_v14 = vld [vmem:[%s1424_s23 + $0x18] sm:$0xff]   ;;  %v1342_v16 = vld [vmem:[%s1424_s23 + $0x20] sm:$0xff]   ;;  %v1344_v18 = vld [vmem:[%s1424_s23 + $0x28] sm:$0xff]  }
  0x12   : > { %1241 = vmatpush3.bf16.msra.mxu0 %v1327_v1  ;;  %1295 = vmatpush3.bf16.msra.mxu1 %v1327_v1  ;;  %v1341_v15 = vld [vmem:[%s1424_s23 + $0x58] sm:$0xff]   ;;  %v1343_v17 = vld [vmem:[%s1424_s23 + $0x60] sm:$0xff]   ;;  %v1345_v19 = vld [vmem:[%s1424_s23 + $0x68] sm:$0xff]  }
  0x13   : > { %1242 = vmatprep.subr.bf16.mxu0 %v1328_v2  ;;  %1288 = vmatprep.subr.bf16.mxu1 %v1328_v2  ;;  %v1346_v20 = vld [vmem:[%s1424_s23 + $0x30] sm:$0xff]   ;;  %v1348_v22 = vld [vmem:[%s1424_s23 + $0x38] sm:$0xff]  }
  0x14   : > { %v1347_v21 = vld [vmem:[%s1424_s23 + $0x70] sm:$0xff]   ;;  %v1349_v23 = vld [vmem:[%s1424_s23 + $0x78] sm:$0xff]  }
  0x16   : > { %1243 = vmatpush3.bf16.msra.mxu0 %v1328_v2  ;;  %1296 = vmatpush3.bf16.msra.mxu1 %v1328_v2 }
  0x17   : > { %1244 = vmatprep.subr.bf16.mxu0 %v1329_v3  ;;  %1289 = vmatprep.subr.bf16.mxu1 %v1329_v3 }
  0x1a   : > { %1245 = vmatpush3.bf16.msra.mxu0 %v1329_v3  ;;  %1297 = vmatpush3.bf16.msra.mxu1 %v1329_v3 }
  0x1b   : > { %1246 = vmatprep.subr.bf16.mxu0 %v1330_v6  ;;  %1290 = vmatprep.subr.bf16.mxu1 %v1330_v6 }
  0x1e   : > { %1247 = vmatpush3.bf16.msra.mxu0 %v1330_v6  ;;  %1298 = vmatpush3.bf16.msra.mxu1 %v1330_v6 }
  0x1f   : > { %1248 = vmatprep.subr.bf16.mxu0 %v1331_v7  ;;  %1291 = vmatprep.subr.bf16.mxu1 %v1331_v7 }
  0x22   : > { %1249 = vmatpush3.bf16.msra.mxu0 %v1331_v7  ;;  %1299 = vmatpush3.bf16.msra.mxu1 %v1331_v7 }
  0x23   : > { %1250 = vmatprep.subr.bf16.mxu0 %v1332_v8  ;;  %1292 = vmatprep.subr.bf16.mxu1 %v1332_v8 }
  0x26   : > { %1251 = vmatpush3.bf16.msra.mxu0 %v1332_v8  ;;  %1300 = vmatpush3.bf16.msra.mxu1 %v1332_v8 }
  0x27   : > { %1252 = vmatprep.subr.bf16.mxu0 %v1333_v9  ;;  %1293 = vmatprep.subr.bf16.mxu1 %v1333_v9 }
  0x2a   : > { %1253 = vmatpush3.bf16.msra.mxu0 %v1333_v9  ;;  %1301 = vmatpush3.bf16.msra.mxu1 %v1333_v9 }
  0x2d   : > { %1255 = vmatmul.mubr.bf16.vlgmr.msra.gmra.mxu0 %v1336_v10  ;;  %1271 = vmatmul.mubr.bf16.vlgmr.msra.gmra.mxu1 %v1337_v11 }
  0x2e   : > { %1258 = vmatprep.mubr.bf16.mxu0 %v1338_v12  ;;  %1274 = vmatprep.mubr.bf16.mxu1 %v1339_v13 }
  0x35   : > { %1259 = vmatmul.mubr.bf16.gmra.mxu0 %v1340_v14  ;;  %1275 = vmatmul.mubr.bf16.gmra.mxu1 %v1341_v15 }
  0x36   : > { %1262 = vmatprep.mubr.bf16.mxu0 %v1342_v16  ;;  %1278 = vmatprep.mubr.bf16.mxu1 %v1343_v17 }
  0x3d   : > { %1263 = vmatmul.mubr.bf16.gmra.mxu0 %v1344_v18  ;;  %1279 = vmatmul.mubr.bf16.gmra.mxu1 %v1345_v19 }
  0x3e   : > { %1266 = vmatprep.mubr.bf16.mxu0 %v1346_v20  ;;  %1282 = vmatprep.mubr.bf16.mxu1 %v1347_v21 }
  0x45   : > { %1267 = vmatmul.mubr.bf16.gmra.mxu0 %v1348_v22  ;;  %1283 = vmatmul.mubr.bf16.gmra.mxu1 %v1349_v23 }
  0xed   : > { %v1256_v24 = vpop.f32.mrf.mxu0  ;;  %v1272_v25 = vpop.f32.mrf.mxu1 }
  0xee   : > { %vm696_vm0 = vcmp.ge.f32.partialorder %v1256_v24, 0.0  ;;  %v728_v26 = vmul.f32 0.2, %v1256_v24  ;;  %v744_v27 = vmul.f32 0.2, %v1272_v25  ;;  %vm712_vm1 = vcmp.ge.f32.partialorder %v1272_v25, 0.0 }
  0xef   : > { %v468_v28 = vpop.f32.mrf.mxu0  ;;  %v532_v29 = vpop.f32.mrf.mxu1 }
  0xf0   : > { %v760_v30 = vsel %vm696_vm0, %v1256_v24, %v728_v26  ;;  %v726_v31 = vmul.f32 0.2, %v468_v28  ;;  %vm694_vm2 = vcmp.ge.f32.partialorder %v468_v28, 0.0  ;;  %v776_v35 = vsel %vm712_vm1, %v1272_v25, %v744_v27 }
  0xf1   : > { %v1257_v32 = vpop.f32.mrf.mxu0  ;;  %v1273_v33 = vpop.f32.mrf.mxu1  ;;  %vm710_vm5 = vcmp.ge.f32.partialorder %v532_v29, 0.0  ;;  %v742_v36 = vmul.f32 0.2, %v532_v29 }
  0xf2   : > { %vm697_vm3 = vcmp.ge.f32.partialorder %v1257_v32, 0.0  ;;  %v729_v34 = vmul.f32 0.2, %v1257_v32  ;;  %vm713_vm4 = vcmp.ge.f32.partialorder %v1273_v33, 0.0  ;;  %v745_v37 = vmul.f32 0.2, %v1273_v33 }
  0xf3   : > { %v471_v38 = vpop.f32.mrf.mxu0  ;;  %v535_v39 = vpop.f32.mrf.mxu1  ;;  %v758_v42 = vsel %vm694_vm2, %v468_v28, %v726_v31  ;;  %v774_v51 = vsel %vm710_vm5, %v532_v29, %v742_v36 }
  0xf4   : > { %v761_v40 = vsel %vm697_vm3, %v1257_v32, %v729_v34  ;;  %vm695_vm6 = vcmp.ge.f32.partialorder %v471_v38, 0.0  ;;  %v727_v41 = vmul.f32 0.2, %v471_v38  ;;  %vm711_vm7 = vcmp.ge.f32.partialorder %v535_v39, 0.0 }
  0xf5   : > { %v1127_v43 = vpack.c.bf16 %v761_v40, %v760_v30  ;;  %v777_v44 = vsel %vm713_vm4, %v1273_v33, %v745_v37  ;;  %v743_v45 = vmul.f32 0.2, %v535_v39  ;;  %v1260_v46 = vpop.f32.mrf.mxu0  ;;  %v1276_v47 = vpop.f32.mrf.mxu1 }
  0xf6   : > { %v1167_v48 = vpack.c.bf16 %v777_v44, %v776_v35  ;;  %v759_v49 = vsel %vm695_vm6, %v471_v38, %v727_v41  ;;  %vm700_vm8 = vcmp.ge.f32.partialorder %v1260_v46, 0.0  ;;  %v732_v50 = vmul.f32 0.2, %v1260_v46 }
  0xf7   : > { %1199 = vst [vmem:[%s1462_s8 + $0x8] sm:$0xff] %v1127_v43   ;;  %v1122_v52 = vpack.c.bf16 %v759_v49, %v758_v42  ;;  %v775_v53 = vsel %vm711_vm7, %v535_v39, %v743_v45  ;;  %v748_v54 = vmul.f32 0.2, %v1276_v47  ;;  %v484_v55 = vpop.f32.mrf.mxu0  ;;  %v548_v56 = vpop.f32.mrf.mxu1  ;;  %vm716_vm9 = vcmp.ge.f32.partialorder %v1276_v47, 0.0 }
  0xf8   : > { %1207 = vst [vmem:[%s1462_s8 + $0x48] sm:$0xff] %v1167_v48   ;;  %v1162_v57 = vpack.c.bf16 %v775_v53, %v774_v51  ;;  %v764_v58 = vsel %vm700_vm8, %v1260_v46, %v732_v50  ;;  %v730_v59 = vmul.f32 0.2, %v484_v55  ;;  %vm698_vm10 = vcmp.ge.f32.partialorder %v484_v55, 0.0 }
  0xf9   : > { %1123 = vst [vmem:[%s1462_s8] sm:$0xff] %v1122_v52   ;;  %v1261_v60 = vpop.f32.mrf.mxu0  ;;  %v1277_v61 = vpop.f32.mrf.mxu1  ;;  %v780_v63 = vsel %vm716_vm9, %v1276_v47, %v748_v54  ;;  %vm714_vm13 = vcmp.ge.f32.partialorder %v548_v56, 0.0  ;;  %v746_v0 = vmul.f32 0.2, %v548_v56 }
  0xfa   : > { %1206 = vst [vmem:[%s1462_s8 + $0x40] sm:$0xff] %v1162_v57   ;;  %vm701_vm11 = vcmp.ge.f32.partialorder %v1261_v60, 0.0  ;;  %v733_v62 = vmul.f32 0.2, %v1261_v60  ;;  %vm717_vm12 = vcmp.ge.f32.partialorder %v1277_v61, 0.0  ;;  %v762_v6 = vsel %vm698_vm10, %v484_v55, %v730_v59 }
  0xfb   : > { %v749_v1 = vmul.f32 0.2, %v1277_v61  ;;  %v487_v2 = vpop.f32.mrf.mxu0  ;;  %v551_v3 = vpop.f32.mrf.mxu1  ;;  %v778_v15 = vsel %vm714_vm13, %v548_v56, %v746_v0 }
  0xfc   : > { %v765_v4 = vsel %vm701_vm11, %v1261_v60, %v733_v62  ;;  %vm699_vm14 = vcmp.ge.f32.partialorder %v487_v2, 0.0  ;;  %v731_v5 = vmul.f32 0.2, %v487_v2  ;;  %vm715_vm15 = vcmp.ge.f32.partialorder %v551_v3, 0.0 }
  0xfd   : > { %v1137_v7 = vpack.c.bf16 %v765_v4, %v764_v58  ;;  %v781_v8 = vsel %vm717_vm12, %v1277_v61, %v749_v1  ;;  %v747_v9 = vmul.f32 0.2, %v551_v3  ;;  %v1264_v10 = vpop.f32.mrf.mxu0  ;;  %v1280_v11 = vpop.f32.mrf.mxu1 }
  0xfe   : > { %v1177_v12 = vpack.c.bf16 %v781_v8, %v780_v63  ;;  %v763_v13 = vsel %vm699_vm14, %v487_v2, %v731_v5  ;;  %vm704_vm0 = vcmp.ge.f32.partialorder %v1264_v10, 0.0  ;;  %v736_v14 = vmul.f32 0.2, %v1264_v10 }
  0xff   : > { %1201 = vst [vmem:[%s1462_s8 + $0x18] sm:$0xff] %v1137_v7   ;;  %v1132_v16 = vpack.c.bf16 %v763_v13, %v762_v6  ;;  %v779_v17 = vsel %vm715_vm15, %v551_v3, %v747_v9  ;;  %v752_v18 = vmul.f32 0.2, %v1280_v11  ;;  %v500_v19 = vpop.f32.mrf.mxu0  ;;  %v564_v20 = vpop.f32.mrf.mxu1  ;;  %vm720_vm1 = vcmp.ge.f32.partialorder %v1280_v11, 0.0 }
 0x100   : > { %1209 = vst [vmem:[%s1462_s8 + $0x58] sm:$0xff] %v1177_v12   ;;  %v1172_v21 = vpack.c.bf16 %v779_v17, %v778_v15  ;;  %v768_v22 = vsel %vm704_vm0, %v1264_v10, %v736_v14  ;;  %v734_v23 = vmul.f32 0.2, %v500_v19  ;;  %vm702_vm2 = vcmp.ge.f32.partialorder %v500_v19, 0.0 }
 0x101   : > { %1200 = vst [vmem:[%s1462_s8 + $0x10] sm:$0xff] %v1132_v16   ;;  %v1265_v24 = vpop.f32.mrf.mxu0  ;;  %v1281_v25 = vpop.f32.mrf.mxu1  ;;  %v784_v27 = vsel %vm720_vm1, %v1280_v11, %v752_v18  ;;  %vm718_vm5 = vcmp.ge.f32.partialorder %v564_v20, 0.0  ;;  %v750_v28 = vmul.f32 0.2, %v564_v20 }
 0x102   : > { %1208 = vst [vmem:[%s1462_s8 + $0x50] sm:$0xff] %v1172_v21   ;;  %vm705_vm3 = vcmp.ge.f32.partialorder %v1265_v24, 0.0  ;;  %v737_v26 = vmul.f32 0.2, %v1265_v24  ;;  %vm721_vm4 = vcmp.ge.f32.partialorder %v1281_v25, 0.0  ;;  %v766_v34 = vsel %vm702_vm2, %v500_v19, %v734_v23 }
 0x103   : > { %v753_v29 = vmul.f32 0.2, %v1281_v25  ;;  %v503_v30 = vpop.f32.mrf.mxu0  ;;  %v567_v31 = vpop.f32.mrf.mxu1  ;;  %v782_v43 = vsel %vm718_vm5, %v564_v20, %v750_v28 }
 0x104   : > { %v769_v32 = vsel %vm705_vm3, %v1265_v24, %v737_v26  ;;  %vm703_vm6 = vcmp.ge.f32.partialorder %v503_v30, 0.0  ;;  %v735_v33 = vmul.f32 0.2, %v503_v30  ;;  %vm719_vm7 = vcmp.ge.f32.partialorder %v567_v31, 0.0 }
 0x105   : > { %v1147_v35 = vpack.c.bf16 %v769_v32, %v768_v22  ;;  %v785_v36 = vsel %vm721_vm4, %v1281_v25, %v753_v29  ;;  %v751_v37 = vmul.f32 0.2, %v567_v31  ;;  %v1268_v38 = vpop.f32.mrf.mxu0  ;;  %v1284_v39 = vpop.f32.mrf.mxu1 }
 0x106   : > { %v1187_v40 = vpack.c.bf16 %v785_v36, %v784_v27  ;;  %v767_v41 = vsel %vm703_vm6, %v503_v30, %v735_v33  ;;  %vm708_vm8 = vcmp.ge.f32.partialorder %v1268_v38, 0.0  ;;  %v740_v42 = vmul.f32 0.2, %v1268_v38 }
 0x107   : > { %1203 = vst [vmem:[%s1462_s8 + $0x28] sm:$0xff] %v1147_v35   ;;  %v1142_v44 = vpack.c.bf16 %v767_v41, %v766_v34  ;;  %v783_v45 = vsel %vm719_vm7, %v567_v31, %v751_v37  ;;  %v516_v46 = vpop.f32.mrf.mxu0  ;;  %v580_v47 = vpop.f32.mrf.mxu1  ;;  %vm724_vm9 = vcmp.ge.f32.partialorder %v1284_v39, 0.0  ;;  %v756_v50 = vmul.f32 0.2, %v1284_v39 }
 0x108   : > { %1211 = vst [vmem:[%s1462_s8 + $0x68] sm:$0xff] %v1187_v40   ;;  %v1182_v48 = vpack.c.bf16 %v783_v45, %v782_v43  ;;  %v772_v49 = vsel %vm708_vm8, %v1268_v38, %v740_v42  ;;  %v738_v53 = vmul.f32 0.2, %v516_v46  ;;  %vm706_vm12 = vcmp.ge.f32.partialorder %v516_v46, 0.0 }
 0x109   : > { %1202 = vst [vmem:[%s1462_s8 + $0x20] sm:$0xff] %v1142_v44   ;;  %v1269_v51 = vpop.f32.mrf.mxu0  ;;  %v1285_v52 = vpop.f32.mrf.mxu1  ;;  %vm722_vm13 = vcmp.ge.f32.partialorder %v580_v47, 0.0  ;;  %v754_v55 = vmul.f32 0.2, %v580_v47  ;;  %v788_v61 = vsel %vm724_vm9, %v1284_v39, %v756_v50 }
 0x10a   : > { %1210 = vst [vmem:[%s1462_s8 + $0x60] sm:$0xff] %v1182_v48   ;;  %vm709_vm10 = vcmp.ge.f32.partialorder %v1269_v51, 0.0  ;;  %v741_v54 = vmul.f32 0.2, %v1269_v51  ;;  %vm725_vm11 = vcmp.ge.f32.partialorder %v1285_v52, 0.0  ;;  %v770_v1 = vsel %vm706_vm12, %v516_v46, %v738_v53 }
 0x10b   : > { %v757_v56 = vmul.f32 0.2, %v1285_v52  ;;  %v519_v57 = vpop.f32.mrf.mxu0  ;;  %v583_v58 = vpop.f32.mrf.mxu1  ;;  %v786_v4 = vsel %vm722_vm13, %v580_v47, %v754_v55 }
 0x10c   : > { %v773_v59 = vsel %vm709_vm10, %v1269_v51, %v741_v54  ;;  %vm707_vm14 = vcmp.ge.f32.partialorder %v519_v57, 0.0  ;;  %v739_v60 = vmul.f32 0.2, %v519_v57  ;;  %vm723_vm15 = vcmp.ge.f32.partialorder %v583_v58, 0.0 }
 0x10d   : > { %v1157_v62 = vpack.c.bf16 %v773_v59, %v772_v49  ;;  %v789_v63 = vsel %vm725_vm11, %v1285_v52, %v757_v56  ;;  %v755_v0 = vmul.f32 0.2, %v583_v58 }
 0x10e   : > { %v1197_v2 = vpack.c.bf16 %v789_v63, %v788_v61  ;;  %v771_v3 = vsel %vm707_vm14, %v519_v57, %v739_v60 }
 0x10f   : > { %1205 = vst [vmem:[%s1462_s8 + $0x38] sm:$0xff] %v1157_v62   ;;  %v1152_v5 = vpack.c.bf16 %v771_v3, %v770_v1  ;;  %v787_v6 = vsel %vm723_vm15, %v583_v58, %v755_v0 }
 0x110   : > { %1213 = vst [vmem:[%s1462_s8 + $0x78] sm:$0xff] %v1197_v2   ;;  %v1192_v7 = vpack.c.bf16 %v787_v6, %v786_v4 }
 0x111   : > { %1204 = vst [vmem:[%s1462_s8 + $0x30] sm:$0xff] %v1152_v5  }
 0x112   : > { %1212 = vst [vmem:[%s1462_s8 + $0x70] sm:$0xff] %v1192_v7  }
 0x113 PF: > { %s12_s11 = sadd.s32 1, %s1372_s11   ;;  %s1497_s9 = smov %s1368_s10 }
 0x114   : > { %p9_p5 = scmp.ge.s32.totalorder %s12_s11, 4   ;;  %s1498_s10 = smov %s1500_s12 }
 0x116   :  { %11 = sbr.rel (!%p9_p5) target bundleno = 2 (0x2), region = 67 }

// kernel: discriminator_forward.6
= control target key start
LH: loop header
LB: loop body
LE: loop exit
PB: predicated region body
PF: predicated region fallthrough
CT: control target
= control target key end

     0   :  { %s1647_s9 = smov 0   ;;  %s1649_s10 = smov 0   ;;  %s1875_s0 = inlined_call_operand.vmem [shape: bf16[128,1024], index: 0, kind: input, shape index: {}]   ;;  %s1876_s1 = inlined_call_operand.vmem [shape: bf16[2,512,128], index: 1, kind: input, shape index: {}]   ;;  %s1877_s2 = inlined_call_operand.vmem [shape: bf16[128,128], index: 2, kind: output, shape index: {}]  }
   0x1   :  { %s1651_s11 = smov 0   ;;  %s1653_s12 = smov 0  }
   0x2   :  { %s1655_s13 = smov 0  }
   0x3 LB: > { %s21_s14 = sadd.s32 1, %s1625_s12  ;;  %p40_p1 = scmp.ne.s32.totalorder %s1617_s10, %s1613_s9  ;;  %s1629_s13 = sphi %s1655_s13, %s12_s13   ;;  %s1625_s12 = sphi %s1653_s12, %s1881_s12   ;;  %s1621_s11 = sphi %s1651_s11, %s1880_s11   ;;  %s1617_s10 = sphi %s1649_s10, %s1879_s10   ;;  %s1613_s9 = sphi %s1647_s9, %s1878_s9  }
   0x4   : > { %p22_p0 = scmp.ge.s32.totalorder %s21_s14, 2  ;;  %p41_p2 = scmp.eq.s32.totalorder %s1629_s13, 0 }
   0x5   : > { %s33_s16 = sadd.s32 1, %s1617_s10  ;;  %p1183_p5 = scmp.ge.s32.totalorder %s1629_s13, 2 }
   0x6   : > { %s1883_s14 = smov (%p22_p0, %s21_s14), 0  ;;  %p42_p3 = por %p41_p2, %p40_p1 }
   0x7   : > { %s29_s15 = ssub.s32 %s1625_s12, %s1883_s14  ;;  %116 = sbr.rel (%p1183_p5) target bundleno = 32 (0x20), region = 20 }
   0x8   : > { %p31_p4 = scmp.eq.s32.totalorder %s29_s15, 0 }
   0xa   : > { %s1682_s17 = scalar_select %p31_p4, %s1617_s10, %s33_s16  }
   0xc   : > { %119 = sbr.rel (!%p42_p3) target bundleno = 32 (0x20), region = 24  ;;  %s121_s18 = sand.u32 (%p42_p3), 1, %s1617_s10  }
   0xd   : > { %s1277_s19 = sshll.u32 (%p42_p3), %s1625_s12, 4  ;;  %s1184_s20 = sshll.u32 (%p42_p3), %s121_s18, 8 }
   0xe   : > { %s1690_s23 = scalar_lea.vmem (%p42_p3), %s1875_s0, %s1277_s19  ;;  %s1695_s24 = scalar_lea.vmem (%p42_p3), [#allocation3], %s1184_s20 }
   0xf   : > { %v142_v0 = vld [vmem:[%s1690_s23] sm:$0xff] (%p42_p3)  ;;  %v144_v1 = vld [vmem:[%s1690_s23 + $0x8] sm:$0xff] (%p42_p3) }
  0x10   : > { %v146_v2 = vld [vmem:[%s1690_s23 + $0x20] sm:$0xff] (%p42_p3)  ;;  %143 = vst [vmem:[%s1695_s24] sm:$0xff] (%p42_p3), %v142_v0  ;;  %145 = vst [vmem:[%s1695_s24 + $0x8] sm:$0xff] (%p42_p3), %v144_v1  ;;  %v148_v3 = vld [vmem:[%s1690_s23 + $0x28] sm:$0xff] (%p42_p3) }
  0x11   : > { %147 = vst [vmem:[%s1695_s24 + $0x10] sm:$0xff] %v146_v2  ;;  %v150_v4 = vld [vmem:[%s1690_s23 + $0x40] sm:$0xff]  ;;  %v152_v5 = vld [vmem:[%s1690_s23 + $0x48] sm:$0xff]  ;;  %149 = vst [vmem:[%s1695_s24 + $0x18] sm:$0xff] %v148_v3 }
  0x12   : > { %151 = vst [vmem:[%s1695_s24 + $0x20] sm:$0xff] %v150_v4  ;;  %153 = vst [vmem:[%s1695_s24 + $0x28] sm:$0xff] %v152_v5  ;;  %v154_v6 = vld [vmem:[%s1690_s23 + $0x60] sm:$0xff]  ;;  %v156_v7 = vld [vmem:[%s1690_s23 + $0x68] sm:$0xff] }
  0x13   : > { %v158_v8 = vld [vmem:[%s1690_s23 + $0x80] sm:$0xff]  ;;  %155 = vst [vmem:[%s1695_s24 + $0x30] sm:$0xff] %v154_v6  ;;  %157 = vst [vmem:[%s1695_s24 + $0x38] sm:$0xff] %v156_v7  ;;  %v160_v9 = vld [vmem:[%s1690_s23 + $0x88] sm:$0xff] }
  0x14   : > { %159 = vst [vmem:[%s1695_s24 + $0x40] sm:$0xff] %v158_v8  ;;  %v162_v10 = vld [vmem:[%s1690_s23 + $0xa0] sm:$0xff]  ;;  %v164_v11 = vld [vmem:[%s1690_s23 + $0xa8] sm:$0xff]  ;;  %161 = vst [vmem:[%s1695_s24 + $0x48] sm:$0xff] %v160_v9 }
  0x15   : > { %163 = vst [vmem:[%s1695_s24 + $0x50] sm:$0xff] %v162_v10  ;;  %165 = vst [vmem:[%s1695_s24 + $0x58] sm:$0xff] %v164_v11  ;;  %v166_v12 = vld [vmem:[%s1690_s23 + $0xc0] sm:$0xff]  ;;  %v168_v13 = vld [vmem:[%s1690_s23 + $0xc8] sm:$0xff] }
  0x16   : > { %v170_v14 = vld [vmem:[%s1690_s23 + $0xe0] sm:$0xff]  ;;  %167 = vst [vmem:[%s1695_s24 + $0x60] sm:$0xff] %v166_v12  ;;  %169 = vst [vmem:[%s1695_s24 + $0x68] sm:$0xff] %v168_v13  ;;  %v172_v15 = vld [vmem:[%s1690_s23 + $0xe8] sm:$0xff] }
  0x17   : > { %171 = vst [vmem:[%s1695_s24 + $0x70] sm:$0xff] %v170_v14  ;;  %v174_v16 = vld [vmem:[%s1690_s23 + $0x100] sm:$0xff]  ;;  %v176_v17 = vld [vmem:[%s1690_s23 + $0x108] sm:$0xff]  ;;  %173 = vst [vmem:[%s1695_s24 + $0x78] sm:$0xff] %v172_v15 }
  0x18   : > { %175 = vst [vmem:[%s1695_s24 + $0x80] sm:$0xff] %v174_v16  ;;  %177 = vst [vmem:[%s1695_s24 + $0x88] sm:$0xff] %v176_v17  ;;  %v178_v18 = vld [vmem:[%s1690_s23 + $0x120] sm:$0xff]  ;;  %v180_v19 = vld [vmem:[%s1690_s23 + $0x128] sm:$0xff] }
  0x19   : > { %v182_v20 = vld [vmem:[%s1690_s23 + $0x140] sm:$0xff]  ;;  %179 = vst [vmem:[%s1695_s24 + $0x90] sm:$0xff] %v178_v18  ;;  %181 = vst [vmem:[%s1695_s24 + $0x98] sm:$0xff] %v180_v19  ;;  %v184_v21 = vld [vmem:[%s1690_s23 + $0x148] sm:$0xff] }
  0x1a   : > { %183 = vst [vmem:[%s1695_s24 + $0xa0] sm:$0xff] %v182_v20  ;;  %v186_v22 = vld [vmem:[%s1690_s23 + $0x160] sm:$0xff]  ;;  %v188_v23 = vld [vmem:[%s1690_s23 + $0x168] sm:$0xff]  ;;  %185 = vst [vmem:[%s1695_s24 + $0xa8] sm:$0xff] %v184_v21 }
  0x1b   : > { %187 = vst [vmem:[%s1695_s24 + $0xb0] sm:$0xff] %v186_v22  ;;  %189 = vst [vmem:[%s1695_s24 + $0xb8] sm:$0xff] %v188_v23  ;;  %v190_v24 = vld [vmem:[%s1690_s23 + $0x180] sm:$0xff]  ;;  %v192_v25 = vld [vmem:[%s1690_s23 + $0x188] sm:$0xff] }
  0x1c   : > { %v194_v26 = vld [vmem:[%s1690_s23 + $0x1a0] sm:$0xff]  ;;  %191 = vst [vmem:[%s1695_s24 + $0xc0] sm:$0xff] %v190_v24  ;;  %193 = vst [vmem:[%s1695_s24 + $0xc8] sm:$0xff] %v192_v25  ;;  %v196_v27 = vld [vmem:[%s1690_s23 + $0x1a8] sm:$0xff] }
  0x1d   : > { %195 = vst [vmem:[%s1695_s24 + $0xd0] sm:$0xff] %v194_v26  ;;  %v198_v28 = vld [vmem:[%s1690_s23 + $0x1c0] sm:$0xff]  ;;  %v200_v29 = vld [vmem:[%s1690_s23 + $0x1c8] sm:$0xff]  ;;  %197 = vst [vmem:[%s1695_s24 + $0xd8] sm:$0xff] %v196_v27 }
  0x1e   : > { %199 = vst [vmem:[%s1695_s24 + $0xe0] sm:$0xff] %v198_v28  ;;  %201 = vst [vmem:[%s1695_s24 + $0xe8] sm:$0xff] %v200_v29  ;;  %v202_v30 = vld [vmem:[%s1690_s23 + $0x1e0] sm:$0xff]  ;;  %v204_v31 = vld [vmem:[%s1690_s23 + $0x1e8] sm:$0xff] }
  0x1f   : > { %203 = vst [vmem:[%s1695_s24 + $0xf0] sm:$0xff] %v202_v30  ;;  %205 = vst [vmem:[%s1695_s24 + $0xf8] sm:$0xff] %v204_v31 }
  0x20 PF: > { %p1187_p6 = scmp.ge.s32.totalorder %s1629_s13, 1  ;;  %p210_p7 = scmp.lt.s32.totalorder %s1629_s13, 3 }
  0x22   : > { %p211_p8 = pnand %p1187_p6, %p210_p7 }
  0x23   : > { %s217_s25 = sand.u32 (!%p211_p8), 1, %s1613_s9   ;;  %p1189_p9 = scmp.ne.s32.totalorder (!%p211_p8), %s1621_s11, 0 }
  0x24   : > { %214 = sbr.rel (%p211_p8) target bundleno = 374 (0x176), region = 47  ;;  %s1188_s26 = sshll.u32 (!%p211_p8), %s217_s25, 8 }
  0x25   : > { %s1761_s27 = scalar_lea.vmem (!%p211_p8), [#allocation3], %s1188_s26 }
  0x29   : > { %250 = sbr.rel (%p1189_p9) target bundleno = 55 (0x37), region = 55 }
  0x2e   : > { %v1631_v32 = vmov 0.0  }
  0x2f   : > { %251 = vst [vmem:[#allocation2 + $0x30] sm:$0xff] %v1631_v32  ;;  %252 = vst [vmem:[#allocation2] sm:$0xff] %v1631_v32 }
  0x30   : > { %253 = vst [vmem:[#allocation2 + $0x58] sm:$0xff] %v1631_v32  ;;  %254 = vst [vmem:[#allocation2 + $0x18] sm:$0xff] %v1631_v32 }
  0x31   : > { %255 = vst [vmem:[#allocation2 + $0x50] sm:$0xff] %v1631_v32  ;;  %256 = vst [vmem:[#allocation2 + $0x68] sm:$0xff] %v1631_v32 }
  0x32   : > { %257 = vst [vmem:[#allocation2 + $0x8] sm:$0xff] %v1631_v32  ;;  %258 = vst [vmem:[#allocation2 + $0x48] sm:$0xff] %v1631_v32 }
  0x33   : > { %259 = vst [vmem:[#allocation2 + $0x40] sm:$0xff] %v1631_v32  ;;  %260 = vst [vmem:[#allocation2 + $0x20] sm:$0xff] %v1631_v32 }
  0x34   : > { %261 = vst [vmem:[#allocation2 + $0x10] sm:$0xff] %v1631_v32  ;;  %262 = vst [vmem:[#allocation2 + $0x38] sm:$0xff] %v1631_v32 }
  0x35   : > { %263 = vst [vmem:[#allocation2 + $0x60] sm:$0xff] %v1631_v32  ;;  %264 = vst [vmem:[#allocation2 + $0x70] sm:$0xff] %v1631_v32 }
  0x36   : > { %265 = vst [vmem:[#allocation2 + $0x78] sm:$0xff] %v1631_v32  ;;  %266 = vst [vmem:[#allocation2 + $0x28] sm:$0xff] %v1631_v32 }
  0x37 PF: > { %s1278_s28 = sshll.u32 %s1621_s11, 8  ;;  %v1545_v33 = vld [vmem:[%s1761_s27 + $0x4] ss:$16 sps:$4 sm:$0xff]   ;;  %v1543_v0 = vld [vmem:[%s1761_s27] ss:$16 sps:$4 sm:$0xff]   ;;  %p1256_p10 = scmp.ne.s32.totalorder %s1621_s11, 1 }
  0x38   : > { %s1768_s3 = scalar_lea.vmem %s1876_s1, %s1278_s28  ;;  %766 = vmatprep.mubr.bf16.mxu0 %v1545_v33  ;;  %v1546_v3 = vld [vmem:[%s1761_s27 + $0x8] ss:$16 sps:$4 sm:$0xff]   ;;  %v1548_v4 = vld [vmem:[%s1761_s27 + $0xc] ss:$16 sps:$4 sm:$0xff]   ;;  %v1549_v5 = vld [vmem:[%s1761_s27 + $0x24] ss:$16 sps:$4 sm:$0xff]  }
  0x39   : > { %v1511_v34 = vld [vmem:[%s1768_s3 + $0x78] sm:$0xff]   ;;  %v1515_v38 = vld [vmem:[%s1768_s3 + $0x70] sm:$0xff]   ;;  %v1519_v42 = vld [vmem:[%s1768_s3 + $0x68] sm:$0xff]   ;;  %863 = vmatprep.mubr.bf16.mxu1 %v1548_v4 }
  0x3a   : > { %v1512_v35 = vld [vmem:[%s1768_s3 + $0xf8] sm:$0xff]   ;;  %1342 = vmatprep.subr.bf16.mxu0 %v1511_v34  ;;  %v1516_v39 = vld [vmem:[%s1768_s3 + $0xf0] sm:$0xff]   ;;  %v1520_v43 = vld [vmem:[%s1768_s3 + $0xe8] sm:$0xff]  }
  0x3b   : > { %v1513_v36 = vld [vmem:[%s1768_s3 + $0x38] sm:$0xff]   ;;  %1406 = vmatprep.subr.bf16.mxu1 %v1512_v35  ;;  %v1517_v40 = vld [vmem:[%s1768_s3 + $0x30] sm:$0xff]   ;;  %v1521_v44 = vld [vmem:[%s1768_s3 + $0x28] sm:$0xff]  }
  0x3c   : > { %v1514_v37 = vld [vmem:[%s1768_s3 + $0xb8] sm:$0xff]   ;;  %1343 = vmatpush3.bf16.msra.mxu0 %v1513_v36  ;;  %v1518_v41 = vld [vmem:[%s1768_s3 + $0xb0] sm:$0xff]   ;;  %v1522_v45 = vld [vmem:[%s1768_s3 + $0xa8] sm:$0xff]  }
  0x3d   : > { %1407 = vmatpush3.bf16.msra.mxu1 %v1514_v37  ;;  %1344 = vmatprep.subr.bf16.mxu0 %v1515_v38  ;;  %v1523_v46 = vld [vmem:[%s1768_s3 + $0x60] sm:$0xff]   ;;  %v1527_v50 = vld [vmem:[%s1768_s3 + $0x58] sm:$0xff]   ;;  %v1531_v54 = vld [vmem:[%s1768_s3 + $0x50] sm:$0xff]  }
  0x3e   : > { %1408 = vmatprep.subr.bf16.mxu1 %v1516_v39  ;;  %v1524_v47 = vld [vmem:[%s1768_s3 + $0xe0] sm:$0xff]   ;;  %v1528_v51 = vld [vmem:[%s1768_s3 + $0xd8] sm:$0xff]   ;;  %v1532_v55 = vld [vmem:[%s1768_s3 + $0xd0] sm:$0xff]  }
  0x3f   : > { %v1525_v48 = vld [vmem:[%s1768_s3 + $0x20] sm:$0xff]   ;;  %v1529_v52 = vld [vmem:[%s1768_s3 + $0x18] sm:$0xff]   ;;  %v1533_v56 = vld [vmem:[%s1768_s3 + $0x10] sm:$0xff]  }
  0x40   : > { %1345 = vmatpush3.bf16.msra.mxu0 %v1517_v40  ;;  %v1526_v49 = vld [vmem:[%s1768_s3 + $0xa0] sm:$0xff]   ;;  %v1530_v53 = vld [vmem:[%s1768_s3 + $0x98] sm:$0xff]   ;;  %v1534_v57 = vld [vmem:[%s1768_s3 + $0x90] sm:$0xff]  }
  0x41   : > { %1409 = vmatpush3.bf16.msra.mxu1 %v1518_v41  ;;  %1346 = vmatprep.subr.bf16.mxu0 %v1519_v42  ;;  %v1535_v58 = vld [vmem:[%s1768_s3 + $0x48] sm:$0xff]   ;;  %v1539_v62 = vld [vmem:[%s1768_s3 + $0x40] sm:$0xff]   ;;  %v267_v40 = vld [vmem:[#allocation2 + $0x30] sm:$0xff] }
  0x42   : > { %1410 = vmatprep.subr.bf16.mxu1 %v1520_v43  ;;  %v1536_v59 = vld [vmem:[%s1768_s3 + $0xc8] sm:$0xff]   ;;  %v1540_v63 = vld [vmem:[%s1768_s3 + $0xc0] sm:$0xff]  }
  0x43   : > { %v1537_v60 = vld [vmem:[%s1768_s3 + $0x8] sm:$0xff]   ;;  %v1541_v1 = vld [vmem:[%s1768_s3] sm:$0xff]  }
  0x44   : > { %1347 = vmatpush3.bf16.msra.mxu0 %v1521_v44  ;;  %v1538_v61 = vld [vmem:[%s1768_s3 + $0x88] sm:$0xff]   ;;  %v1542_v2 = vld [vmem:[%s1768_s3 + $0x80] sm:$0xff]  }
  0x45   : > { %1411 = vmatpush3.bf16.msra.mxu1 %v1522_v45  ;;  %1348 = vmatprep.subr.bf16.mxu0 %v1523_v46  ;;  %v1551_v6 = vld [vmem:[%s1761_s27 + $0x2c] ss:$16 sps:$4 sm:$0xff]   ;;  %v1553_v7 = vld [vmem:[%s1761_s27 + $0x20] ss:$16 sps:$4 sm:$0xff]   ;;  %v1554_v8 = vld [vmem:[%s1761_s27 + $0x28] ss:$16 sps:$4 sm:$0xff]  }
  0x46   : > { %1412 = vmatprep.subr.bf16.mxu1 %v1524_v47  ;;  %v1555_v9 = vld [vmem:[%s1761_s27 + $0x44] ss:$16 sps:$4 sm:$0xff]   ;;  %v1557_v10 = vld [vmem:[%s1761_s27 + $0x4c] ss:$16 sps:$4 sm:$0xff]   ;;  %v1559_v11 = vld [vmem:[%s1761_s27 + $0x40] ss:$16 sps:$4 sm:$0xff]  }
  0x47   : > { %v1560_v12 = vld [vmem:[%s1761_s27 + $0x48] ss:$16 sps:$4 sm:$0xff]   ;;  %v1561_v13 = vld [vmem:[%s1761_s27 + $0x64] ss:$16 sps:$4 sm:$0xff]   ;;  %v1563_v14 = vld [vmem:[%s1761_s27 + $0x6c] ss:$16 sps:$4 sm:$0xff]  }
  0x48   : > { %1349 = vmatpush3.bf16.msra.mxu0 %v1525_v48  ;;  %v1565_v15 = vld [vmem:[%s1761_s27 + $0x60] ss:$16 sps:$4 sm:$0xff]   ;;  %v1566_v16 = vld [vmem:[%s1761_s27 + $0x68] ss:$16 sps:$4 sm:$0xff]   ;;  %v1567_v17 = vld [vmem:[%s1761_s27 + $0x84] ss:$16 sps:$4 sm:$0xff]  }
  0x49   : > { %1413 = vmatpush3.bf16.msra.mxu1 %v1526_v49  ;;  %1350 = vmatprep.subr.bf16.mxu0 %v1527_v50  ;;  %v1569_v18 = vld [vmem:[%s1761_s27 + $0x8c] ss:$16 sps:$4 sm:$0xff]   ;;  %v1571_v19 = vld [vmem:[%s1761_s27 + $0x80] ss:$16 sps:$4 sm:$0xff]   ;;  %v1572_v20 = vld [vmem:[%s1761_s27 + $0x88] ss:$16 sps:$4 sm:$0xff]  }
  0x4a   : > { %1414 = vmatprep.subr.bf16.mxu1 %v1528_v51  ;;  %v1573_v21 = vld [vmem:[%s1761_s27 + $0xa4] ss:$16 sps:$4 sm:$0xff]   ;;  %v1575_v22 = vld [vmem:[%s1761_s27 + $0xac] ss:$16 sps:$4 sm:$0xff]   ;;  %v1577_v23 = vld [vmem:[%s1761_s27 + $0xa0] ss:$16 sps:$4 sm:$0xff]  }
  0x4b   : > { %v1578_v24 = vld [vmem:[%s1761_s27 + $0xa8] ss:$16 sps:$4 sm:$0xff]   ;;  %v1579_v25 = vld [vmem:[%s1761_s27 + $0xc4] ss:$16 sps:$4 sm:$0xff]   ;;  %v1581_v26 = vld [vmem:[%s1761_s27 + $0xcc] ss:$16 sps:$4 sm:$0xff]  }
  0x4c   : > { %1351 = vmatpush3.bf16.msra.mxu0 %v1529_v52  ;;  %v1583_v27 = vld [vmem:[%s1761_s27 + $0xc0] ss:$16 sps:$4 sm:$0xff]   ;;  %v1584_v28 = vld [vmem:[%s1761_s27 + $0xc8] ss:$16 sps:$4 sm:$0xff]   ;;  %v1585_v29 = vld [vmem:[%s1761_s27 + $0xe4] ss:$16 sps:$4 sm:$0xff]  }
  0x4d   : > { %1415 = vmatpush3.bf16.msra.mxu1 %v1530_v53  ;;  %1352 = vmatprep.subr.bf16.mxu0 %v1531_v54  ;;  %v1587_v30 = vld [vmem:[%s1761_s27 + $0xec] ss:$16 sps:$4 sm:$0xff]   ;;  %v1589_v31 = vld [vmem:[%s1761_s27 + $0xe0] ss:$16 sps:$4 sm:$0xff]   ;;  %v1590_v32 = vld [vmem:[%s1761_s27 + $0xe8] ss:$16 sps:$4 sm:$0xff]  }
  0x4e   : > { %1416 = vmatprep.subr.bf16.mxu1 %v1532_v55  ;;  %v268_v49 = vld [vmem:[#allocation2] sm:$0xff] }
  0x50   : > { %1353 = vmatpush3.bf16.msra.mxu0 %v1533_v56 }
  0x51   : > { %1417 = vmatpush3.bf16.msra.mxu1 %v1534_v57  ;;  %1354 = vmatprep.subr.bf16.mxu0 %v1535_v58  ;;  %v269_v58 = vld [vmem:[#allocation2 + $0x58] sm:$0xff] }
  0x52   : > { %1418 = vmatprep.subr.bf16.mxu1 %v1536_v59 }
  0x54   : > { %1355 = vmatpush3.bf16.msra.mxu0 %v1537_v60 }
  0x55   : > { %1419 = vmatpush3.bf16.msra.mxu1 %v1538_v61  ;;  %1356 = vmatprep.subr.bf16.mxu0 %v1539_v62 }
  0x56   : > { %1420 = vmatprep.subr.bf16.mxu1 %v1540_v63 }
  0x58   : > { %1357 = vmatpush3.bf16.msra.mxu0 %v1541_v1 }
  0x59   : > { %1421 = vmatpush3.bf16.msra.mxu1 %v1542_v2 }
  0x5b   : > { %767 = vmatmul.mubr.bf16.vlgmr.msra.gmra.mxu0 %v1543_v0 }
  0x5c   : > { %864 = vmatmul.mubr.bf16.vlgmr.msra.gmra.mxu1 %v1546_v3  ;;  %774 = vmatprep.mubr.bf16.mxu0 %v1549_v5  ;;  %v270_v3 = vld [vmem:[#allocation2 + $0x18] sm:$0xff] }
  0x5d   : > { %871 = vmatprep.mubr.bf16.mxu1 %v1551_v6 }
  0x63   : > { %775 = vmatmul.mubr.bf16.gmra.mxu0 %v1553_v7 }
  0x64   : > { %872 = vmatmul.mubr.bf16.gmra.mxu1 %v1554_v8  ;;  %782 = vmatprep.mubr.bf16.mxu0 %v1555_v9 }
  0x65   : > { %879 = vmatprep.mubr.bf16.mxu1 %v1557_v10 }
  0x6b   : > { %783 = vmatmul.mubr.bf16.gmra.mxu0 %v1559_v11 }
  0x6c   : > { %880 = vmatmul.mubr.bf16.gmra.mxu1 %v1560_v12  ;;  %790 = vmatprep.mubr.bf16.mxu0 %v1561_v13  ;;  %v271_v12 = vld [vmem:[#allocation2 + $0x50] sm:$0xff] }
  0x6d   : > { %887 = vmatprep.mubr.bf16.mxu1 %v1563_v14 }
  0x73   : > { %791 = vmatmul.mubr.bf16.gmra.mxu0 %v1565_v15 }
  0x74   : > { %888 = vmatmul.mubr.bf16.gmra.mxu1 %v1566_v16  ;;  %798 = vmatprep.mubr.bf16.mxu0 %v1567_v17 }
  0x75   : > { %895 = vmatprep.mubr.bf16.mxu1 %v1569_v18 }
  0x7b   : > { %799 = vmatmul.mubr.bf16.gmra.mxu0 %v1571_v19 }
  0x7c   : > { %896 = vmatmul.mubr.bf16.gmra.mxu1 %v1572_v20  ;;  %806 = vmatprep.mubr.bf16.mxu0 %v1573_v21  ;;  %v272_v21 = vld [vmem:[#allocation2 + $0x68] sm:$0xff] }
  0x7d   : > { %903 = vmatprep.mubr.bf16.mxu1 %v1575_v22 }
  0x83   : > { %807 = vmatmul.mubr.bf16.gmra.mxu0 %v1577_v23 }
  0x84   : > { %904 = vmatmul.mubr.bf16.gmra.mxu1 %v1578_v24  ;;  %814 = vmatprep.mubr.bf16.mxu0 %v1579_v25 }
  0x85   : > { %911 = vmatprep.mubr.bf16.mxu1 %v1581_v26 }
  0x8b   : > { %815 = vmatmul.mubr.bf16.gmra.mxu0 %v1583_v27 }
  0x8c   : > { %912 = vmatmul.mubr.bf16.gmra.mxu1 %v1584_v28  ;;  %822 = vmatprep.mubr.bf16.mxu0 %v1585_v29 }
  0x8d   : > { %919 = vmatprep.mubr.bf16.mxu1 %v1587_v30  ;;  %v273_v30 = vld [vmem:[#allocation2 + $0x8] sm:$0xff] }
  0x93   : > { %823 = vmatmul.mubr.bf16.gmra.mxu0 %v1589_v31 }
  0x94   : > { %920 = vmatmul.mubr.bf16.gmra.mxu1 %v1590_v32 }
 0x11b   : > { %v1358_v33 = vpop.f32.mrf.mxu0 }
 0x11c   : > { %v1422_v34 = vpop.f32.mrf.mxu1 }
 0x11d   : > { %v1359_v35 = vpop.f32.mrf.mxu0 }
 0x11e   : > { %v1360_v36 = vadd.f32 %v1359_v35, %v1358_v33  ;;  %v1423_v37 = vpop.f32.mrf.mxu1 }
 0x11f   : > { %v1424_v38 = vadd.f32 %v1423_v37, %v1422_v34  ;;  %v1361_v39 = vpop.f32.mrf.mxu0 }
 0x120   : > { %v1425_v41 = vpop.f32.mrf.mxu1 }
 0x121   : > { %v866_v42 = vadd.f32 %v1424_v38, %v1360_v36  ;;  %v1362_v43 = vpop.f32.mrf.mxu0 }
 0x122   : > { %v1363_v44 = vadd.f32 %v1362_v43, %v1361_v39  ;;  %v1426_v45 = vpop.f32.mrf.mxu1  ;;  %v274_v39 = vld [vmem:[#allocation2 + $0x48] sm:$0xff] }
 0x123   : > { %v928_v46 = vadd.f32 %v866_v42, %v267_v40  ;;  %v1427_v47 = vadd.f32 %v1426_v45, %v1425_v41  ;;  %v1364_v48 = vpop.f32.mrf.mxu0 }
 0x124   : > { %v1428_v50 = vpop.f32.mrf.mxu1 }
 0x125   : > { %944 = vst [vmem:[#allocation2 + $0x30] sm:$0xff] %v928_v46  ;;  %v869_v51 = vadd.f32 %v1427_v47, %v1363_v44  ;;  %v1365_v52 = vpop.f32.mrf.mxu0 }
 0x126   : > { %v1366_v53 = vadd.f32 %v1365_v52, %v1364_v48  ;;  %v1429_v54 = vpop.f32.mrf.mxu1  ;;  %v275_v48 = vld [vmem:[#allocation2 + $0x40] sm:$0xff] }
 0x127   : > { %v929_v55 = vadd.f32 %v869_v51, %v268_v49  ;;  %v1430_v56 = vadd.f32 %v1429_v54, %v1428_v50  ;;  %v1367_v57 = vpop.f32.mrf.mxu0 }
 0x128   : > { %v1431_v59 = vpop.f32.mrf.mxu1 }
 0x129   : > { %945 = vst [vmem:[#allocation2] sm:$0xff] %v929_v55  ;;  %v874_v60 = vadd.f32 %v1430_v56, %v1366_v53  ;;  %v1368_v61 = vpop.f32.mrf.mxu0 }
 0x12a   : > { %v1369_v62 = vadd.f32 %v1368_v61, %v1367_v57  ;;  %v1432_v63 = vpop.f32.mrf.mxu1  ;;  %v276_v57 = vld [vmem:[#allocation2 + $0x20] sm:$0xff] }
 0x12b   : > { %v930_v0 = vadd.f32 %v874_v60, %v269_v58  ;;  %v1433_v1 = vadd.f32 %v1432_v63, %v1431_v59  ;;  %v1370_v2 = vpop.f32.mrf.mxu0 }
 0x12c   : > { %v1434_v4 = vpop.f32.mrf.mxu1 }
 0x12d   : > { %946 = vst [vmem:[#allocation2 + $0x58] sm:$0xff] %v930_v0  ;;  %v877_v5 = vadd.f32 %v1433_v1, %v1369_v62  ;;  %v1371_v6 = vpop.f32.mrf.mxu0 }
 0x12e   : > { %v1372_v7 = vadd.f32 %v1371_v6, %v1370_v2  ;;  %v1435_v8 = vpop.f32.mrf.mxu1  ;;  %v277_v2 = vld [vmem:[#allocation2 + $0x10] sm:$0xff] }
 0x12f   : > { %v931_v9 = vadd.f32 %v877_v5, %v270_v3  ;;  %v1436_v10 = vadd.f32 %v1435_v8, %v1434_v4  ;;  %v1373_v11 = vpop.f32.mrf.mxu0 }
 0x130   : > { %v1437_v13 = vpop.f32.mrf.mxu1 }
 0x131   : > { %947 = vst [vmem:[#allocation2 + $0x18] sm:$0xff] %v931_v9  ;;  %v882_v14 = vadd.f32 %v1436_v10, %v1372_v7  ;;  %v1374_v15 = vpop.f32.mrf.mxu0 }
 0x132   : > { %v1375_v16 = vadd.f32 %v1374_v15, %v1373_v11  ;;  %v1438_v17 = vpop.f32.mrf.mxu1  ;;  %v278_v11 = vld [vmem:[#allocation2 + $0x38] sm:$0xff] }
 0x133   : > { %v932_v18 = vadd.f32 %v882_v14, %v271_v12  ;;  %v1439_v19 = vadd.f32 %v1438_v17, %v1437_v13  ;;  %v1376_v20 = vpop.f32.mrf.mxu0 }
 0x134   : > { %v1440_v22 = vpop.f32.mrf.mxu1 }
 0x135   : > { %948 = vst [vmem:[#allocation2 + $0x50] sm:$0xff] %v932_v18  ;;  %v885_v23 = vadd.f32 %v1439_v19, %v1375_v16  ;;  %v1377_v24 = vpop.f32.mrf.mxu0 }
 0x136   : > { %v1378_v25 = vadd.f32 %v1377_v24, %v1376_v20  ;;  %v1441_v26 = vpop.f32.mrf.mxu1  ;;  %v279_v20 = vld [vmem:[#allocation2 + $0x60] sm:$0xff] }
 0x137   : > { %v933_v27 = vadd.f32 %v885_v23, %v272_v21  ;;  %v1442_v28 = vadd.f32 %v1441_v26, %v1440_v22  ;;  %v1379_v29 = vpop.f32.mrf.mxu0 }
 0x138   : > { %v1443_v31 = vpop.f32.mrf.mxu1 }
 0x139   : > { %949 = vst [vmem:[#allocation2 + $0x68] sm:$0xff] %v933_v27  ;;  %v890_v32 = vadd.f32 %v1442_v28, %v1378_v25  ;;  %v1380_v33 = vpop.f32.mrf.mxu0 }
 0x13a   : > { %v1381_v34 = vadd.f32 %v1380_v33, %v1379_v29  ;;  %v1444_v35 = vpop.f32.mrf.mxu1  ;;  %v280_v29 = vld [vmem:[#allocation2 + $0x70] sm:$0xff] }
 0x13b   : > { %v934_v36 = vadd.f32 %v890_v32, %v273_v30  ;;  %v1445_v37 = vadd.f32 %v1444_v35, %v1443_v31  ;;  %v1382_v38 = vpop.f32.mrf.mxu0 }
 0x13c   : > { %v1446_v40 = vpop.f32.mrf.mxu1 }
 0x13d   : > { %950 = vst [vmem:[#allocation2 + $0x8] sm:$0xff] %v934_v36  ;;  %v893_v41 = vadd.f32 %v1445_v37, %v1381_v34  ;;  %v1383_v42 = vpop.f32.mrf.mxu0 }
 0x13e   : > { %v1384_v43 = vadd.f32 %v1383_v42, %v1382_v38  ;;  %v1447_v44 = vpop.f32.mrf.mxu1  ;;  %v281_v38 = vld [vmem:[#allocation2 + $0x78] sm:$0xff] }
 0x13f   : > { %v935_v45 = vadd.f32 %v893_v41, %v274_v39  ;;  %v1448_v46 = vadd.f32 %v1447_v44, %v1446_v40  ;;  %v1385_v47 = vpop.f32.mrf.mxu0 }
 0x140   : > { %v1449_v49 = vpop.f32.mrf.mxu1 }
 0x141   : > { %951 = vst [vmem:[#allocation2 + $0x48] sm:$0xff] %v935_v45  ;;  %v898_v50 = vadd.f32 %v1448_v46, %v1384_v43  ;;  %v1386_v51 = vpop.f32.mrf.mxu0  ;;  %v282_v46 = vld [vmem:[#allocation2 + $0x28] sm:$0xff] }
 0x142   : > { %v1387_v52 = vadd.f32 %v1386_v51, %v1385_v47  ;;  %v1450_v53 = vpop.f32.mrf.mxu1 }
 0x143   : > { %v936_v54 = vadd.f32 %v898_v50, %v275_v48  ;;  %v1451_v55 = vadd.f32 %v1450_v53, %v1449_v49  ;;  %v1388_v56 = vpop.f32.mrf.mxu0 }
 0x144   : > { %v1452_v58 = vpop.f32.mrf.mxu1 }
 0x145   : > { %952 = vst [vmem:[#allocation2 + $0x40] sm:$0xff] %v936_v54  ;;  %v901_v59 = vadd.f32 %v1451_v55, %v1387_v52  ;;  %v1389_v60 = vpop.f32.mrf.mxu0 }
 0x146   : > { %v1390_v61 = vadd.f32 %v1389_v60, %v1388_v56  ;;  %v1453_v62 = vpop.f32.mrf.mxu1 }
 0x147   : > { %v937_v63 = vadd.f32 %v901_v59, %v276_v57  ;;  %v1454_v0 = vadd.f32 %v1453_v62, %v1452_v58  ;;  %v1391_v1 = vpop.f32.mrf.mxu0 }
 0x148   : > { %v1455_v3 = vpop.f32.mrf.mxu1 }
 0x149   : > { %953 = vst [vmem:[#allocation2 + $0x20] sm:$0xff] %v937_v63  ;;  %v906_v4 = vadd.f32 %v1454_v0, %v1390_v61  ;;  %v1392_v5 = vpop.f32.mrf.mxu0 }
 0x14a   : > { %v1393_v6 = vadd.f32 %v1392_v5, %v1391_v1  ;;  %v1456_v7 = vpop.f32.mrf.mxu1 }
 0x14b   : > { %v938_v8 = vadd.f32 %v906_v4, %v277_v2  ;;  %v1457_v9 = vadd.f32 %v1456_v7, %v1455_v3  ;;  %v1394_v10 = vpop.f32.mrf.mxu0 }
 0x14c   : > { %v1458_v12 = vpop.f32.mrf.mxu1 }
 0x14d   : > { %954 = vst [vmem:[#allocation2 + $0x10] sm:$0xff] %v938_v8  ;;  %v909_v13 = vadd.f32 %v1457_v9, %v1393_v6  ;;  %v1395_v14 = vpop.f32.mrf.mxu0 }
 0x14e   : > { %v1396_v15 = vadd.f32 %v1395_v14, %v1394_v10  ;;  %v1459_v16 = vpop.f32.mrf.mxu1 }
 0x14f   : > { %v939_v17 = vadd.f32 %v909_v13, %v278_v11  ;;  %v1460_v18 = vadd.f32 %v1459_v16, %v1458_v12  ;;  %v1397_v19 = vpop.f32.mrf.mxu0 }
 0x150   : > { %v1461_v21 = vpop.f32.mrf.mxu1 }
 0x151   : > { %955 = vst [vmem:[#allocation2 + $0x38] sm:$0xff] %v939_v17  ;;  %v914_v22 = vadd.f32 %v1460_v18, %v1396_v15  ;;  %v1398_v23 = vpop.f32.mrf.mxu0 }
 0x152   : > { %v1399_v24 = vadd.f32 %v1398_v23, %v1397_v19  ;;  %v1462_v25 = vpop.f32.mrf.mxu1 }
 0x153   : > { %v940_v26 = vadd.f32 %v914_v22, %v279_v20  ;;  %v1463_v27 = vadd.f32 %v1462_v25, %v1461_v21  ;;  %v1400_v28 = vpop.f32.mrf.mxu0 }
 0x154   : > { %v1464_v30 = vpop.f32.mrf.mxu1 }
 0x155   : > { %956 = vst [vmem:[#allocation2 + $0x60] sm:$0xff] %v940_v26  ;;  %v917_v31 = vadd.f32 %v1463_v27, %v1399_v24  ;;  %v1401_v32 = vpop.f32.mrf.mxu0 }
 0x156   : > { %v1402_v33 = vadd.f32 %v1401_v32, %v1400_v28  ;;  %v1465_v34 = vpop.f32.mrf.mxu1 }
 0x157   : > { %v941_v35 = vadd.f32 %v917_v31, %v280_v29  ;;  %v1466_v36 = vadd.f32 %v1465_v34, %v1464_v30  ;;  %v1403_v37 = vpop.f32.mrf.mxu0 }
 0x158   : > { %v1467_v39 = vpop.f32.mrf.mxu1 }
 0x159   : > { %957 = vst [vmem:[#allocation2 + $0x70] sm:$0xff] %v941_v35  ;;  %v922_v40 = vadd.f32 %v1466_v36, %v1402_v33  ;;  %v1404_v41 = vpop.f32.mrf.mxu0 }
 0x15a   : > { %v1405_v42 = vadd.f32 %v1404_v41, %v1403_v37  ;;  %v1468_v43 = vpop.f32.mrf.mxu1 }
 0x15b   : > { %v942_v44 = vadd.f32 %v922_v40, %v281_v38  ;;  %v1469_v45 = vadd.f32 %v1468_v43, %v1467_v39 }
 0x15d   : > { %958 = vst [vmem:[#allocation2 + $0x78] sm:$0xff] %v942_v44  ;;  %v925_v47 = vadd.f32 %v1469_v45, %v1405_v42  ;;  %963 = sbr.rel (%p1256_p10) target bundleno = 374 (0x176), region = 59 }
 0x15f   : > { %v943_v48 = vadd.f32 %v925_v47, %v282_v46 }
 0x161   : > { %959 = vst [vmem:[#allocation2 + $0x28] sm:$0xff] %v943_v48 }
 0x162   : > { %v964_v49 = vld [vmem:[#allocation2 + $0x30] sm:$0xff]  ;;  %v965_v50 = vld [vmem:[#allocation2] sm:$0xff]  ;;  %v966_v51 = vld [vmem:[#allocation2 + $0x58] sm:$0xff] }
 0x163   : > { %vm980_vm0 = vcmp.ge.f32.partialorder %v964_v49, 0.0  ;;  %vm981_vm1 = vcmp.ge.f32.partialorder %v965_v50, 0.0  ;;  %v996_v52 = vmul.f32 0.2, %v964_v49  ;;  %v997_v53 = vmul.f32 0.2, %v965_v50 }
 0x164   : > { %v967_v54 = vld [vmem:[#allocation2 + $0x18] sm:$0xff]  ;;  %vm982_vm2 = vcmp.ge.f32.partialorder %v966_v51, 0.0  ;;  %v998_v55 = vmul.f32 0.2, %v966_v51  ;;  %v968_v56 = vld [vmem:[#allocation2 + $0x50] sm:$0xff]  ;;  %v969_v57 = vld [vmem:[#allocation2 + $0x68] sm:$0xff] }
 0x165   : > { %v1012_v58 = vsel %vm980_vm0, %v964_v49, %v996_v52  ;;  %v1013_v59 = vsel %vm981_vm1, %v965_v50, %v997_v53  ;;  %vm983_vm3 = vcmp.ge.f32.partialorder %v967_v54, 0.0  ;;  %v999_v60 = vmul.f32 0.2, %v967_v54  ;;  %v970_v61 = vld [vmem:[#allocation2 + $0x8] sm:$0xff]  ;;  %v972_v1 = vld [vmem:[#allocation2 + $0x40] sm:$0xff]  ;;  %v974_v6 = vld [vmem:[#allocation2 + $0x10] sm:$0xff] }
 0x166   : > { %v971_v62 = vld [vmem:[#allocation2 + $0x48] sm:$0xff]  ;;  %v1298_v63 = vpack.c.bf16 %v1013_v59, %v1012_v58  ;;  %v1014_v0 = vsel %vm982_vm2, %v966_v51, %v998_v55  ;;  %vm984_vm4 = vcmp.ge.f32.partialorder %v968_v56, 0.0  ;;  %vm985_vm5 = vcmp.ge.f32.partialorder %v969_v57, 0.0  ;;  %v973_v2 = vld [vmem:[#allocation2 + $0x20] sm:$0xff]  ;;  %v975_v10 = vld [vmem:[#allocation2 + $0x38] sm:$0xff] }
 0x167   : > { %v1015_v3 = vsel %vm983_vm3, %v967_v54, %v999_v60  ;;  %v1000_v4 = vmul.f32 0.2, %v968_v56  ;;  %v1001_v5 = vmul.f32 0.2, %v969_v57  ;;  %vm986_vm6 = vcmp.ge.f32.partialorder %v970_v61, 0.0  ;;  %v976_v13 = vld [vmem:[#allocation2 + $0x60] sm:$0xff] }
 0x168   : > { %1299 = vst [vmem:[%s1877_s2] sm:$0xff] %v1298_v63   ;;  %v1303_v7 = vpack.c.bf16 %v1015_v3, %v1014_v0  ;;  %vm987_vm7 = vcmp.ge.f32.partialorder %v971_v62, 0.0  ;;  %v1002_v8 = vmul.f32 0.2, %v970_v61  ;;  %v1003_v9 = vmul.f32 0.2, %v971_v62  ;;  %v977_v18 = vld [vmem:[#allocation2 + $0x70] sm:$0xff] }
 0x169   : > { %v1016_v11 = vsel %vm984_vm4, %v968_v56, %v1000_v4  ;;  %v1017_v12 = vsel %vm985_vm5, %v969_v57, %v1001_v5  ;;  %vm988_vm8 = vcmp.ge.f32.partialorder %v972_v1, 0.0  ;;  %vm989_vm9 = vcmp.ge.f32.partialorder %v973_v2, 0.0  ;;  %v978_v21 = vld [vmem:[#allocation2 + $0x78] sm:$0xff]  ;;  %v979_v25 = vld [vmem:[#allocation2 + $0x28] sm:$0xff] }
 0x16a   : > { %1335 = vst [vmem:[%s1877_s2 + $0x8] sm:$0xff] %v1303_v7   ;;  %v1308_v14 = vpack.c.bf16 %v1017_v12, %v1016_v11  ;;  %v1018_v15 = vsel %vm986_vm6, %v970_v61, %v1002_v8  ;;  %v1019_v16 = vsel %vm987_vm7, %v971_v62, %v1003_v9  ;;  %v1004_v17 = vmul.f32 0.2, %v972_v1 }
 0x16b   : > { %v1313_v19 = vpack.c.bf16 %v1019_v16, %v1018_v15  ;;  %v1005_v20 = vmul.f32 0.2, %v973_v2  ;;  %vm990_vm10 = vcmp.ge.f32.partialorder %v974_v6, 0.0  ;;  %vm991_vm11 = vcmp.ge.f32.partialorder %v975_v10, 0.0 }
 0x16c   : > { %1336 = vst [vmem:[%s1877_s2 + $0x10] sm:$0xff] %v1308_v14   ;;  %v1020_v22 = vsel %vm988_vm8, %v972_v1, %v1004_v17  ;;  %v1006_v23 = vmul.f32 0.2, %v974_v6  ;;  %v1007_v24 = vmul.f32 0.2, %v975_v10  ;;  %vm992_vm12 = vcmp.ge.f32.partialorder %v976_v13, 0.0 }
 0x16d   : > { %1337 = vst [vmem:[%s1877_s2 + $0x18] sm:$0xff] %v1313_v19   ;;  %v1021_v26 = vsel %vm989_vm9, %v973_v2, %v1005_v20  ;;  %vm993_vm13 = vcmp.ge.f32.partialorder %v977_v18, 0.0  ;;  %v1008_v27 = vmul.f32 0.2, %v976_v13  ;;  %v1009_v28 = vmul.f32 0.2, %v977_v18 }
 0x16e   : > { %v1318_v29 = vpack.c.bf16 %v1021_v26, %v1020_v22  ;;  %v1022_v30 = vsel %vm990_vm10, %v974_v6, %v1006_v23  ;;  %v1023_v31 = vsel %vm991_vm11, %v975_v10, %v1007_v24  ;;  %vm994_vm14 = vcmp.ge.f32.partialorder %v978_v21, 0.0 }
 0x16f   : > { %v1323_v32 = vpack.c.bf16 %v1023_v31, %v1022_v30  ;;  %v1024_v33 = vsel %vm992_vm12, %v976_v13, %v1008_v27  ;;  %v1025_v34 = vsel %vm993_vm13, %v977_v18, %v1009_v28  ;;  %vm995_vm15 = vcmp.ge.f32.partialorder %v979_v25, 0.0 }
 0x170   : > { %1338 = vst [vmem:[%s1877_s2 + $0x20] sm:$0xff] %v1318_v29   ;;  %v1328_v35 = vpack.c.bf16 %v1025_v34, %v1024_v33  ;;  %v1010_v36 = vmul.f32 0.2, %v978_v21  ;;  %v1011_v37 = vmul.f32 0.2, %v979_v25 }
 0x171   : > { %1339 = vst [vmem:[%s1877_s2 + $0x28] sm:$0xff] %v1323_v32  }
 0x172   : > { %1340 = vst [vmem:[%s1877_s2 + $0x30] sm:$0xff] %v1328_v35   ;;  %v1026_v38 = vsel %vm994_vm14, %v978_v21, %v1010_v36  ;;  %v1027_v39 = vsel %vm995_vm15, %v979_v25, %v1011_v37 }
 0x173   : > { %v1333_v40 = vpack.c.bf16 %v1027_v39, %v1026_v38 }
 0x175   : > { %1341 = vst [vmem:[%s1877_s2 + $0x38] sm:$0xff] %v1333_v40  }
 0x176 PF: > { %s12_s13 = sadd.s32 1, %s1629_s13   ;;  %s1878_s9 = smov %s1617_s10 }
 0x177   : > { %p9_p11 = scmp.ge.s32.totalorder %s12_s13, 4   ;;  %s1879_s10 = smov %s1682_s17 }
 0x178   : > { %s1880_s11 = smov %s1625_s12  ;;  %s1881_s12 = smov %s1883_s14 }
 0x179   :  { %11 = sbr.rel (!%p9_p11) target bundleno = 3 (0x3), region = 95 }

// kernel: discriminator_forward.7
= control target key start
LH: loop header
LB: loop body
LE: loop exit
PB: predicated region body
PF: predicated region fallthrough
CT: control target
= control target key end

     0   :  { %s1219_s9 = smov 0   ;;  %s1221_s10 = smov 0   ;;  %s1374_s0 = inlined_call_operand.vmem [shape: bf16[32,2048], index: 0, kind: input, shape index: {}]   ;;  %s1375_s1 = inlined_call_operand.vmem [shape: bf16[4,512,256], index: 1, kind: input, shape index: {}]   ;;  %s1376_s2 = inlined_call_operand.vmem [shape: bf16[32,256], index: 2, kind: output, shape index: {}]  }
   0x1   :  { %s1223_s11 = smov 0   ;;  %s1225_s12 = smov 0  }
   0x2   :  { %s1227_s13 = smov 0  }
   0x3 LB: > { %s21_s14 = sadd.s32 1, %s1197_s12  ;;  %p40_p1 = scmp.ne.s32.totalorder %s1189_s10, %s1185_s9  ;;  %s1201_s13 = sphi %s1227_s13, %s12_s13   ;;  %s1197_s12 = sphi %s1225_s12, %s1380_s12   ;;  %s1193_s11 = sphi %s1223_s11, %s1379_s11   ;;  %s1189_s10 = sphi %s1221_s10, %s1378_s10   ;;  %s1185_s9 = sphi %s1219_s9, %s1377_s9  }
   0x4   : > { %p22_p0 = scmp.ge.s32.totalorder %s21_s14, 4  ;;  %p41_p2 = scmp.eq.s32.totalorder %s1201_s13, 0 }
   0x5   : > { %s33_s16 = sadd.s32 1, %s1189_s10  ;;  %p918_p5 = scmp.ge.s32.totalorder %s1201_s13, 4 }
   0x6   : > { %s1382_s14 = smov (%p22_p0, %s21_s14), 0  ;;  %p42_p3 = por %p41_p2, %p40_p1 }
   0x7   : > { %s29_s15 = ssub.s32 %s1197_s12, %s1382_s14  ;;  %116 = sbr.rel (%p918_p5) target bundleno = 20 (0x14), region = 20 }
   0x8   : > { %p31_p4 = scmp.eq.s32.totalorder %s29_s15, 0 }
   0xa   : > { %s1254_s17 = scalar_select %p31_p4, %s1189_s10, %s33_s16  }
   0xc   : > { %119 = sbr.rel (!%p42_p3) target bundleno = 20 (0x14), region = 24  ;;  %s121_s18 = sand.u32 (%p42_p3), 1, %s1189_s10  }
   0xd   : > { %s1008_s19 = sshll.u32 (%p42_p3), %s1197_s12, 4  ;;  %s919_s20 = sshll.u32 (%p42_p3), %s121_s18, 6 }
   0xe   : > { %s129_s23 = scalar_lea.vmem (%p42_p3), %s1374_s0, %s1008_s19  ;;  %s123_s24 = scalar_lea.vmem (%p42_p3), [#allocation3], %s919_s20 }
   0xf   : > { %v142_v0 = vld [vmem:[%s129_s23] sm:$0xff] (%p42_p3)  ;;  %v144_v1 = vld [vmem:[%s129_s23 + $0x8] sm:$0xff] (%p42_p3) }
  0x10   : > { %v146_v2 = vld [vmem:[%s129_s23 + $0x40] sm:$0xff] (%p42_p3)  ;;  %143 = vst [vmem:[%s123_s24] sm:$0xff] (%p42_p3), %v142_v0  ;;  %145 = vst [vmem:[%s123_s24 + $0x8] sm:$0xff] (%p42_p3), %v144_v1  ;;  %v148_v3 = vld [vmem:[%s129_s23 + $0x48] sm:$0xff] (%p42_p3) }
  0x11   : > { %147 = vst [vmem:[%s123_s24 + $0x10] sm:$0xff] %v146_v2  ;;  %v150_v4 = vld [vmem:[%s129_s23 + $0x80] sm:$0xff]  ;;  %v152_v5 = vld [vmem:[%s129_s23 + $0x88] sm:$0xff]  ;;  %149 = vst [vmem:[%s123_s24 + $0x18] sm:$0xff] %v148_v3 }
  0x12   : > { %151 = vst [vmem:[%s123_s24 + $0x20] sm:$0xff] %v150_v4  ;;  %153 = vst [vmem:[%s123_s24 + $0x28] sm:$0xff] %v152_v5  ;;  %v154_v6 = vld [vmem:[%s129_s23 + $0xc0] sm:$0xff]  ;;  %v156_v7 = vld [vmem:[%s129_s23 + $0xc8] sm:$0xff] }
  0x13   : > { %155 = vst [vmem:[%s123_s24 + $0x30] sm:$0xff] %v154_v6  ;;  %157 = vst [vmem:[%s123_s24 + $0x38] sm:$0xff] %v156_v7 }
  0x14 PF: > { %p922_p6 = scmp.ge.s32.totalorder %s1201_s13, 1  ;;  %p162_p7 = scmp.lt.s32.totalorder %s1201_s13, 5 }
  0x16   : > { %p163_p8 = pnand %p922_p6, %p162_p7 }
  0x17   : > { %s169_s25 = sand.u32 (!%p163_p8), 1, %s1185_s9   ;;  %p924_p9 = scmp.ne.s32.totalorder (!%p163_p8), %s1193_s11, 0 }
  0x18   : > { %166 = sbr.rel (%p163_p8) target bundleno = 332 (0x14c), region = 47  ;;  %s923_s26 = sshll.u32 (!%p163_p8), %s169_s25, 6 }
  0x19   : > { %s1265_s27 = scalar_lea.vmem (!%p163_p8), [#allocation3], %s923_s26 }
  0x1d   : > { %203 = sbr.rel (%p924_p9) target bundleno = 39 (0x27), region = 55 }
  0x22   : > { %v1203_v8 = vmov 0.0  }
  0x23   : > { %204 = vst [vmem:[#allocation2 + $0x30] sm:$0xff] %v1203_v8  ;;  %205 = vst [vmem:[#allocation2] sm:$0xff] %v1203_v8 }
  0x24   : > { %206 = vst [vmem:[#allocation2 + $0x18] sm:$0xff] %v1203_v8  ;;  %207 = vst [vmem:[#allocation2 + $0x10] sm:$0xff] %v1203_v8 }
  0x25   : > { %208 = vst [vmem:[#allocation2 + $0x8] sm:$0xff] %v1203_v8  ;;  %209 = vst [vmem:[#allocation2 + $0x20] sm:$0xff] %v1203_v8 }
  0x26   : > { %210 = vst [vmem:[#allocation2 + $0x28] sm:$0xff] %v1203_v8  ;;  %211 = vst [vmem:[#allocation2 + $0x38] sm:$0xff] %v1203_v8 }
  0x27 PF: > { %s1009_s28 = sshll.u32 %s1193_s11, 9  ;;  %v1153_v9 = vld [vmem:[%s1265_s27 + $0x4] ss:$16 sps:$4 sm:$0xff]   ;;  %v1156_v57 = vld [vmem:[%s1265_s27 + $0xc] ss:$16 sps:$4 sm:$0xff]   ;;  %p999_p10 = scmp.ne.s32.totalorder %s1193_s11, 3 }
  0x28   : > { %s1272_s3 = scalar_lea.vmem %s1375_s1, %s1009_s28  ;;  %687 = vmatprep.mubr.bf16.mxu0 %v1153_v9  ;;  %740 = vmatprep.mubr.bf16.mxu1 %v1156_v57 }
  0x29   : > { %v1055_v10 = vld [vmem:[%s1272_s3 + $0x74] ss:$8 sps:$4 sm:$0xff]   ;;  %v1059_v12 = vld [vmem:[%s1272_s3 + $0x70] ss:$8 sps:$4 sm:$0xff]   ;;  %v1061_v14 = vld [vmem:[%s1272_s3 + $0x64] ss:$8 sps:$4 sm:$0xff]  }
  0x2a   : > { %v1057_v11 = vld [vmem:[%s1272_s3 + $0x174] ss:$8 sps:$4 sm:$0xff]   ;;  %655 = vmatprep.subr.bf16.mxu0 %v1055_v10  ;;  %v1060_v13 = vld [vmem:[%s1272_s3 + $0x170] ss:$8 sps:$4 sm:$0xff]   ;;  %v1063_v15 = vld [vmem:[%s1272_s3 + $0x164] ss:$8 sps:$4 sm:$0xff]  }
  0x2b   : > { %708 = vmatprep.subr.bf16.mxu1 %v1057_v11  ;;  %656 = vmatpush1.bf16.msra.mxu0 %v1059_v12  ;;  %v1065_v16 = vld [vmem:[%s1272_s3 + $0x60] ss:$8 sps:$4 sm:$0xff]   ;;  %v1067_v18 = vld [vmem:[%s1272_s3 + $0x54] ss:$8 sps:$4 sm:$0xff]   ;;  %v1071_v20 = vld [vmem:[%s1272_s3 + $0x50] ss:$8 sps:$4 sm:$0xff]  }
  0x2c   : > { %709 = vmatpush1.bf16.msra.mxu1 %v1060_v13  ;;  %657 = vmatprep.subr.bf16.mxu0 %v1061_v14  ;;  %v1066_v17 = vld [vmem:[%s1272_s3 + $0x160] ss:$8 sps:$4 sm:$0xff]   ;;  %v1069_v19 = vld [vmem:[%s1272_s3 + $0x154] ss:$8 sps:$4 sm:$0xff]   ;;  %v1072_v21 = vld [vmem:[%s1272_s3 + $0x150] ss:$8 sps:$4 sm:$0xff]  }
  0x2d   : > { %710 = vmatprep.subr.bf16.mxu1 %v1063_v15  ;;  %v1073_v22 = vld [vmem:[%s1272_s3 + $0x44] ss:$8 sps:$4 sm:$0xff]   ;;  %v1077_v24 = vld [vmem:[%s1272_s3 + $0x40] ss:$8 sps:$4 sm:$0xff]   ;;  %v1079_v26 = vld [vmem:[%s1272_s3 + $0x34] ss:$8 sps:$4 sm:$0xff]  }
  0x2e   : > { %v1075_v23 = vld [vmem:[%s1272_s3 + $0x144] ss:$8 sps:$4 sm:$0xff]   ;;  %v1078_v25 = vld [vmem:[%s1272_s3 + $0x140] ss:$8 sps:$4 sm:$0xff]   ;;  %v1081_v27 = vld [vmem:[%s1272_s3 + $0x134] ss:$8 sps:$4 sm:$0xff]  }
  0x2f   : > { %658 = vmatpush1.bf16.msra.mxu0 %v1065_v16  ;;  %v1083_v28 = vld [vmem:[%s1272_s3 + $0x30] ss:$8 sps:$4 sm:$0xff]   ;;  %v1085_v30 = vld [vmem:[%s1272_s3 + $0x24] ss:$8 sps:$4 sm:$0xff]   ;;  %v1089_v32 = vld [vmem:[%s1272_s3 + $0x20] ss:$8 sps:$4 sm:$0xff]  }
  0x30   : > { %711 = vmatpush1.bf16.msra.mxu1 %v1066_v17  ;;  %659 = vmatprep.subr.bf16.mxu0 %v1067_v18  ;;  %v1084_v29 = vld [vmem:[%s1272_s3 + $0x130] ss:$8 sps:$4 sm:$0xff]   ;;  %v1087_v31 = vld [vmem:[%s1272_s3 + $0x124] ss:$8 sps:$4 sm:$0xff]   ;;  %v1090_v33 = vld [vmem:[%s1272_s3 + $0x120] ss:$8 sps:$4 sm:$0xff]  }
  0x31   : > { %712 = vmatprep.subr.bf16.mxu1 %v1069_v19  ;;  %v1091_v34 = vld [vmem:[%s1272_s3 + $0x14] ss:$8 sps:$4 sm:$0xff]   ;;  %v1095_v36 = vld [vmem:[%s1272_s3 + $0x10] ss:$8 sps:$4 sm:$0xff]   ;;  %v1097_v38 = vld [vmem:[%s1272_s3 + $0x4] ss:$8 sps:$4 sm:$0xff]  }
  0x32   : > { %v1093_v35 = vld [vmem:[%s1272_s3 + $0x114] ss:$8 sps:$4 sm:$0xff]   ;;  %v1096_v37 = vld [vmem:[%s1272_s3 + $0x110] ss:$8 sps:$4 sm:$0xff]   ;;  %v1099_v39 = vld [vmem:[%s1272_s3 + $0x104] ss:$8 sps:$4 sm:$0xff]  }
  0x33   : > { %660 = vmatpush1.bf16.msra.mxu0 %v1071_v20  ;;  %v1101_v40 = vld [vmem:[%s1272_s3] ss:$8 sps:$4 sm:$0xff]   ;;  %v1103_v42 = vld [vmem:[%s1272_s3 + $0xf4] ss:$8 sps:$4 sm:$0xff]   ;;  %v1107_v44 = vld [vmem:[%s1272_s3 + $0xf0] ss:$8 sps:$4 sm:$0xff]  }
  0x34   : > { %713 = vmatpush1.bf16.msra.mxu1 %v1072_v21  ;;  %661 = vmatprep.subr.bf16.mxu0 %v1073_v22  ;;  %v1102_v41 = vld [vmem:[%s1272_s3 + $0x100] ss:$8 sps:$4 sm:$0xff]   ;;  %v1105_v43 = vld [vmem:[%s1272_s3 + $0x1f4] ss:$8 sps:$4 sm:$0xff]   ;;  %v1108_v45 = vld [vmem:[%s1272_s3 + $0x1f0] ss:$8 sps:$4 sm:$0xff]  }
  0x35   : > { %714 = vmatprep.subr.bf16.mxu1 %v1075_v23  ;;  %v1109_v46 = vld [vmem:[%s1272_s3 + $0xe4] ss:$8 sps:$4 sm:$0xff]   ;;  %v1113_v48 = vld [vmem:[%s1272_s3 + $0xe0] ss:$8 sps:$4 sm:$0xff]   ;;  %v1115_v50 = vld [vmem:[%s1272_s3 + $0xd4] ss:$8 sps:$4 sm:$0xff]  }
  0x36   : > { %v1111_v47 = vld [vmem:[%s1272_s3 + $0x1e4] ss:$8 sps:$4 sm:$0xff]   ;;  %v1114_v49 = vld [vmem:[%s1272_s3 + $0x1e0] ss:$8 sps:$4 sm:$0xff]   ;;  %v1117_v51 = vld [vmem:[%s1272_s3 + $0x1d4] ss:$8 sps:$4 sm:$0xff]  }
  0x37   : > { %662 = vmatpush1.bf16.msra.mxu0 %v1077_v24  ;;  %v1119_v52 = vld [vmem:[%s1272_s3 + $0xd0] ss:$8 sps:$4 sm:$0xff]   ;;  %v1121_v54 = vld [vmem:[%s1272_s3 + $0xc4] ss:$8 sps:$4 sm:$0xff]   ;;  %v1125_v56 = vld [vmem:[%s1272_s3 + $0xc0] ss:$8 sps:$4 sm:$0xff]  }
  0x38   : > { %715 = vmatpush1.bf16.msra.mxu1 %v1078_v25  ;;  %663 = vmatprep.subr.bf16.mxu0 %v1079_v26  ;;  %v1120_v53 = vld [vmem:[%s1272_s3 + $0x1d0] ss:$8 sps:$4 sm:$0xff]   ;;  %v1123_v55 = vld [vmem:[%s1272_s3 + $0x1c4] ss:$8 sps:$4 sm:$0xff]   ;;  %v1126_v58 = vld [vmem:[%s1272_s3 + $0x1c0] ss:$8 sps:$4 sm:$0xff]  }
  0x39   : > { %716 = vmatprep.subr.bf16.mxu1 %v1081_v27  ;;  %v1127_v59 = vld [vmem:[%s1272_s3 + $0xb4] ss:$8 sps:$4 sm:$0xff]   ;;  %v1131_v61 = vld [vmem:[%s1272_s3 + $0xb0] ss:$8 sps:$4 sm:$0xff]   ;;  %v1133_v63 = vld [vmem:[%s1272_s3 + $0xa4] ss:$8 sps:$4 sm:$0xff]  }
  0x3a   : > { %v1129_v60 = vld [vmem:[%s1272_s3 + $0x1b4] ss:$8 sps:$4 sm:$0xff]   ;;  %v1132_v62 = vld [vmem:[%s1272_s3 + $0x1b0] ss:$8 sps:$4 sm:$0xff]   ;;  %v1135_v0 = vld [vmem:[%s1272_s3 + $0x1a4] ss:$8 sps:$4 sm:$0xff]  }
  0x3b   : > { %664 = vmatpush1.bf16.msra.mxu0 %v1083_v28  ;;  %v1137_v1 = vld [vmem:[%s1272_s3 + $0xa0] ss:$8 sps:$4 sm:$0xff]   ;;  %v1139_v3 = vld [vmem:[%s1272_s3 + $0x94] ss:$8 sps:$4 sm:$0xff]   ;;  %v1143_v5 = vld [vmem:[%s1272_s3 + $0x90] ss:$8 sps:$4 sm:$0xff]  }
  0x3c   : > { %717 = vmatpush1.bf16.msra.mxu1 %v1084_v29  ;;  %665 = vmatprep.subr.bf16.mxu0 %v1085_v30  ;;  %v1138_v2 = vld [vmem:[%s1272_s3 + $0x1a0] ss:$8 sps:$4 sm:$0xff]   ;;  %v1141_v4 = vld [vmem:[%s1272_s3 + $0x194] ss:$8 sps:$4 sm:$0xff]   ;;  %v1144_v6 = vld [vmem:[%s1272_s3 + $0x190] ss:$8 sps:$4 sm:$0xff]  }
  0x3d   : > { %718 = vmatprep.subr.bf16.mxu1 %v1087_v31  ;;  %v1145_v7 = vld [vmem:[%s1272_s3 + $0x84] ss:$8 sps:$4 sm:$0xff]   ;;  %v1149_v9 = vld [vmem:[%s1272_s3 + $0x80] ss:$8 sps:$4 sm:$0xff]   ;;  %v212_v18 = vld [vmem:[#allocation2 + $0x30] sm:$0xff] }
  0x3e   : > { %v1147_v8 = vld [vmem:[%s1272_s3 + $0x184] ss:$8 sps:$4 sm:$0xff]   ;;  %v1150_v10 = vld [vmem:[%s1272_s3 + $0x180] ss:$8 sps:$4 sm:$0xff]   ;;  %v214_v27 = vld [vmem:[#allocation2 + $0x18] sm:$0xff] }
  0x3f   : > { %666 = vmatpush1.bf16.msra.mxu0 %v1089_v32  ;;  %v1151_v11 = vld [vmem:[%s1265_s27] ss:$16 sps:$4 sm:$0xff]   ;;  %v1154_v12 = vld [vmem:[%s1265_s27 + $0x8] ss:$16 sps:$4 sm:$0xff]   ;;  %v1157_v13 = vld [vmem:[%s1265_s27 + $0x24] ss:$16 sps:$4 sm:$0xff]  }
  0x40   : > { %719 = vmatpush1.bf16.msra.mxu1 %v1090_v33  ;;  %667 = vmatprep.subr.bf16.mxu0 %v1091_v34  ;;  %v1159_v14 = vld [vmem:[%s1265_s27 + $0x2c] ss:$16 sps:$4 sm:$0xff]   ;;  %v1161_v15 = vld [vmem:[%s1265_s27 + $0x20] ss:$16 sps:$4 sm:$0xff]   ;;  %v1162_v16 = vld [vmem:[%s1265_s27 + $0x28] ss:$16 sps:$4 sm:$0xff]  }
  0x41   : > { %720 = vmatprep.subr.bf16.mxu1 %v1093_v35  ;;  %v213_v22 = vld [vmem:[#allocation2] sm:$0xff]  ;;  %v215_v32 = vld [vmem:[#allocation2 + $0x10] sm:$0xff] }
  0x43   : > { %668 = vmatpush1.bf16.msra.mxu0 %v1095_v36 }
  0x44   : > { %721 = vmatpush1.bf16.msra.mxu1 %v1096_v37  ;;  %669 = vmatprep.subr.bf16.mxu0 %v1097_v38  ;;  %v216_v37 = vld [vmem:[#allocation2 + $0x8] sm:$0xff] }
  0x45   : > { %722 = vmatprep.subr.bf16.mxu1 %v1099_v39 }
  0x47   : > { %670 = vmatpush1.bf16.msra.mxu0 %v1101_v40 }
  0x48   : > { %723 = vmatpush1.bf16.msra.mxu1 %v1102_v41  ;;  %671 = vmatprep.subr.bf16.mxu0 %v1103_v42  ;;  %v217_v42 = vld [vmem:[#allocation2 + $0x20] sm:$0xff] }
  0x49   : > { %724 = vmatprep.subr.bf16.mxu1 %v1105_v43 }
  0x4b   : > { %672 = vmatpush2.bf16.msra.mxu0 %v1107_v44 }
  0x4c   : > { %725 = vmatpush2.bf16.msra.mxu1 %v1108_v45  ;;  %673 = vmatprep.subr.bf16.mxu0 %v1109_v46 }
  0x4d   : > { %726 = vmatprep.subr.bf16.mxu1 %v1111_v47  ;;  %v218_v47 = vld [vmem:[#allocation2 + $0x28] sm:$0xff] }
  0x4f   : > { %674 = vmatpush2.bf16.msra.mxu0 %v1113_v48 }
  0x50   : > { %727 = vmatpush2.bf16.msra.mxu1 %v1114_v49  ;;  %675 = vmatprep.subr.bf16.mxu0 %v1115_v50 }
  0x51   : > { %728 = vmatprep.subr.bf16.mxu1 %v1117_v51 }
  0x53   : > { %676 = vmatpush2.bf16.msra.mxu0 %v1119_v52  ;;  %v219_v52 = vld [vmem:[#allocation2 + $0x38] sm:$0xff] }
  0x54   : > { %729 = vmatpush2.bf16.msra.mxu1 %v1120_v53  ;;  %677 = vmatprep.subr.bf16.mxu0 %v1121_v54 }
  0x55   : > { %730 = vmatprep.subr.bf16.mxu1 %v1123_v55 }
  0x57   : > { %678 = vmatpush2.bf16.msra.mxu0 %v1125_v56 }
  0x58   : > { %731 = vmatpush2.bf16.msra.mxu1 %v1126_v58  ;;  %679 = vmatprep.subr.bf16.mxu0 %v1127_v59 }
  0x59   : > { %732 = vmatprep.subr.bf16.mxu1 %v1129_v60 }
  0x5b   : > { %680 = vmatpush2.bf16.msra.mxu0 %v1131_v61 }
  0x5c   : > { %733 = vmatpush2.bf16.msra.mxu1 %v1132_v62  ;;  %681 = vmatprep.subr.bf16.mxu0 %v1133_v63 }
  0x5d   : > { %734 = vmatprep.subr.bf16.mxu1 %v1135_v0 }
  0x5f   : > { %682 = vmatpush2.bf16.msra.mxu0 %v1137_v1 }
  0x60   : > { %735 = vmatpush2.bf16.msra.mxu1 %v1138_v2  ;;  %683 = vmatprep.subr.bf16.mxu0 %v1139_v3 }
  0x61   : > { %736 = vmatprep.subr.bf16.mxu1 %v1141_v4 }
  0x63   : > { %684 = vmatpush2.bf16.msra.mxu0 %v1143_v5 }
  0x64   : > { %737 = vmatpush2.bf16.msra.mxu1 %v1144_v6  ;;  %685 = vmatprep.subr.bf16.mxu0 %v1145_v7 }
  0x65   : > { %738 = vmatprep.subr.bf16.mxu1 %v1147_v8 }
  0x67   : > { %686 = vmatpush2.bf16.msra.mxu0 %v1149_v9 }
  0x68   : > { %739 = vmatpush2.bf16.msra.mxu1 %v1150_v10 }
  0x6a   : > { %688 = vmatmul.mubr.bf16.vlgmr.msra.gmra.mxu0 %v1151_v11 }
  0x6b   : > { %741 = vmatmul.mubr.bf16.vlgmr.msra.gmra.mxu1 %v1154_v12  ;;  %697 = vmatprep.mubr.bf16.mxu0 %v1157_v13 }
  0x6c   : > { %750 = vmatprep.mubr.bf16.mxu1 %v1159_v14 }
  0x72   : > { %698 = vmatmul.mubr.bf16.gmra.mxu0 %v1161_v15 }
  0x73   : > { %751 = vmatmul.mubr.bf16.gmra.mxu1 %v1162_v16 }
 0x12a   : > { %v689_v17 = vpop.f32.mrf.mxu0 }
 0x12b   : > { %v742_v19 = vpop.f32.mrf.mxu1 }
 0x12c   : > { %v743_v20 = vadd.f32 %v742_v19, %v689_v17  ;;  %v691_v21 = vpop.f32.mrf.mxu0 }
 0x12d   : > { %v744_v23 = vpop.f32.mrf.mxu1 }
 0x12e   : > { %v761_v24 = vadd.f32 %v743_v20, %v212_v18  ;;  %v745_v25 = vadd.f32 %v744_v23, %v691_v21  ;;  %v693_v26 = vpop.f32.mrf.mxu0 }
 0x12f   : > { %v746_v28 = vpop.f32.mrf.mxu1 }
 0x130   : > { %769 = vst [vmem:[#allocation2 + $0x30] sm:$0xff] %v761_v24  ;;  %v762_v29 = vadd.f32 %v745_v25, %v213_v22  ;;  %v747_v30 = vadd.f32 %v746_v28, %v693_v26  ;;  %v695_v31 = vpop.f32.mrf.mxu0 }
 0x131   : > { %v748_v33 = vpop.f32.mrf.mxu1 }
 0x132   : > { %770 = vst [vmem:[#allocation2] sm:$0xff] %v762_v29  ;;  %v763_v34 = vadd.f32 %v747_v30, %v214_v27  ;;  %v749_v35 = vadd.f32 %v748_v33, %v695_v31  ;;  %v699_v36 = vpop.f32.mrf.mxu0 }
 0x133   : > { %v752_v38 = vpop.f32.mrf.mxu1 }
 0x134   : > { %771 = vst [vmem:[#allocation2 + $0x18] sm:$0xff] %v763_v34  ;;  %v764_v39 = vadd.f32 %v749_v35, %v215_v32  ;;  %v753_v40 = vadd.f32 %v752_v38, %v699_v36  ;;  %v701_v41 = vpop.f32.mrf.mxu0 }
 0x135   : > { %v754_v43 = vpop.f32.mrf.mxu1 }
 0x136   : > { %772 = vst [vmem:[#allocation2 + $0x10] sm:$0xff] %v764_v39  ;;  %v765_v44 = vadd.f32 %v753_v40, %v216_v37  ;;  %v755_v45 = vadd.f32 %v754_v43, %v701_v41  ;;  %v703_v46 = vpop.f32.mrf.mxu0 }
 0x137   : > { %v756_v48 = vpop.f32.mrf.mxu1 }
 0x138   : > { %773 = vst [vmem:[#allocation2 + $0x8] sm:$0xff] %v765_v44  ;;  %v766_v49 = vadd.f32 %v755_v45, %v217_v42  ;;  %v757_v50 = vadd.f32 %v756_v48, %v703_v46  ;;  %v705_v51 = vpop.f32.mrf.mxu0 }
 0x139   : > { %v758_v53 = vpop.f32.mrf.mxu1 }
 0x13a   : > { %774 = vst [vmem:[#allocation2 + $0x20] sm:$0xff] %v766_v49  ;;  %v767_v54 = vadd.f32 %v757_v50, %v218_v47  ;;  %v759_v55 = vadd.f32 %v758_v53, %v705_v51  ;;  %780 = sbr.rel (%p999_p10) target bundleno = 332 (0x14c), region = 59 }
 0x13c   : > { %775 = vst [vmem:[#allocation2 + $0x28] sm:$0xff] %v767_v54  ;;  %v768_v56 = vadd.f32 %v759_v55, %v219_v52 }
 0x13e   : > { %776 = vst [vmem:[#allocation2 + $0x38] sm:$0xff] %v768_v56 }
 0x13f   : > { %v781_v57 = vld [vmem:[#allocation2 + $0x30] sm:$0xff]  ;;  %v782_v58 = vld [vmem:[#allocation2] sm:$0xff]  ;;  %v783_v59 = vld [vmem:[#allocation2 + $0x18] sm:$0xff] }
 0x140   : > { %vm789_vm0 = vcmp.ge.f32.partialorder %v781_v57, 0.0  ;;  %vm790_vm1 = vcmp.ge.f32.partialorder %v782_v58, 0.0  ;;  %v797_v60 = vmul.f32 0.2, %v781_v57  ;;  %v798_v61 = vmul.f32 0.2, %v782_v58 }
 0x141   : > { %v784_v62 = vld [vmem:[#allocation2 + $0x10] sm:$0xff]  ;;  %vm791_vm2 = vcmp.ge.f32.partialorder %v783_v59, 0.0  ;;  %v799_v63 = vmul.f32 0.2, %v783_v59  ;;  %v785_v0 = vld [vmem:[#allocation2 + $0x8] sm:$0xff]  ;;  %v786_v1 = vld [vmem:[#allocation2 + $0x20] sm:$0xff] }
 0x142   : > { %v805_v2 = vsel %vm789_vm0, %v781_v57, %v797_v60  ;;  %v806_v3 = vsel %vm790_vm1, %v782_v58, %v798_v61  ;;  %vm792_vm3 = vcmp.ge.f32.partialorder %v784_v62, 0.0  ;;  %v800_v4 = vmul.f32 0.2, %v784_v62 }
 0x143   : > { %v787_v5 = vld [vmem:[#allocation2 + $0x28] sm:$0xff]  ;;  %v1010_v7 = vpack.c.bf16 %v806_v3, %v805_v2  ;;  %v807_v8 = vsel %vm791_vm2, %v783_v59, %v799_v63  ;;  %vm793_vm4 = vcmp.ge.f32.partialorder %v785_v0, 0.0  ;;  %vm794_vm5 = vcmp.ge.f32.partialorder %v786_v1, 0.0 }
 0x144   : > { %v808_v9 = vsel %vm792_vm3, %v784_v62, %v800_v4  ;;  %v801_v10 = vmul.f32 0.2, %v785_v0  ;;  %v802_v11 = vmul.f32 0.2, %v786_v1  ;;  %vm795_vm6 = vcmp.ge.f32.partialorder %v787_v5, 0.0 }
 0x145   : > { %v788_v6 = vld [vmem:[#allocation2 + $0x38] sm:$0xff]  ;;  %837 = vst [vmem:[%s1376_s2] sm:$0xff] %v1010_v7  ;;  %v1011_v12 = vpack.c.bf16 %v808_v9, %v807_v8  ;;  %v803_v13 = vmul.f32 0.2, %v787_v5 }
 0x146   : > { %vm796_vm7 = vcmp.ge.f32.partialorder %v788_v6, 0.0  ;;  %v804_v14 = vmul.f32 0.2, %v788_v6  ;;  %v809_v15 = vsel %vm793_vm4, %v785_v0, %v801_v10  ;;  %v810_v16 = vsel %vm794_vm5, %v786_v1, %v802_v11 }
 0x147   : > { %838 = vst [vmem:[%s1376_s2 + $0x8] sm:$0xff] %v1011_v12  ;;  %v1012_v17 = vpack.c.bf16 %v810_v16, %v809_v15  ;;  %v811_v18 = vsel %vm795_vm6, %v787_v5, %v803_v13 }
 0x148   : > { %v812_v19 = vsel %vm796_vm7, %v788_v6, %v804_v14 }
 0x149   : > { %v1013_v20 = vpack.c.bf16 %v812_v19, %v811_v18  ;;  %839 = vst [vmem:[%s1376_s2 + $0x10] sm:$0xff] %v1012_v17 }
 0x14b   : > { %840 = vst [vmem:[%s1376_s2 + $0x18] sm:$0xff] %v1013_v20 }
 0x14c PF: > { %s12_s13 = sadd.s32 1, %s1201_s13   ;;  %s1377_s9 = smov %s1189_s10 }
 0x14d   : > { %p9_p11 = scmp.ge.s32.totalorder %s12_s13, 6   ;;  %s1378_s10 = smov %s1254_s17 }
 0x14e   : > { %s1379_s11 = smov %s1197_s12  ;;  %s1380_s12 = smov %s1382_s14 }
 0x14f   :  { %11 = sbr.rel (!%p9_p11) target bundleno = 3 (0x3), region = 95 }

// kernel: discriminator_forward.8
= control target key start
LH: loop header
LB: loop body
LE: loop exit
PB: predicated region body
PF: predicated region fallthrough
CT: control target
= control target key end

     0   :  { %s1901_s9 = smov 0   ;;  %s1903_s10 = smov 0   ;;  %s2156_s0 = inlined_call_operand.vmem [shape: bf16[24,4096], index: 0, kind: input, shape index: {}]   ;;  %s2157_s1 = inlined_call_operand.vmem [shape: bf16[8,512,512], index: 1, kind: input, shape index: {}]   ;;  %s2158_s2 = inlined_call_operand.vmem [shape: bf16[24,512], index: 2, kind: output, shape index: {}]  }
   0x1   :  { %s1905_s11 = smov 0   ;;  %s1907_s12 = smov 0  }
   0x2   :  { %s1909_s13 = smov 0  }
   0x3 LB: > { %s21_s14 = sadd.s32 1, %s1879_s12  ;;  %p40_p1 = scmp.ne.s32.totalorder %s1871_s10, %s1867_s9  ;;  %s1883_s13 = sphi %s1909_s13, %s12_s13   ;;  %s1879_s12 = sphi %s1907_s12, %s2162_s12   ;;  %s1875_s11 = sphi %s1905_s11, %s2161_s11   ;;  %s1871_s10 = sphi %s1903_s10, %s2160_s10   ;;  %s1867_s9 = sphi %s1901_s9, %s2159_s9  }
   0x4   : > { %p22_p0 = scmp.ge.s32.totalorder %s21_s14, 8  ;;  %p41_p2 = scmp.eq.s32.totalorder %s1883_s13, 0 }
   0x5   : > { %s33_s16 = sadd.s32 1, %s1871_s10  ;;  %p1438_p5 = scmp.ge.s32.totalorder %s1883_s13, 8 }
   0x6   : > { %s2164_s14 = smov (%p22_p0, %s21_s14), 0  ;;  %p42_p3 = por %p41_p2, %p40_p1 }
   0x7   : > { %s29_s15 = ssub.s32 %s1879_s12, %s2164_s14  ;;  %116 = sbr.rel (%p1438_p5) target bundleno = 19 (0x13), region = 20 }
   0x8   : > { %p31_p4 = scmp.eq.s32.totalorder %s29_s15, 0 }
   0xa   : > { %s1936_s17 = scalar_select %p31_p4, %s1871_s10, %s33_s16  }
   0xc   : > { %119 = sbr.rel (!%p42_p3) target bundleno = 19 (0x13), region = 24  ;;  %s121_s18 = sand.u32 (%p42_p3), 1, %s1871_s10  }
   0xd   : > { %s1592_s19 = sshll.u32 (%p42_p3), %s1879_s12, 4  ;;  %s1600_s20 = smul.u32 (%p42_p3), 48, %s121_s18 }
   0xe   : > { %s129_s23 = scalar_lea.vmem (%p42_p3), %s2156_s0, %s1592_s19 }
   0xf   : > { %v142_v0 = vld [vmem:[%s129_s23] sm:$0xff] (%p42_p3)  ;;  %v144_v1 = vld [vmem:[%s129_s23 + $0x8] sm:$0xff] (%p42_p3)  ;;  %s123_s24 = scalar_lea.vmem (%p42_p3), [#allocation3], %s1600_s20 }
  0x10   : > { %v146_v2 = vld [vmem:[%s129_s23 + $0x80] sm:$0xff] (%p42_p3)  ;;  %v148_v3 = vld [vmem:[%s129_s23 + $0x88] sm:$0xff] (%p42_p3)  ;;  %143 = vst [vmem:[%s123_s24] sm:$0xff] (%p42_p3), %v142_v0  ;;  %145 = vst [vmem:[%s123_s24 + $0x8] sm:$0xff] (%p42_p3), %v144_v1 }
  0x11   : > { %v150_v4 = vld [vmem:[%s129_s23 + $0x100] sm:$0xff]  ;;  %v152_v5 = vld [vmem:[%s129_s23 + $0x108] sm:$0xff]  ;;  %147 = vst [vmem:[%s123_s24 + $0x10] sm:$0xff] %v146_v2  ;;  %149 = vst [vmem:[%s123_s24 + $0x18] sm:$0xff] %v148_v3 }
  0x12   : > { %151 = vst [vmem:[%s123_s24 + $0x20] sm:$0xff] %v150_v4  ;;  %153 = vst [vmem:[%s123_s24 + $0x28] sm:$0xff] %v152_v5 }
  0x13 PF: > { %p1441_p6 = scmp.ge.s32.totalorder %s1883_s13, 1  ;;  %p158_p7 = scmp.lt.s32.totalorder %s1883_s13, 9 }
  0x15   : > { %p159_p8 = pnand %p1441_p6, %p158_p7 }
  0x16   : > { %s165_s25 = sand.u32 (!%p159_p8), 1, %s1867_s9   ;;  %p1442_p9 = scmp.ne.s32.totalorder (!%p159_p8), %s1875_s11, 0 }
  0x17   : > { %162 = sbr.rel (%p159_p8) target bundleno = 396 (0x18c), region = 47 }
  0x18   : > { %s1601_s26 = smul.u32 (!%p159_p8), 48, %s165_s25 }
  0x1a   : > { %s1947_s27 = scalar_lea.vmem (!%p159_p8), [#allocation3], %s1601_s26 }
  0x1c   : > { %199 = sbr.rel (%p1442_p9) target bundleno = 40 (0x28), region = 55 }
  0x21   : > { %v1885_v6 = vmov 0.0  }
  0x22   : > { %200 = vst [vmem:[#allocation2 + $0x30] sm:$0xff] %v1885_v6  ;;  %201 = vst [vmem:[#allocation2] sm:$0xff] %v1885_v6 }
  0x23   : > { %202 = vst [vmem:[#allocation2 + $0x58] sm:$0xff] %v1885_v6  ;;  %203 = vst [vmem:[#allocation2 + $0x18] sm:$0xff] %v1885_v6 }
  0x24   : > { %204 = vst [vmem:[#allocation2 + $0x50] sm:$0xff] %v1885_v6  ;;  %205 = vst [vmem:[#allocation2 + $0x20] sm:$0xff] %v1885_v6 }
  0x25   : > { %206 = vst [vmem:[#allocation2 + $0x8] sm:$0xff] %v1885_v6  ;;  %207 = vst [vmem:[#allocation2 + $0x38] sm:$0xff] %v1885_v6 }
  0x26   : > { %208 = vst [vmem:[#allocation2 + $0x28] sm:$0xff] %v1885_v6  ;;  %209 = vst [vmem:[#allocation2 + $0x48] sm:$0xff] %v1885_v6 }
  0x27   : > { %210 = vst [vmem:[#allocation2 + $0x10] sm:$0xff] %v1885_v6  ;;  %211 = vst [vmem:[#allocation2 + $0x40] sm:$0xff] %v1885_v6 }
  0x28 PF: > { %s1593_s28 = sshll.u32 %s1875_s11, 10  ;;  %v1957_v7 = vld [vmem:[%s1947_s27 + $0x4] ss:$16 sps:$4 sm:$0xff]   ;;  %v2007_v54 = vld [vmem:[%s1947_s27 + $0xc] ss:$16 sps:$4 sm:$0xff]   ;;  %p1581_p10 = scmp.ne.s32.totalorder %s1875_s11, 7 }
  0x29   : > { %s1954_s3 = scalar_lea.vmem %s2157_s1, %s1593_s28  ;;  %1067 = vmatprep.mubr.bf16.mxu0 %v1957_v7  ;;  %1118 = vmatprep.mubr.bf16.mxu1 %v2007_v54 }
  0x2a   : > { %v1643_v8 = vld [vmem:[%s1954_s3 + $0xe4] ss:$16 sps:$4 sm:$0xff]   ;;  %v1647_v10 = vld [vmem:[%s1954_s3 + $0xe0] ss:$16 sps:$4 sm:$0xff]  }
  0x2b   : > { %v1645_v9 = vld [vmem:[%s1954_s3 + $0x2e4] ss:$16 sps:$4 sm:$0xff]   ;;  %1035 = vmatprep.subr.bf16.mxu0 %v1643_v8  ;;  %v1648_v11 = vld [vmem:[%s1954_s3 + $0x2e0] ss:$16 sps:$4 sm:$0xff]  }
  0x2c   : > { %1086 = vmatprep.subr.bf16.mxu1 %v1645_v9  ;;  %v1649_v12 = vld [vmem:[%s1954_s3 + $0xc4] ss:$16 sps:$4 sm:$0xff]   ;;  %1036 = vmatpush1.bf16.msra.mxu0 %v1647_v10  ;;  %v1653_v14 = vld [vmem:[%s1954_s3 + $0xc0] ss:$16 sps:$4 sm:$0xff]   ;;  %v1747_v10 = vld [vmem:[%s1954_s3 + $0xec] ss:$16 sps:$4 sm:$0xff]  }
  0x2d   : > { %1087 = vmatpush1.bf16.msra.mxu1 %v1648_v11  ;;  %v1651_v13 = vld [vmem:[%s1954_s3 + $0x2c4] ss:$16 sps:$4 sm:$0xff]   ;;  %1037 = vmatprep.subr.bf16.mxu0 %v1649_v12  ;;  %v1654_v15 = vld [vmem:[%s1954_s3 + $0x2c0] ss:$16 sps:$4 sm:$0xff]   ;;  %v1750_v11 = vld [vmem:[%s1954_s3 + $0x2ec] ss:$16 sps:$4 sm:$0xff]  }
  0x2e   : > { %1088 = vmatprep.subr.bf16.mxu1 %v1651_v13  ;;  %v1655_v16 = vld [vmem:[%s1954_s3 + $0xa4] ss:$16 sps:$4 sm:$0xff]   ;;  %v1659_v18 = vld [vmem:[%s1954_s3 + $0xa0] ss:$16 sps:$4 sm:$0xff]   ;;  %v2034_v13 = vld [vmem:[%s1947_s27 + $0x8] ss:$16 sps:$4 sm:$0xff]  }
  0x2f   : > { %v1657_v17 = vld [vmem:[%s1954_s3 + $0x2a4] ss:$16 sps:$4 sm:$0xff]   ;;  %v1660_v19 = vld [vmem:[%s1954_s3 + $0x2a0] ss:$16 sps:$4 sm:$0xff]  }
  0x30   : > { %1038 = vmatpush1.bf16.msra.mxu0 %v1653_v14  ;;  %v1661_v20 = vld [vmem:[%s1954_s3 + $0x84] ss:$16 sps:$4 sm:$0xff]   ;;  %v1665_v22 = vld [vmem:[%s1954_s3 + $0x80] ss:$16 sps:$4 sm:$0xff]   ;;  %v1745_v14 = vld [vmem:[%s1954_s3 + $0xe8] ss:$16 sps:$4 sm:$0xff]  }
  0x31   : > { %1089 = vmatpush1.bf16.msra.mxu1 %v1654_v15  ;;  %1039 = vmatprep.subr.bf16.mxu0 %v1655_v16  ;;  %v1663_v21 = vld [vmem:[%s1954_s3 + $0x284] ss:$16 sps:$4 sm:$0xff]   ;;  %v1666_v23 = vld [vmem:[%s1954_s3 + $0x280] ss:$16 sps:$4 sm:$0xff]   ;;  %v1748_v15 = vld [vmem:[%s1954_s3 + $0x2e8] ss:$16 sps:$4 sm:$0xff]  }
  0x32   : > { %1090 = vmatprep.subr.bf16.mxu1 %v1657_v17  ;;  %v1667_v24 = vld [vmem:[%s1954_s3 + $0x64] ss:$16 sps:$4 sm:$0xff]   ;;  %v1671_v26 = vld [vmem:[%s1954_s3 + $0x60] ss:$16 sps:$4 sm:$0xff]   ;;  %v1753_v16 = vld [vmem:[%s1954_s3 + $0xcc] ss:$16 sps:$4 sm:$0xff]  }
  0x33   : > { %v1669_v25 = vld [vmem:[%s1954_s3 + $0x264] ss:$16 sps:$4 sm:$0xff]   ;;  %v1672_v27 = vld [vmem:[%s1954_s3 + $0x260] ss:$16 sps:$4 sm:$0xff]   ;;  %v1756_v17 = vld [vmem:[%s1954_s3 + $0x2cc] ss:$16 sps:$4 sm:$0xff]  }
  0x34   : > { %1040 = vmatpush1.bf16.msra.mxu0 %v1659_v18  ;;  %v1673_v28 = vld [vmem:[%s1954_s3 + $0x44] ss:$16 sps:$4 sm:$0xff]   ;;  %v1677_v30 = vld [vmem:[%s1954_s3 + $0x40] ss:$16 sps:$4 sm:$0xff]   ;;  %v1751_v18 = vld [vmem:[%s1954_s3 + $0xc8] ss:$16 sps:$4 sm:$0xff]  }
  0x35   : > { %1091 = vmatpush1.bf16.msra.mxu1 %v1660_v19  ;;  %1041 = vmatprep.subr.bf16.mxu0 %v1661_v20  ;;  %v1675_v29 = vld [vmem:[%s1954_s3 + $0x244] ss:$16 sps:$4 sm:$0xff]   ;;  %v1678_v31 = vld [vmem:[%s1954_s3 + $0x240] ss:$16 sps:$4 sm:$0xff]   ;;  %v1754_v19 = vld [vmem:[%s1954_s3 + $0x2c8] ss:$16 sps:$4 sm:$0xff]  }
  0x36   : > { %1092 = vmatprep.subr.bf16.mxu1 %v1663_v21  ;;  %v1679_v32 = vld [vmem:[%s1954_s3 + $0x24] ss:$16 sps:$4 sm:$0xff]   ;;  %v1683_v34 = vld [vmem:[%s1954_s3 + $0x20] ss:$16 sps:$4 sm:$0xff]   ;;  %v1759_v20 = vld [vmem:[%s1954_s3 + $0xac] ss:$16 sps:$4 sm:$0xff]  }
  0x37   : > { %v1681_v33 = vld [vmem:[%s1954_s3 + $0x224] ss:$16 sps:$4 sm:$0xff]   ;;  %v1684_v35 = vld [vmem:[%s1954_s3 + $0x220] ss:$16 sps:$4 sm:$0xff]   ;;  %v1762_v21 = vld [vmem:[%s1954_s3 + $0x2ac] ss:$16 sps:$4 sm:$0xff]  }
  0x38   : > { %1042 = vmatpush1.bf16.msra.mxu0 %v1665_v22  ;;  %v1685_v36 = vld [vmem:[%s1954_s3 + $0x4] ss:$16 sps:$4 sm:$0xff]   ;;  %v1689_v38 = vld [vmem:[%s1954_s3] ss:$16 sps:$4 sm:$0xff]   ;;  %v1757_v22 = vld [vmem:[%s1954_s3 + $0xa8] ss:$16 sps:$4 sm:$0xff]  }
  0x39   : > { %1093 = vmatpush1.bf16.msra.mxu1 %v1666_v23  ;;  %1043 = vmatprep.subr.bf16.mxu0 %v1667_v24  ;;  %v1687_v37 = vld [vmem:[%s1954_s3 + $0x204] ss:$16 sps:$4 sm:$0xff]   ;;  %v1690_v39 = vld [vmem:[%s1954_s3 + $0x200] ss:$16 sps:$4 sm:$0xff]   ;;  %v1760_v23 = vld [vmem:[%s1954_s3 + $0x2a8] ss:$16 sps:$4 sm:$0xff]  }
  0x3a   : > { %1094 = vmatprep.subr.bf16.mxu1 %v1669_v25  ;;  %v1691_v40 = vld [vmem:[%s1954_s3 + $0x1e4] ss:$16 sps:$4 sm:$0xff]   ;;  %v1695_v42 = vld [vmem:[%s1954_s3 + $0x1e0] ss:$16 sps:$4 sm:$0xff]   ;;  %v1765_v24 = vld [vmem:[%s1954_s3 + $0x8c] ss:$16 sps:$4 sm:$0xff]  }
  0x3b   : > { %v1693_v41 = vld [vmem:[%s1954_s3 + $0x3e4] ss:$16 sps:$4 sm:$0xff]   ;;  %v1696_v43 = vld [vmem:[%s1954_s3 + $0x3e0] ss:$16 sps:$4 sm:$0xff]   ;;  %v1768_v25 = vld [vmem:[%s1954_s3 + $0x28c] ss:$16 sps:$4 sm:$0xff]  }
  0x3c   : > { %1044 = vmatpush1.bf16.msra.mxu0 %v1671_v26  ;;  %v1697_v44 = vld [vmem:[%s1954_s3 + $0x1c4] ss:$16 sps:$4 sm:$0xff]   ;;  %v1701_v46 = vld [vmem:[%s1954_s3 + $0x1c0] ss:$16 sps:$4 sm:$0xff]   ;;  %v1763_v26 = vld [vmem:[%s1954_s3 + $0x88] ss:$16 sps:$4 sm:$0xff]  }
  0x3d   : > { %1095 = vmatpush1.bf16.msra.mxu1 %v1672_v27  ;;  %1045 = vmatprep.subr.bf16.mxu0 %v1673_v28  ;;  %v1699_v45 = vld [vmem:[%s1954_s3 + $0x3c4] ss:$16 sps:$4 sm:$0xff]   ;;  %v1702_v47 = vld [vmem:[%s1954_s3 + $0x3c0] ss:$16 sps:$4 sm:$0xff]   ;;  %v1766_v27 = vld [vmem:[%s1954_s3 + $0x288] ss:$16 sps:$4 sm:$0xff]  }
  0x3e   : > { %1096 = vmatprep.subr.bf16.mxu1 %v1675_v29  ;;  %v1703_v48 = vld [vmem:[%s1954_s3 + $0x1a4] ss:$16 sps:$4 sm:$0xff]   ;;  %v1707_v50 = vld [vmem:[%s1954_s3 + $0x1a0] ss:$16 sps:$4 sm:$0xff]   ;;  %v1771_v28 = vld [vmem:[%s1954_s3 + $0x6c] ss:$16 sps:$4 sm:$0xff]  }
  0x3f   : > { %v1705_v49 = vld [vmem:[%s1954_s3 + $0x3a4] ss:$16 sps:$4 sm:$0xff]   ;;  %v1708_v51 = vld [vmem:[%s1954_s3 + $0x3a0] ss:$16 sps:$4 sm:$0xff]   ;;  %v1774_v29 = vld [vmem:[%s1954_s3 + $0x26c] ss:$16 sps:$4 sm:$0xff]  }
  0x40   : > { %1046 = vmatpush1.bf16.msra.mxu0 %v1677_v30  ;;  %v1709_v52 = vld [vmem:[%s1954_s3 + $0x184] ss:$16 sps:$4 sm:$0xff]   ;;  %v1713_v55 = vld [vmem:[%s1954_s3 + $0x180] ss:$16 sps:$4 sm:$0xff]  }
  0x41   : > { %1097 = vmatpush1.bf16.msra.mxu1 %v1678_v31  ;;  %1047 = vmatprep.subr.bf16.mxu0 %v1679_v32  ;;  %v1711_v53 = vld [vmem:[%s1954_s3 + $0x384] ss:$16 sps:$4 sm:$0xff]   ;;  %v1714_v56 = vld [vmem:[%s1954_s3 + $0x380] ss:$16 sps:$4 sm:$0xff]   ;;  %v229_v31 = vld [vmem:[%s1947_s27 + $0x28] sm:$0xff] }
  0x42   : > { %1098 = vmatprep.subr.bf16.mxu1 %v1681_v33  ;;  %v1715_v57 = vld [vmem:[%s1954_s3 + $0x164] ss:$16 sps:$4 sm:$0xff]   ;;  %v1719_v59 = vld [vmem:[%s1954_s3 + $0x160] ss:$16 sps:$4 sm:$0xff]   ;;  %v1769_v32 = vld [vmem:[%s1954_s3 + $0x68] ss:$16 sps:$4 sm:$0xff]  }
  0x43   : > { %v1717_v58 = vld [vmem:[%s1954_s3 + $0x364] ss:$16 sps:$4 sm:$0xff]   ;;  %v1720_v60 = vld [vmem:[%s1954_s3 + $0x360] ss:$16 sps:$4 sm:$0xff]   ;;  %v1772_v33 = vld [vmem:[%s1954_s3 + $0x268] ss:$16 sps:$4 sm:$0xff]  }
  0x44   : > { %1048 = vmatpush1.bf16.msra.mxu0 %v1683_v34  ;;  %v1721_v61 = vld [vmem:[%s1954_s3 + $0x144] ss:$16 sps:$4 sm:$0xff]   ;;  %v1725_v63 = vld [vmem:[%s1954_s3 + $0x140] ss:$16 sps:$4 sm:$0xff]  }
  0x45   : > { %1099 = vmatpush1.bf16.msra.mxu1 %v1684_v35  ;;  %1049 = vmatprep.subr.bf16.mxu0 %v1685_v36  ;;  %v1723_v62 = vld [vmem:[%s1954_s3 + $0x344] ss:$16 sps:$4 sm:$0xff]   ;;  %v1726_v0 = vld [vmem:[%s1954_s3 + $0x340] ss:$16 sps:$4 sm:$0xff]   ;;  %v2060_v35 = vcombine.high %v229_v31, %v229_v31 }
  0x46   : > { %1100 = vmatprep.subr.bf16.mxu1 %v1687_v37  ;;  %v1727_v1 = vld [vmem:[%s1954_s3 + $0x124] ss:$16 sps:$4 sm:$0xff]   ;;  %v1731_v3 = vld [vmem:[%s1954_s3 + $0x120] ss:$16 sps:$4 sm:$0xff]   ;;  %v2064_v37 = vcombine.low %v229_v31, %v229_v31 }
  0x47   : > { %v1729_v2 = vld [vmem:[%s1954_s3 + $0x324] ss:$16 sps:$4 sm:$0xff]   ;;  %v1732_v4 = vld [vmem:[%s1954_s3 + $0x320] ss:$16 sps:$4 sm:$0xff]  }
  0x48   : > { %1050 = vmatpush1.bf16.msra.mxu0 %v1689_v38  ;;  %v1733_v5 = vld [vmem:[%s1954_s3 + $0x104] ss:$16 sps:$4 sm:$0xff]   ;;  %v1737_v8 = vld [vmem:[%s1954_s3 + $0x100] ss:$16 sps:$4 sm:$0xff]   ;;  %v1777_v38 = vld [vmem:[%s1954_s3 + $0x4c] ss:$16 sps:$4 sm:$0xff]  }
  0x49   : > { %1101 = vmatpush1.bf16.msra.mxu1 %v1690_v39  ;;  %1051 = vmatprep.subr.bf16.mxu0 %v1691_v40  ;;  %v1735_v6 = vld [vmem:[%s1954_s3 + $0x304] ss:$16 sps:$4 sm:$0xff]   ;;  %v1738_v9 = vld [vmem:[%s1954_s3 + $0x300] ss:$16 sps:$4 sm:$0xff]   ;;  %v1780_v39 = vld [vmem:[%s1954_s3 + $0x24c] ss:$16 sps:$4 sm:$0xff]  }
  0x4a   : > { %1102 = vmatprep.subr.bf16.mxu1 %v1693_v41  ;;  %v2031_v12 = vld [vmem:[%s1947_s27] ss:$16 sps:$4 sm:$0xff]   ;;  %v1775_v40 = vld [vmem:[%s1954_s3 + $0x48] ss:$16 sps:$4 sm:$0xff]  }
  0x4b   : > { %v228_v30 = vld [vmem:[%s1947_s27 + $0x20] sm:$0xff]  ;;  %v1778_v41 = vld [vmem:[%s1954_s3 + $0x248] ss:$16 sps:$4 sm:$0xff]  }
  0x4c   : > { %1052 = vmatpush2.bf16.msra.mxu0 %v1695_v42  ;;  %v2058_v34 = vcombine.high %v228_v30, %v228_v30  ;;  %v2062_v36 = vcombine.low %v228_v30, %v228_v30  ;;  %v1783_v42 = vld [vmem:[%s1954_s3 + $0x2c] ss:$16 sps:$4 sm:$0xff]  }
  0x4d   : > { %1103 = vmatpush2.bf16.msra.mxu1 %v1696_v43  ;;  %1053 = vmatprep.subr.bf16.mxu0 %v1697_v44  ;;  %v1786_v43 = vld [vmem:[%s1954_s3 + $0x22c] ss:$16 sps:$4 sm:$0xff]   ;;  %v1781_v44 = vld [vmem:[%s1954_s3 + $0x28] ss:$16 sps:$4 sm:$0xff]  }
  0x4e   : > { %1104 = vmatprep.subr.bf16.mxu1 %v1699_v45  ;;  %v1784_v45 = vld [vmem:[%s1954_s3 + $0x228] ss:$16 sps:$4 sm:$0xff]  }
  0x50   : > { %1054 = vmatpush2.bf16.msra.mxu0 %v1701_v46  ;;  %v1789_v46 = vld [vmem:[%s1954_s3 + $0xc] ss:$16 sps:$4 sm:$0xff]  }
  0x51   : > { %1105 = vmatpush2.bf16.msra.mxu1 %v1702_v47  ;;  %1055 = vmatprep.subr.bf16.mxu0 %v1703_v48  ;;  %v1792_v47 = vld [vmem:[%s1954_s3 + $0x20c] ss:$16 sps:$4 sm:$0xff]   ;;  %v1787_v48 = vld [vmem:[%s1954_s3 + $0x8] ss:$16 sps:$4 sm:$0xff]  }
  0x52   : > { %1106 = vmatprep.subr.bf16.mxu1 %v1705_v49  ;;  %v1795_v49 = vld [vmem:[%s1954_s3 + $0x1ec] ss:$16 sps:$4 sm:$0xff]  }
  0x54   : > { %1056 = vmatpush2.bf16.msra.mxu0 %v1707_v50  ;;  %v1798_v50 = vld [vmem:[%s1954_s3 + $0x3ec] ss:$16 sps:$4 sm:$0xff]  }
  0x55   : > { %1107 = vmatpush2.bf16.msra.mxu1 %v1708_v51  ;;  %1057 = vmatprep.subr.bf16.mxu0 %v1709_v52  ;;  %v1793_v51 = vld [vmem:[%s1954_s3 + $0x1e8] ss:$16 sps:$4 sm:$0xff]  }
  0x56   : > { %1108 = vmatprep.subr.bf16.mxu1 %v1711_v53  ;;  %v1796_v52 = vld [vmem:[%s1954_s3 + $0x3e8] ss:$16 sps:$4 sm:$0xff]   ;;  %v1801_v53 = vld [vmem:[%s1954_s3 + $0x1cc] ss:$16 sps:$4 sm:$0xff]  }
  0x58   : > { %1058 = vmatpush2.bf16.msra.mxu0 %v1713_v55  ;;  %v1799_v55 = vld [vmem:[%s1954_s3 + $0x1c8] ss:$16 sps:$4 sm:$0xff]  }
  0x59   : > { %1109 = vmatpush2.bf16.msra.mxu1 %v1714_v56  ;;  %1059 = vmatprep.subr.bf16.mxu0 %v1715_v57  ;;  %v1802_v56 = vld [vmem:[%s1954_s3 + $0x3c8] ss:$16 sps:$4 sm:$0xff]   ;;  %v1807_v57 = vld [vmem:[%s1954_s3 + $0x1ac] ss:$16 sps:$4 sm:$0xff]  }
  0x5a   : > { %1110 = vmatprep.subr.bf16.mxu1 %v1717_v58  ;;  %v1810_v58 = vld [vmem:[%s1954_s3 + $0x3ac] ss:$16 sps:$4 sm:$0xff]  }
  0x5c   : > { %1060 = vmatpush2.bf16.msra.mxu0 %v1719_v59  ;;  %v1805_v59 = vld [vmem:[%s1954_s3 + $0x1a8] ss:$16 sps:$4 sm:$0xff]  }
  0x5d   : > { %1111 = vmatpush2.bf16.msra.mxu1 %v1720_v60  ;;  %1061 = vmatprep.subr.bf16.mxu0 %v1721_v61  ;;  %v1808_v60 = vld [vmem:[%s1954_s3 + $0x3a8] ss:$16 sps:$4 sm:$0xff]   ;;  %v1813_v61 = vld [vmem:[%s1954_s3 + $0x18c] ss:$16 sps:$4 sm:$0xff]  }
  0x5e   : > { %1112 = vmatprep.subr.bf16.mxu1 %v1723_v62  ;;  %v1816_v62 = vld [vmem:[%s1954_s3 + $0x38c] ss:$16 sps:$4 sm:$0xff]  }
  0x60   : > { %1062 = vmatpush2.bf16.msra.mxu0 %v1725_v63  ;;  %v1811_v63 = vld [vmem:[%s1954_s3 + $0x188] ss:$16 sps:$4 sm:$0xff]  }
  0x61   : > { %1113 = vmatpush2.bf16.msra.mxu1 %v1726_v0  ;;  %1063 = vmatprep.subr.bf16.mxu0 %v1727_v1  ;;  %v1814_v0 = vld [vmem:[%s1954_s3 + $0x388] ss:$16 sps:$4 sm:$0xff]   ;;  %v1819_v1 = vld [vmem:[%s1954_s3 + $0x16c] ss:$16 sps:$4 sm:$0xff]  }
  0x62   : > { %1114 = vmatprep.subr.bf16.mxu1 %v1729_v2  ;;  %v1822_v2 = vld [vmem:[%s1954_s3 + $0x36c] ss:$16 sps:$4 sm:$0xff]  }
  0x64   : > { %1064 = vmatpush2.bf16.msra.mxu0 %v1731_v3  ;;  %v1817_v3 = vld [vmem:[%s1954_s3 + $0x168] ss:$16 sps:$4 sm:$0xff]  }
  0x65   : > { %1115 = vmatpush2.bf16.msra.mxu1 %v1732_v4  ;;  %1065 = vmatprep.subr.bf16.mxu0 %v1733_v5  ;;  %v1820_v4 = vld [vmem:[%s1954_s3 + $0x368] ss:$16 sps:$4 sm:$0xff]   ;;  %v1829_v5 = vld [vmem:[%s1954_s3 + $0x14c] ss:$16 sps:$4 sm:$0xff]  }
  0x66   : > { %1116 = vmatprep.subr.bf16.mxu1 %v1735_v6  ;;  %v1832_v6 = vld [vmem:[%s1954_s3 + $0x34c] ss:$16 sps:$4 sm:$0xff]  }
  0x68   : > { %1066 = vmatpush2.bf16.msra.mxu0 %v1737_v8  ;;  %v1827_v8 = vld [vmem:[%s1954_s3 + $0x148] ss:$16 sps:$4 sm:$0xff]  }
  0x69   : > { %1117 = vmatpush2.bf16.msra.mxu1 %v1738_v9  ;;  %1137 = vmatprep.subr.bf16.mxu0 %v1747_v10  ;;  %v1830_v9 = vld [vmem:[%s1954_s3 + $0x348] ss:$16 sps:$4 sm:$0xff]   ;;  %v1835_v10 = vld [vmem:[%s1954_s3 + $0x12c] ss:$16 sps:$4 sm:$0xff]  }
  0x6a   : > { %1188 = vmatprep.subr.bf16.mxu1 %v1750_v11  ;;  %v1838_v11 = vld [vmem:[%s1954_s3 + $0x32c] ss:$16 sps:$4 sm:$0xff]  }
  0x6b   : > { %1068 = vmatmul.mubr.bf16.vlgmr.msra.gmra.mxu0 %v2031_v12 }
  0x6c   : > { %1119 = vmatmul.mubr.bf16.vlgmr.msra.gmra.mxu1 %v2034_v13  ;;  %1138 = vmatpush1.bf16.msra.mxu0 %v1745_v14  ;;  %v1833_v14 = vld [vmem:[%s1954_s3 + $0x128] ss:$16 sps:$4 sm:$0xff]  }
  0x6d   : > { %1189 = vmatpush1.bf16.msra.mxu1 %v1748_v15  ;;  %1139 = vmatprep.subr.bf16.mxu0 %v1753_v16  ;;  %v1836_v15 = vld [vmem:[%s1954_s3 + $0x328] ss:$16 sps:$4 sm:$0xff]   ;;  %v1841_v16 = vld [vmem:[%s1954_s3 + $0x10c] ss:$16 sps:$4 sm:$0xff]  }
  0x6e   : > { %1190 = vmatprep.subr.bf16.mxu1 %v1756_v17  ;;  %1077 = vmatprep.mubr.bf16.mxu0 %v2058_v34  ;;  %v1844_v17 = vld [vmem:[%s1954_s3 + $0x30c] ss:$16 sps:$4 sm:$0xff]  }
  0x6f   : > { %1128 = vmatprep.mubr.bf16.mxu1 %v2060_v35 }
  0x70   : > { %1140 = vmatpush1.bf16.msra.mxu0 %v1751_v18  ;;  %v1839_v18 = vld [vmem:[%s1954_s3 + $0x108] ss:$16 sps:$4 sm:$0xff]  }
  0x71   : > { %1191 = vmatpush1.bf16.msra.mxu1 %v1754_v19  ;;  %1141 = vmatprep.subr.bf16.mxu0 %v1759_v20  ;;  %v1842_v19 = vld [vmem:[%s1954_s3 + $0x308] ss:$16 sps:$4 sm:$0xff]  }
  0x72   : > { %1192 = vmatprep.subr.bf16.mxu1 %v1762_v21  ;;  %v212_v21 = vld [vmem:[#allocation2 + $0x30] sm:$0xff] }
  0x73   : > { %1078 = vmatmul.mubr.bf16.gmra.mxu0 %v2062_v36 }
  0x74   : > { %1142 = vmatpush1.bf16.msra.mxu0 %v1757_v22  ;;  %1129 = vmatmul.mubr.bf16.gmra.mxu1 %v2064_v37 }
  0x75   : > { %1193 = vmatpush1.bf16.msra.mxu1 %v1760_v23  ;;  %1143 = vmatprep.subr.bf16.mxu0 %v1765_v24 }
  0x76   : > { %1194 = vmatprep.subr.bf16.mxu1 %v1768_v25  ;;  %1169 = vmatprep.mubr.bf16.mxu0 %v1957_v7  ;;  %v1790_v7 = vld [vmem:[%s1954_s3 + $0x208] ss:$16 sps:$4 sm:$0xff]   ;;  %v213_v25 = vld [vmem:[#allocation2] sm:$0xff] }
  0x77   : > { %1220 = vmatprep.mubr.bf16.mxu1 %v2007_v54  ;;  %v1804_v54 = vld [vmem:[%s1954_s3 + $0x3cc] ss:$16 sps:$4 sm:$0xff]  }
  0x78   : > { %1144 = vmatpush1.bf16.msra.mxu0 %v1763_v26 }
  0x79   : > { %1195 = vmatpush1.bf16.msra.mxu1 %v1766_v27  ;;  %1145 = vmatprep.subr.bf16.mxu0 %v1771_v28 }
  0x7a   : > { %1196 = vmatprep.subr.bf16.mxu1 %v1774_v29  ;;  %v216_v29 = vld [vmem:[#allocation2 + $0x50] sm:$0xff] }
  0x7c   : > { %1146 = vmatpush1.bf16.msra.mxu0 %v1769_v32 }
  0x7d   : > { %1197 = vmatpush1.bf16.msra.mxu1 %v1772_v33  ;;  %1147 = vmatprep.subr.bf16.mxu0 %v1777_v38  ;;  %v217_v33 = vld [vmem:[#allocation2 + $0x20] sm:$0xff] }
  0x7e   : > { %1198 = vmatprep.subr.bf16.mxu1 %v1780_v39  ;;  %v220_v39 = vld [vmem:[#allocation2 + $0x28] sm:$0xff] }
  0x80   : > { %1148 = vmatpush1.bf16.msra.mxu0 %v1775_v40 }
  0x81   : > { %1199 = vmatpush1.bf16.msra.mxu1 %v1778_v41  ;;  %1149 = vmatprep.subr.bf16.mxu0 %v1783_v42 }
  0x82   : > { %1200 = vmatprep.subr.bf16.mxu1 %v1786_v43  ;;  %v221_v43 = vld [vmem:[#allocation2 + $0x48] sm:$0xff] }
  0x84   : > { %1150 = vmatpush1.bf16.msra.mxu0 %v1781_v44 }
  0x85   : > { %1201 = vmatpush1.bf16.msra.mxu1 %v1784_v45  ;;  %1151 = vmatprep.subr.bf16.mxu0 %v1789_v46 }
  0x86   : > { %1202 = vmatprep.subr.bf16.mxu1 %v1792_v47 }
  0x88   : > { %1152 = vmatpush1.bf16.msra.mxu0 %v1787_v48 }
  0x89   : > { %1203 = vmatpush1.bf16.msra.mxu1 %v1790_v7  ;;  %1153 = vmatprep.subr.bf16.mxu0 %v1795_v49 }
  0x8a   : > { %1204 = vmatprep.subr.bf16.mxu1 %v1798_v50 }
  0x8c   : > { %1154 = vmatpush2.bf16.msra.mxu0 %v1793_v51 }
  0x8d   : > { %1205 = vmatpush2.bf16.msra.mxu1 %v1796_v52  ;;  %1155 = vmatprep.subr.bf16.mxu0 %v1801_v53  ;;  %v214_v52 = vld [vmem:[#allocation2 + $0x58] sm:$0xff] }
  0x8e   : > { %1206 = vmatprep.subr.bf16.mxu1 %v1804_v54 }
  0x90   : > { %1156 = vmatpush2.bf16.msra.mxu0 %v1799_v55 }
  0x91   : > { %1207 = vmatpush2.bf16.msra.mxu1 %v1802_v56  ;;  %1157 = vmatprep.subr.bf16.mxu0 %v1807_v57  ;;  %v215_v56 = vld [vmem:[#allocation2 + $0x18] sm:$0xff] }
  0x92   : > { %1208 = vmatprep.subr.bf16.mxu1 %v1810_v58 }
  0x94   : > { %1158 = vmatpush2.bf16.msra.mxu0 %v1805_v59 }
  0x95   : > { %1209 = vmatpush2.bf16.msra.mxu1 %v1808_v60  ;;  %1159 = vmatprep.subr.bf16.mxu0 %v1813_v61  ;;  %v218_v61 = vld [vmem:[#allocation2 + $0x8] sm:$0xff] }
  0x96   : > { %1210 = vmatprep.subr.bf16.mxu1 %v1816_v62 }
  0x98   : > { %1160 = vmatpush2.bf16.msra.mxu0 %v1811_v63 }
  0x99   : > { %1211 = vmatpush2.bf16.msra.mxu1 %v1814_v0  ;;  %1161 = vmatprep.subr.bf16.mxu0 %v1819_v1 }
  0x9a   : > { %1212 = vmatprep.subr.bf16.mxu1 %v1822_v2  ;;  %v219_v2 = vld [vmem:[#allocation2 + $0x38] sm:$0xff] }
  0x9c   : > { %1162 = vmatpush2.bf16.msra.mxu0 %v1817_v3 }
  0x9d   : > { %1213 = vmatpush2.bf16.msra.mxu1 %v1820_v4  ;;  %1163 = vmatprep.subr.bf16.mxu0 %v1829_v5 }
  0x9e   : > { %1214 = vmatprep.subr.bf16.mxu1 %v1832_v6 }
  0xa0   : > { %1164 = vmatpush2.bf16.msra.mxu0 %v1827_v8  ;;  %v222_v8 = vld [vmem:[#allocation2 + $0x10] sm:$0xff] }
  0xa1   : > { %1215 = vmatpush2.bf16.msra.mxu1 %v1830_v9  ;;  %1165 = vmatprep.subr.bf16.mxu0 %v1835_v10 }
  0xa2   : > { %1216 = vmatprep.subr.bf16.mxu1 %v1838_v11 }
  0xa4   : > { %1166 = vmatpush2.bf16.msra.mxu0 %v1833_v14 }
  0xa5   : > { %1217 = vmatpush2.bf16.msra.mxu1 %v1836_v15  ;;  %1167 = vmatprep.subr.bf16.mxu0 %v1841_v16  ;;  %v223_v15 = vld [vmem:[#allocation2 + $0x40] sm:$0xff] }
  0xa6   : > { %1218 = vmatprep.subr.bf16.mxu1 %v1844_v17 }
  0xa8   : > { %1168 = vmatpush2.bf16.msra.mxu0 %v1839_v18 }
  0xa9   : > { %1219 = vmatpush2.bf16.msra.mxu1 %v1842_v19 }
  0xab   : > { %1170 = vmatmul.mubr.bf16.vlgmr.msra.gmra.mxu0 %v2031_v12 }
  0xac   : > { %1221 = vmatmul.mubr.bf16.vlgmr.msra.gmra.mxu1 %v2034_v13  ;;  %1179 = vmatprep.mubr.bf16.mxu0 %v2058_v34 }
  0xad   : > { %1230 = vmatprep.mubr.bf16.mxu1 %v2060_v35 }
  0xb3   : > { %1180 = vmatmul.mubr.bf16.gmra.mxu0 %v2062_v36 }
  0xb4   : > { %1231 = vmatmul.mubr.bf16.gmra.mxu1 %v2064_v37 }
 0x12b   : > { %v1069_v20 = vpop.f32.mrf.mxu0 }
 0x12c   : > { %v1120_v22 = vpop.f32.mrf.mxu1 }
 0x12d   : > { %v1121_v23 = vadd.f32 %v1120_v22, %v1069_v20  ;;  %v1071_v24 = vpop.f32.mrf.mxu0 }
 0x12e   : > { %v1122_v26 = vpop.f32.mrf.mxu1 }
 0x12f   : > { %v1239_v27 = vadd.f32 %v1121_v23, %v212_v21  ;;  %v1123_v28 = vadd.f32 %v1122_v26, %v1071_v24  ;;  %v1073_v12 = vpop.f32.mrf.mxu0 }
 0x130   : > { %v1124_v13 = vpop.f32.mrf.mxu1 }
 0x131   : > { %1251 = vst [vmem:[#allocation2 + $0x30] sm:$0xff] %v1239_v27  ;;  %v1240_v30 = vadd.f32 %v1123_v28, %v213_v25  ;;  %v1125_v31 = vadd.f32 %v1124_v13, %v1073_v12  ;;  %v1075_v32 = vpop.f32.mrf.mxu0 }
 0x132   : > { %v1126_v34 = vpop.f32.mrf.mxu1 }
 0x133   : > { %1252 = vst [vmem:[#allocation2] sm:$0xff] %v1240_v30  ;;  %v1243_v35 = vadd.f32 %v1125_v31, %v216_v29  ;;  %v1127_v36 = vadd.f32 %v1126_v34, %v1075_v32  ;;  %v1079_v38 = vpop.f32.mrf.mxu0 }
 0x134   : > { %v1130_v40 = vpop.f32.mrf.mxu1 }
 0x135   : > { %1255 = vst [vmem:[#allocation2 + $0x50] sm:$0xff] %v1243_v35  ;;  %v1244_v37 = vadd.f32 %v1127_v36, %v217_v33  ;;  %v1131_v41 = vadd.f32 %v1130_v40, %v1079_v38  ;;  %v1081_v42 = vpop.f32.mrf.mxu0 }
 0x136   : > { %v1132_v44 = vpop.f32.mrf.mxu1 }
 0x137   : > { %1256 = vst [vmem:[#allocation2 + $0x20] sm:$0xff] %v1244_v37  ;;  %v1247_v45 = vadd.f32 %v1131_v41, %v220_v39  ;;  %v1133_v46 = vadd.f32 %v1132_v44, %v1081_v42  ;;  %v1083_v47 = vpop.f32.mrf.mxu0 }
 0x138   : > { %v1134_v48 = vpop.f32.mrf.mxu1 }
 0x139   : > { %1259 = vst [vmem:[#allocation2 + $0x28] sm:$0xff] %v1247_v45  ;;  %v1248_v7 = vadd.f32 %v1133_v46, %v221_v43  ;;  %v1084_v49 = vpop.f32.mrf.mxu0 }
 0x13a   : > { %v1135_v50 = vpop.f32.mrf.mxu1 }
 0x13b   : > { %1260 = vst [vmem:[#allocation2 + $0x48] sm:$0xff] %v1248_v7 }
 0x16b   : > { %v1171_v51 = vpop.f32.mrf.mxu0 }
 0x16c   : > { %v1222_v53 = vpop.f32.mrf.mxu1 }
 0x16d   : > { %v1223_v54 = vadd.f32 %v1222_v53, %v1171_v51  ;;  %v1173_v55 = vpop.f32.mrf.mxu0 }
 0x16e   : > { %v1224_v57 = vpop.f32.mrf.mxu1 }
 0x16f   : > { %v1241_v58 = vadd.f32 %v1223_v54, %v214_v52  ;;  %v1225_v59 = vadd.f32 %v1224_v57, %v1173_v55  ;;  %v1175_v60 = vpop.f32.mrf.mxu0 }
 0x170   : > { %v1226_v62 = vpop.f32.mrf.mxu1 }
 0x171   : > { %1253 = vst [vmem:[#allocation2 + $0x58] sm:$0xff] %v1241_v58  ;;  %v1242_v63 = vadd.f32 %v1225_v59, %v215_v56  ;;  %v1227_v0 = vadd.f32 %v1226_v62, %v1175_v60  ;;  %v1177_v1 = vpop.f32.mrf.mxu0 }
 0x172   : > { %v1228_v3 = vpop.f32.mrf.mxu1 }
 0x173   : > { %1254 = vst [vmem:[#allocation2 + $0x18] sm:$0xff] %v1242_v63  ;;  %v1245_v4 = vadd.f32 %v1227_v0, %v218_v61  ;;  %v1229_v5 = vadd.f32 %v1228_v3, %v1177_v1  ;;  %v1181_v6 = vpop.f32.mrf.mxu0 }
 0x174   : > { %v1232_v9 = vpop.f32.mrf.mxu1 }
 0x175   : > { %1257 = vst [vmem:[#allocation2 + $0x8] sm:$0xff] %v1245_v4  ;;  %v1246_v10 = vadd.f32 %v1229_v5, %v219_v2  ;;  %v1233_v11 = vadd.f32 %v1232_v9, %v1181_v6  ;;  %v1183_v14 = vpop.f32.mrf.mxu0 }
 0x176   : > { %v1234_v16 = vpop.f32.mrf.mxu1 }
 0x177   : > { %1258 = vst [vmem:[#allocation2 + $0x38] sm:$0xff] %v1246_v10  ;;  %v1249_v17 = vadd.f32 %v1233_v11, %v222_v8  ;;  %v1235_v18 = vadd.f32 %v1234_v16, %v1183_v14  ;;  %v1185_v19 = vpop.f32.mrf.mxu0  ;;  %1266 = sbr.rel (%p1581_p10) target bundleno = 396 (0x18c), region = 59 }
 0x178   : > { %v1236_v20 = vpop.f32.mrf.mxu1 }
 0x179   : > { %1261 = vst [vmem:[#allocation2 + $0x10] sm:$0xff] %v1249_v17  ;;  %v1250_v21 = vadd.f32 %v1235_v18, %v223_v15  ;;  %v1186_v22 = vpop.f32.mrf.mxu0 }
 0x17a   : > { %v1237_v23 = vpop.f32.mrf.mxu1 }
 0x17b   : > { %1262 = vst [vmem:[#allocation2 + $0x40] sm:$0xff] %v1250_v21 }
 0x17c   : > { %v1267_v24 = vld [vmem:[#allocation2 + $0x30] sm:$0xff]  ;;  %v1268_v25 = vld [vmem:[#allocation2] sm:$0xff]  ;;  %v1269_v26 = vld [vmem:[#allocation2 + $0x58] sm:$0xff] }
 0x17d   : > { %vm1279_vm0 = vcmp.ge.f32.partialorder %v1267_v24, 0.0  ;;  %vm1280_vm1 = vcmp.ge.f32.partialorder %v1268_v25, 0.0  ;;  %v1291_v27 = vmul.f32 0.2, %v1267_v24  ;;  %v1292_v28 = vmul.f32 0.2, %v1268_v25 }
 0x17e   : > { %v1270_v12 = vld [vmem:[#allocation2 + $0x18] sm:$0xff]  ;;  %vm1281_vm2 = vcmp.ge.f32.partialorder %v1269_v26, 0.0  ;;  %v1293_v29 = vmul.f32 0.2, %v1269_v26  ;;  %v1271_v13 = vld [vmem:[#allocation2 + $0x50] sm:$0xff]  ;;  %v1272_v30 = vld [vmem:[#allocation2 + $0x20] sm:$0xff] }
 0x17f   : > { %v1303_v31 = vsel %vm1279_vm0, %v1267_v24, %v1291_v27  ;;  %v1304_v32 = vsel %vm1280_vm1, %v1268_v25, %v1292_v28  ;;  %vm1282_vm3 = vcmp.ge.f32.partialorder %v1270_v12, 0.0  ;;  %v1294_v33 = vmul.f32 0.2, %v1270_v12  ;;  %v1273_v34 = vld [vmem:[#allocation2 + $0x8] sm:$0xff]  ;;  %v1274_v35 = vld [vmem:[#allocation2 + $0x38] sm:$0xff] }
 0x180   : > { %v1594_v36 = vpack.c.bf16 %v1304_v32, %v1303_v31  ;;  %v1305_v37 = vsel %vm1281_vm2, %v1269_v26, %v1293_v29  ;;  %vm1283_vm4 = vcmp.ge.f32.partialorder %v1271_v13, 0.0  ;;  %vm1284_vm5 = vcmp.ge.f32.partialorder %v1272_v30, 0.0  ;;  %v1275_v38 = vld [vmem:[#allocation2 + $0x28] sm:$0xff]  ;;  %v1277_v43 = vld [vmem:[#allocation2 + $0x10] sm:$0xff] }
 0x181   : > { %v1276_v39 = vld [vmem:[#allocation2 + $0x48] sm:$0xff]  ;;  %v1306_v40 = vsel %vm1282_vm3, %v1270_v12, %v1294_v33  ;;  %v1295_v41 = vmul.f32 0.2, %v1271_v13  ;;  %v1296_v42 = vmul.f32 0.2, %v1272_v30  ;;  %vm1285_vm6 = vcmp.ge.f32.partialorder %v1273_v34, 0.0 }
 0x182   : > { %1355 = vst [vmem:[%s2158_s2] sm:$0xff] %v1594_v36  ;;  %v1595_v44 = vpack.c.bf16 %v1306_v40, %v1305_v37  ;;  %vm1286_vm7 = vcmp.ge.f32.partialorder %v1274_v35, 0.0  ;;  %v1297_v45 = vmul.f32 0.2, %v1273_v34  ;;  %v1298_v46 = vmul.f32 0.2, %v1274_v35  ;;  %v1278_v47 = vld [vmem:[#allocation2 + $0x40] sm:$0xff] }
 0x183   : > { %v1307_v48 = vsel %vm1283_vm4, %v1271_v13, %v1295_v41  ;;  %v1308_v7 = vsel %vm1284_vm5, %v1272_v30, %v1296_v42  ;;  %vm1287_vm8 = vcmp.ge.f32.partialorder %v1275_v38, 0.0  ;;  %vm1288_vm9 = vcmp.ge.f32.partialorder %v1276_v39, 0.0 }
 0x184   : > { %1356 = vst [vmem:[%s2158_s2 + $0x8] sm:$0xff] %v1595_v44  ;;  %v1596_v49 = vpack.c.bf16 %v1308_v7, %v1307_v48  ;;  %v1309_v50 = vsel %vm1285_vm6, %v1273_v34, %v1297_v45  ;;  %v1310_v51 = vsel %vm1286_vm7, %v1274_v35, %v1298_v46  ;;  %v1299_v52 = vmul.f32 0.2, %v1275_v38 }
 0x185   : > { %v1597_v53 = vpack.c.bf16 %v1310_v51, %v1309_v50  ;;  %v1300_v54 = vmul.f32 0.2, %v1276_v39  ;;  %vm1289_vm10 = vcmp.ge.f32.partialorder %v1277_v43, 0.0  ;;  %vm1290_vm11 = vcmp.ge.f32.partialorder %v1278_v47, 0.0 }
 0x186   : > { %1357 = vst [vmem:[%s2158_s2 + $0x10] sm:$0xff] %v1596_v49  ;;  %v1311_v55 = vsel %vm1287_vm8, %v1275_v38, %v1299_v52  ;;  %v1301_v56 = vmul.f32 0.2, %v1277_v43  ;;  %v1302_v57 = vmul.f32 0.2, %v1278_v47 }
 0x187   : > { %1358 = vst [vmem:[%s2158_s2 + $0x18] sm:$0xff] %v1597_v53  ;;  %v1312_v58 = vsel %vm1288_vm9, %v1276_v39, %v1300_v54 }
 0x188   : > { %v1598_v59 = vpack.c.bf16 %v1312_v58, %v1311_v55  ;;  %v1313_v60 = vsel %vm1289_vm10, %v1277_v43, %v1301_v56  ;;  %v1314_v61 = vsel %vm1290_vm11, %v1278_v47, %v1302_v57 }
 0x189   : > { %v1599_v62 = vpack.c.bf16 %v1314_v61, %v1313_v60 }
 0x18a   : > { %1359 = vst [vmem:[%s2158_s2 + $0x20] sm:$0xff] %v1598_v59 }
 0x18b   : > { %1360 = vst [vmem:[%s2158_s2 + $0x28] sm:$0xff] %v1599_v62 }
 0x18c PF: > { %s12_s13 = sadd.s32 1, %s1883_s13   ;;  %s2159_s9 = smov %s1871_s10 }
 0x18d   : > { %p9_p11 = scmp.ge.s32.totalorder %s12_s13, 10   ;;  %s2160_s10 = smov %s1936_s17 }
 0x18e   : > { %s2161_s11 = smov %s1879_s12  ;;  %s2162_s12 = smov %s2164_s14 }
 0x18f   :  { %11 = sbr.rel (!%p9_p11) target bundleno = 3 (0x3), region = 95 }

// kernel: discriminator_forward.9
= control target key start
LH: loop header
LB: loop body
LE: loop exit
PB: predicated region body
PF: predicated region fallthrough
CT: control target
= control target key end

     0   :  { %s843_s12 = smov 0   ;;  %s845_s13 = smov 0   ;;  %s934_s0 = inlined_call_operand.vmem [shape: bf16[8,8192], index: 0, kind: input, shape index: {}]   ;;  %s935_s1 = inlined_call_operand.vmem [shape: bf16[16,512,128], index: 1, kind: input, shape index: {}]   ;;  %s936_s2 = inlined_call_operand.vmem [shape: f32[1,128], index: 2, kind: input, shape index: {}]   ;;  %s937_s3 = inlined_call_operand.vmem [shape: f32[8,128], index: 3, kind: output, shape index: {}]  }
   0x1   :  { %s847_s14 = smov 0  }
   0x2 LB: > { %s22_s15 = sadd.s32 1, %s816_s13  ;;  %p645_p0 = scmp.ge.s32.totalorder %s820_s14, 1  ;;  %s820_s14 = sphi %s847_s14, %s13_s14   ;;  %s816_s13 = sphi %s845_s13, %s939_s13   ;;  %s812_s12 = sphi %s843_s12, %s938_s12  }
   0x3   : > { %p23_p1 = scmp.ge.s32.totalorder %s22_s15, 16  ;;  %p156_p2 = scmp.lt.s32.totalorder %s820_s14, 17 }
   0x5   : > { %s941_s15 = smov (%p23_p1, %s22_s15), 0  ;;  %p157_p3 = pnand %p645_p0, %p156_p2 }
   0x6   : > { %s646_s16 = sshll.u32 (!%p157_p3), %s812_s12, 2  ;;  %p648_p5 = scmp.ne.s32.totalorder (!%p157_p3), %s812_s12, 0 }
   0x7   : > { %160 = sbr.rel (%p157_p3) target bundleno = 268 (0x10c), region = 32  ;;  %p186_p4 = scmp.lt.s32.totalorder (!%p157_p3), %s646_s16, 63 }
   0xc   : > { %s943_s16 = smov (!%p186_p4, %s646_s16), 63  ;;  %201 = sbr.rel (%p648_p5) target bundleno = 19 (0x13), region = 36 }
   0xd   : > { %s647_s17 = sshll.u32 %s943_s16, 2 }
   0xe   : > { %s191_s20 = scalar_lea.vmem %s934_s0, %s647_s17 }
  0x11   : > { %v822_v0 = vmov 0.0  }
  0x12   : > { %202 = vst [vmem:[#allocation2] sm:$0xff] %v822_v0 }
  0x13 PF: > { %s692_s21 = sshll.u32 %s812_s12, 8  ;;  %v869_v1 = vld [vmem:[%s191_s20] sm:$0xff]  ;;  %v871_v2 = vld [vmem:[%s191_s20 + $0x8] sm:$0xff]  ;;  %p687_p6 = scmp.ne.s32.totalorder %s812_s12, 15 }
  0x14   : > { %s876_s24 = scalar_lea.vmem %s935_s1, %s692_s21  ;;  %v652_v3 = vcombine.high %v869_v1, %v869_v1  ;;  %v654_v4 = vcombine.high %v871_v2, %v871_v2  ;;  %v651_v37 = vcombine.low %v869_v1, %v869_v1  ;;  %v653_v38 = vcombine.low %v871_v2, %v871_v2 }
  0x15   : > { %v762_v5 = vld [vmem:[%s876_s24 + $0x78] sm:$0xff]   ;;  %v766_v9 = vld [vmem:[%s876_s24 + $0x70] sm:$0xff]   ;;  %v770_v13 = vld [vmem:[%s876_s24 + $0x68] sm:$0xff]  }
  0x16   : > { %v763_v6 = vld [vmem:[%s876_s24 + $0xf8] sm:$0xff]   ;;  %511 = vmatprep.mubr.bf16.mxu0 %v652_v3  ;;  %551 = vmatprep.mubr.bf16.mxu1 %v654_v4  ;;  %v767_v10 = vld [vmem:[%s876_s24 + $0xf0] sm:$0xff]   ;;  %v771_v14 = vld [vmem:[%s876_s24 + $0xe8] sm:$0xff]  }
  0x17   : > { %693 = vmatprep.subr.bf16.mxu0 %v762_v5  ;;  %v764_v7 = vld [vmem:[%s876_s24 + $0x38] sm:$0xff]   ;;  %715 = vmatprep.subr.bf16.mxu1 %v763_v6  ;;  %v768_v11 = vld [vmem:[%s876_s24 + $0x30] sm:$0xff]   ;;  %v772_v15 = vld [vmem:[%s876_s24 + $0x28] sm:$0xff]  }
  0x18   : > { %v765_v8 = vld [vmem:[%s876_s24 + $0xb8] sm:$0xff]   ;;  %694 = vmatpush3.bf16.msra.mxu0 %v764_v7  ;;  %v769_v12 = vld [vmem:[%s876_s24 + $0xb0] sm:$0xff]   ;;  %v773_v16 = vld [vmem:[%s876_s24 + $0xa8] sm:$0xff]  }
  0x19   : > { %716 = vmatpush3.bf16.msra.mxu1 %v765_v8  ;;  %695 = vmatprep.subr.bf16.mxu0 %v766_v9  ;;  %v774_v17 = vld [vmem:[%s876_s24 + $0x60] sm:$0xff]   ;;  %v778_v21 = vld [vmem:[%s876_s24 + $0x58] sm:$0xff]   ;;  %v782_v25 = vld [vmem:[%s876_s24 + $0x50] sm:$0xff]  }
  0x1a   : > { %717 = vmatprep.subr.bf16.mxu1 %v767_v10  ;;  %v775_v18 = vld [vmem:[%s876_s24 + $0xe0] sm:$0xff]   ;;  %v779_v22 = vld [vmem:[%s876_s24 + $0xd8] sm:$0xff]   ;;  %v783_v26 = vld [vmem:[%s876_s24 + $0xd0] sm:$0xff]  }
  0x1b   : > { %v776_v19 = vld [vmem:[%s876_s24 + $0x20] sm:$0xff]   ;;  %v780_v23 = vld [vmem:[%s876_s24 + $0x18] sm:$0xff]   ;;  %v784_v27 = vld [vmem:[%s876_s24 + $0x10] sm:$0xff]  }
  0x1c   : > { %696 = vmatpush3.bf16.msra.mxu0 %v768_v11  ;;  %v777_v20 = vld [vmem:[%s876_s24 + $0xa0] sm:$0xff]   ;;  %v781_v24 = vld [vmem:[%s876_s24 + $0x98] sm:$0xff]   ;;  %v785_v28 = vld [vmem:[%s876_s24 + $0x90] sm:$0xff]  }
  0x1d   : > { %718 = vmatpush3.bf16.msra.mxu1 %v769_v12  ;;  %697 = vmatprep.subr.bf16.mxu0 %v770_v13  ;;  %v786_v29 = vld [vmem:[%s876_s24 + $0x48] sm:$0xff]   ;;  %v790_v33 = vld [vmem:[%s876_s24 + $0x40] sm:$0xff]  }
  0x1e   : > { %719 = vmatprep.subr.bf16.mxu1 %v771_v14  ;;  %v787_v30 = vld [vmem:[%s876_s24 + $0xc8] sm:$0xff]   ;;  %v791_v34 = vld [vmem:[%s876_s24 + $0xc0] sm:$0xff]  }
  0x1f   : > { %v788_v31 = vld [vmem:[%s876_s24 + $0x8] sm:$0xff]   ;;  %v792_v35 = vld [vmem:[%s876_s24] sm:$0xff]  }
  0x20   : > { %698 = vmatpush3.bf16.msra.mxu0 %v772_v15  ;;  %v789_v32 = vld [vmem:[%s876_s24 + $0x88] sm:$0xff]   ;;  %v793_v36 = vld [vmem:[%s876_s24 + $0x80] sm:$0xff]  }
  0x21   : > { %720 = vmatpush3.bf16.msra.mxu1 %v773_v16  ;;  %699 = vmatprep.subr.bf16.mxu0 %v774_v17  ;;  %v203_v46 = vld [vmem:[#allocation2] sm:$0xff] }
  0x22   : > { %721 = vmatprep.subr.bf16.mxu1 %v775_v18 }
  0x24   : > { %700 = vmatpush3.bf16.msra.mxu0 %v776_v19 }
  0x25   : > { %722 = vmatpush3.bf16.msra.mxu1 %v777_v20  ;;  %701 = vmatprep.subr.bf16.mxu0 %v778_v21 }
  0x26   : > { %723 = vmatprep.subr.bf16.mxu1 %v779_v22 }
  0x28   : > { %702 = vmatpush3.bf16.msra.mxu0 %v780_v23 }
  0x29   : > { %724 = vmatpush3.bf16.msra.mxu1 %v781_v24  ;;  %703 = vmatprep.subr.bf16.mxu0 %v782_v25 }
  0x2a   : > { %725 = vmatprep.subr.bf16.mxu1 %v783_v26 }
  0x2c   : > { %704 = vmatpush3.bf16.msra.mxu0 %v784_v27 }
  0x2d   : > { %726 = vmatpush3.bf16.msra.mxu1 %v785_v28  ;;  %705 = vmatprep.subr.bf16.mxu0 %v786_v29 }
  0x2e   : > { %727 = vmatprep.subr.bf16.mxu1 %v787_v30 }
  0x30   : > { %706 = vmatpush3.bf16.msra.mxu0 %v788_v31 }
  0x31   : > { %728 = vmatpush3.bf16.msra.mxu1 %v789_v32  ;;  %707 = vmatprep.subr.bf16.mxu0 %v790_v33 }
  0x32   : > { %729 = vmatprep.subr.bf16.mxu1 %v791_v34 }
  0x34   : > { %708 = vmatpush3.bf16.msra.mxu0 %v792_v35 }
  0x35   : > { %730 = vmatpush3.bf16.msra.mxu1 %v793_v36 }
  0x37   : > { %512 = vmatmul.mubr.bf16.vlgmr.msra.gmra.mxu0 %v651_v37 }
  0x38   : > { %552 = vmatmul.mubr.bf16.vlgmr.msra.gmra.mxu1 %v653_v38 }
  0xf7   : > { %v709_v39 = vpop.f32.mrf.mxu0 }
  0xf8   : > { %v731_v40 = vpop.f32.mrf.mxu1 }
  0xf9   : > { %v710_v41 = vpop.f32.mrf.mxu0 }
  0xfa   : > { %v711_v42 = vadd.f32 %v710_v41, %v709_v39  ;;  %v732_v43 = vpop.f32.mrf.mxu1 }
  0xfb   : > { %v733_v44 = vadd.f32 %v732_v43, %v731_v40  ;;  %v712_v45 = vpop.f32.mrf.mxu0 }
  0xfc   : > { %v734_v47 = vpop.f32.mrf.mxu1 }
  0xfd   : > { %v554_v48 = vadd.f32 %v733_v44, %v711_v42  ;;  %v713_v49 = vpop.f32.mrf.mxu0  ;;  %564 = sbr.rel (%p687_p6) target bundleno = 268 (0x10c), region = 40 }
  0xfe   : > { %v735_v50 = vpop.f32.mrf.mxu1 }
  0xff   : > { %v559_v51 = vadd.f32 %v554_v48, %v203_v46 }
 0x101   : > { %560 = vst [vmem:[#allocation2] sm:$0xff] %v559_v51 }
 0x102   : > { %v688_v53 = vld [vmem:[%s936_s2] ss:$0 sm:$0xff] }
 0x108   : > { %v565_v52 = vld [vmem:[#allocation2] sm:$0xff] }
 0x109   : > { %v573_v54 = vadd.f32 %v688_v53, %v565_v52 }
 0x10b   : > { %574 = vst [vmem:[%s937_s3] sm:$0xff] %v573_v54 }
 0x10c PF: > { %s13_s14 = sadd.s32 1, %s820_s14   ;;  %s938_s12 = smov %s816_s13 }
 0x10d   : > { %p10_p7 = scmp.ge.s32.totalorder %s13_s14, 18   ;;  %s939_s13 = smov %s941_s15 }
 0x10f   :  { %12 = sbr.rel (!%p10_p7) target bundleno = 2 (0x2), region = 71 }

</bundles_post_ra>
